<compile_context>
chip_gen: v7x
topology: tpu7x:2x2x1
jax: 0.10.0
libtpu: 0.0.40
codegen_flags: <defaults>
</compile_context>

<pallas_src>
import jax
import jax.numpy as jnp
from jax import lax
from jax.experimental import pallas as pl
from jax.experimental.pallas import tpu as pltpu

VMEM_SPEC = pl.BlockSpec(memory_space=pltpu.MemorySpace.VMEM)


# ------------------------------ fused kernel ------------------------------
def _make_siamese_kernel(T, B, Bp, Hp):
    inv_n = 1.0 / float(T * B)  # true per-feature sample count (padded batch rows are zero)

    def kernel(x_ref, gamma_ref, beta_ref,
               wih0_ref, whh0_ref, b0_ref,
               wih1_ref, whh1_ref, b1_ref,
               out_ref, xp_ref, seq0_ref):
        # ---- BatchNorm1d (training-mode batch stats), one-pass mean/var ----
        x = x_ref[...]                                       # (T*Bp, F) f32, time-major
        mean = jnp.sum(x, axis=0, keepdims=True) * inv_n
        ex2 = jnp.sum(x * x, axis=0, keepdims=True) * inv_n
        var = ex2 - mean * mean                              # biased variance (torch)
        scale = gamma_ref[...] * lax.rsqrt(var + 1e-5)
        shift = beta_ref[...] - mean * scale
        xn = x * scale + shift                               # affine apply stays in vregs

        # ---- layer-0 input projection hoisted out of the recurrence (+ bias folded once) ----
        xp_ref[...] = (
            jnp.dot(xn, wih0_ref[...], preferred_element_type=jnp.float32) + b0_ref[...]
        )

        def lstm_cell(gates, c):
            # gate blocks are Hp(=128)-lane aligned -> full-vreg slices, no lane shuffles
            i_g = jax.nn.sigmoid(gates[:, 0 * Hp:1 * Hp])
            f_g = jax.nn.sigmoid(gates[:, 1 * Hp:2 * Hp])
            g_g = jnp.tanh(gates[:, 2 * Hp:3 * Hp])
            o_g = jax.nn.sigmoid(gates[:, 3 * Hp:4 * Hp])
            c_new = f_g * c + i_g * g_g
            h_new = o_g * jnp.tanh(c_new)
            return h_new, c_new

        # ---- layer 0 recurrence: only h @ Whh inside the serial loop ----
        h = jnp.zeros((Bp, Hp), jnp.float32)
        c = jnp.zeros((Bp, Hp), jnp.float32)
        for t in range(T):  # fully unrolled, static slice starts (multiples of 8 sublanes)
            g = xp_ref[t * Bp:(t + 1) * Bp, :] + jnp.dot(
                h.astype(jnp.bfloat16), whh0_ref[...],
                preferred_element_type=jnp.float32)
            h, c = lstm_cell(g, c)
            seq0_ref[t * Bp:(t + 1) * Bp, :] = h             # layer-0 sequence kept in VMEM

        # ---- layer-1 input projection hoisted: one (T*Bp, Hp) x (Hp, 4Hp) matmul ----
        xp_ref[...] = (
            jnp.dot(seq0_ref[...].astype(jnp.bfloat16), wih1_ref[...],
                    preferred_element_type=jnp.float32) + b1_ref[...]
        )

        # ---- layer 1 recurrence ----
        h = jnp.zeros((Bp, Hp), jnp.float32)
        c = jnp.zeros((Bp, Hp), jnp.float32)
        for t in range(T):
            g = xp_ref[t * Bp:(t + 1) * Bp, :] + jnp.dot(
                h.astype(jnp.bfloat16), whh1_ref[...],
                preferred_element_type=jnp.float32)
            h, c = lstm_cell(g, c)

        out_ref[...] = h  # final hidden state of layer 2 == torch h_n[1]

    return kernel


# --------------------------- parameter layout prep ---------------------------
def _pad_gate_cols(w, H, Hp):
    """(rows, 4H) -> (rows, 4Hp): each gate block placed at a 128-aligned lane offset."""
    rows = w.shape[0]
    out = jnp.zeros((rows, 4 * Hp), w.dtype)
    for k in range(4):
        out = out.at[:, k * Hp:k * Hp + H].set(w[:, k * H:(k + 1) * H])
    return out


def _pad_rows(w, Hp):
    return jnp.zeros((Hp, w.shape[1]), w.dtype).at[:w.shape[0], :].set(w)


# --------------------------------- forward ---------------------------------
def siamese_forward(data, params):
    B, T, F = data.shape
    H = params["whh0_t"].shape[0]
    Hp = ((H + 127) // 128) * 128     # lane-dense hidden dim
    Bp = ((B + 7) // 8) * 8           # sublane-aligned batch

    # padded / cast parameters (zero-padding keeps padded hidden units exactly zero)
    wih0_p = _pad_gate_cols(params["wih0_t"], H, Hp)                                  # (F, 4Hp) f32
    whh0_p = _pad_rows(_pad_gate_cols(params["whh0_t"], H, Hp), Hp).astype(jnp.bfloat16)
    wih1_p = _pad_rows(_pad_gate_cols(params["wih1_t"], H, Hp), Hp).astype(jnp.bfloat16)
    whh1_p = _pad_rows(_pad_gate_cols(params["whh1_t"], H, Hp), Hp).astype(jnp.bfloat16)
    b0_p = _pad_gate_cols(params["b0"], H, Hp)                                        # (1, 4Hp) f32
    b1_p = _pad_gate_cols(params["b1"], H, Hp)
    gamma = params["bn_gamma"].reshape(1, F)
    beta = params["bn_beta"].reshape(1, F)

    # pad batch with zero rows (BN divides by the true count) and flatten time-major
    if Bp != B:
        data = jnp.pad(data, ((0, Bp - B), (0, 0), (0, 0)))
    x_tm = jnp.transpose(data, (1, 0, 2)).reshape(T * Bp, F)

    kernel = _make_siamese_kernel(T, B, Bp, Hp)
    out = pl.pallas_call(
        kernel,
        out_shape=jax.ShapeDtypeStruct((Bp, Hp), jnp.float32),
        in_specs=[VMEM_SPEC] * 9,
        out_specs=VMEM_SPEC,
        scratch_shapes=[
            pltpu.VMEM((T * Bp, 4 * Hp), jnp.float32),  # hoisted gate pre-activations
            pltpu.VMEM((T * Bp, Hp), jnp.float32),      # layer-0 hidden sequence (VMEM only)
        ],
    )(x_tm, gamma, beta, wih0_p, whh0_p, b0_p, wih1_p, whh1_p, b1_p)
    return out[:B, :H]


# ---------------------------- deterministic params ----------------------------
def init_params(key, input_size, hidden_size):
    k = 1.0 / jnp.sqrt(jnp.float32(hidden_size))
    keys = jax.random.split(key, 10)

    def unif(kk, shape):
        return jax.random.uniform(kk, shape, jnp.float32, -k, k)

    wih0 = unif(keys[0], (4 * hidden_size, input_size))
    whh0 = unif(keys[1], (4 * hidden_size, hidden_size))
    b0 = unif(keys[2], (4 * hidden_size,)) + unif(keys[3], (4 * hidden_size,))
    wih1 = unif(keys[4], (4 * hidden_size, hidden_size))
    whh1 = unif(keys[5], (4 * hidden_size, hidden_size))
    b1 = unif(keys[6], (4 * hidden_size,)) + unif(keys[7], (4 * hidden_size,))
    bn_gamma = 1.0 + 0.1 * jax.random.normal(keys[8], (input_size,), jnp.float32)
    bn_beta = 0.1 * jax.random.normal(keys[9], (input_size,), jnp.float32)

    return {
        "wih0_t": wih0.T, "whh0_t": whh0.T, "b0": b0.reshape(1, -1),
        "wih1_t": wih1.T, "whh1_t": whh1.T, "b1": b1.reshape(1, -1),
        "bn_gamma": bn_gamma, "bn_beta": bn_beta,
    }


# ------------------------------ pure-JAX reference ------------------------------
def reference_forward(data, params):
    B, T, F = data.shape
    mean = jnp.mean(data, axis=(0, 1), keepdims=True)
    var = jnp.mean((data - mean) ** 2, axis=(0, 1), keepdims=True)
    x = (data - mean) * lax.rsqrt(var + 1e-5)
    x = x * params["bn_gamma"].reshape(1, 1, F) + params["bn_beta"].reshape(1, 1, F)

    def run_layer(xs, wih_t, whh_t, b):
        H = whh_t.shape[0]
        h = jnp.zeros((B, H), jnp.float32)
        c = jnp.zeros((B, H), jnp.float32)
        outs = []
        for t in range(xs.shape[1]):
            g = (xs[:, t, :] @ wih_t + h @ whh_t + b).astype(jnp.float32)
            i_g = jax.nn.sigmoid(g[:, 0 * H:1 * H])
            f_g = jax.nn.sigmoid(g[:, 1 * H:2 * H])
            g_g = jnp.tanh(g[:, 2 * H:3 * H])
            o_g = jax.nn.sigmoid(g[:, 3 * H:4 * H])
            c = f_g * c + i_g * g_g
            h = o_g * jnp.tanh(c)
            outs.append(h)
        return jnp.stack(outs, axis=1), h

    seq0, _ = run_layer(x, params["wih0_t"], params["whh0_t"], params["b0"])
    _, h1 = run_layer(seq0, params["wih1_t"], params["whh1_t"], params["b1"])
    return h1


if __name__ == "__main__":
    B, T, INPUT_SIZE, HIDDEN_SIZE = 2, 8, 4, 32  # num_layers fixed at 2 (forward reads h_n[1])

    key = jax.random.PRNGKey(0)
    k_data, k_params = jax.random.split(key)
    data = jax.random.normal(k_data, (B, T, INPUT_SIZE), jnp.float32)
    params = init_params(k_params, INPUT_SIZE, HIDDEN_SIZE)

    fwd = jax.jit(siamese_forward)
    out = jax.block_until_ready(fwd(data, params))
    assert out.shape == (B, HIDDEN_SIZE), out.shape

    ref = reference_forward(data, params)
    err = float(jnp.max(jnp.abs(out - ref)))
    assert jnp.allclose(out, ref, rtol=5e-2, atol=5e-2), err

    print("KERNEL_OK")
</pallas_src>

<mosaic_0001>
module attributes {stable_mosaic.version = 11 : i64} {
  func.func @kernel(%arg0: memref<64x4xf32, #tpu.memory_space<vmem>>, %arg1: memref<1x4xf32, #tpu.memory_space<vmem>>, %arg2: memref<1x4xf32, #tpu.memory_space<vmem>>, %arg3: memref<4x512xf32, #tpu.memory_space<vmem>>, %arg4: memref<128x512xbf16, #tpu.memory_space<vmem>>, %arg5: memref<1x512xf32, #tpu.memory_space<vmem>>, %arg6: memref<128x512xbf16, #tpu.memory_space<vmem>>, %arg7: memref<128x512xbf16, #tpu.memory_space<vmem>>, %arg8: memref<1x512xf32, #tpu.memory_space<vmem>>, %arg9: memref<8x128xf32, #tpu.memory_space<vmem>>, %arg10: memref<64x512xf32, #tpu.memory_space<vmem>>, %arg11: memref<64x128xf32, #tpu.memory_space<vmem>>) attributes {dimension_semantics = [], scalar_prefetch = 0 : i64, scratch_operands = 2 : i64, tpu.core_type = #tpu.core_type<tc>} {
    %c0 = arith.constant 0 : index
    %c0_0 = arith.constant 0 : index
    %0 = vector.load %arg0[%c0, %c0_0] : memref<64x4xf32, #tpu.memory_space<vmem>>, vector<64x4xf32>
    %cst = arith.constant dense<0.000000e+00> : vector<4xf32>
    %1 = vector.multi_reduction <add>, %0, %cst [0] : vector<64x4xf32> to vector<4xf32>
    %2 = vector.shape_cast %1 : vector<4xf32> to vector<1x4xf32>
    %cst_1 = arith.constant 6.250000e-02 : f32
    %3 = vector.broadcast %cst_1 : f32 to vector<1x4xf32>
    %4 = arith.mulf %2, %3 : vector<1x4xf32>
    %5 = arith.mulf %0, %0 : vector<64x4xf32>
    %cst_2 = arith.constant dense<0.000000e+00> : vector<4xf32>
    %6 = vector.multi_reduction <add>, %5, %cst_2 [0] : vector<64x4xf32> to vector<4xf32>
    %7 = vector.shape_cast %6 : vector<4xf32> to vector<1x4xf32>
    %cst_3 = arith.constant 6.250000e-02 : f32
    %8 = vector.broadcast %cst_3 : f32 to vector<1x4xf32>
    %9 = arith.mulf %7, %8 : vector<1x4xf32>
    %10 = arith.mulf %4, %4 : vector<1x4xf32>
    %11 = arith.subf %9, %10 : vector<1x4xf32>
    %c0_4 = arith.constant 0 : index
    %c0_5 = arith.constant 0 : index
    %12 = vector.load %arg1[%c0_4, %c0_5] : memref<1x4xf32, #tpu.memory_space<vmem>>, vector<1x4xf32>
    %cst_6 = arith.constant 9.99999974E-6 : f32
    %13 = vector.broadcast %cst_6 : f32 to vector<1x4xf32>
    %14 = arith.addf %11, %13 : vector<1x4xf32>
    %15 = math.rsqrt %14 : vector<1x4xf32>
    %16 = arith.mulf %12, %15 : vector<1x4xf32>
    %c0_7 = arith.constant 0 : index
    %c0_8 = arith.constant 0 : index
    %17 = vector.load %arg2[%c0_7, %c0_8] : memref<1x4xf32, #tpu.memory_space<vmem>>, vector<1x4xf32>
    %18 = arith.mulf %4, %16 : vector<1x4xf32>
    %19 = arith.subf %17, %18 : vector<1x4xf32>
    %20 = vector.broadcast %16 : vector<1x4xf32> to vector<64x4xf32>
    %21 = arith.mulf %0, %20 : vector<64x4xf32>
    %22 = vector.broadcast %19 : vector<1x4xf32> to vector<64x4xf32>
    %23 = arith.addf %21, %22 : vector<64x4xf32>
    %c0_9 = arith.constant 0 : index
    %c0_10 = arith.constant 0 : index
    %24 = vector.load %arg3[%c0_9, %c0_10] : memref<4x512xf32, #tpu.memory_space<vmem>>, vector<4x512xf32>
    %cst_11 = arith.constant dense<0.000000e+00> : vector<64x512xf32>
    %25 = tpu.matmul %23, %24, %cst_11 {dimension_numbers = #tpu.dot_dimension_numbers<[1], [0], [0], [1], [0, 0, 1, 1], [], []>} : vector<64x4xf32>, vector<4x512xf32>, vector<64x512xf32> -> vector<64x512xf32>
    %c0_12 = arith.constant 0 : index
    %c0_13 = arith.constant 0 : index
    %26 = vector.load %arg5[%c0_12, %c0_13] : memref<1x512xf32, #tpu.memory_space<vmem>>, vector<1x512xf32>
    %27 = vector.broadcast %26 : vector<1x512xf32> to vector<64x512xf32>
    %28 = arith.addf %25, %27 : vector<64x512xf32>
    %c0_14 = arith.constant 0 : index
    %c0_15 = arith.constant 0 : index
    %29 = vector.load %arg10[%c0_14, %c0_15] : memref<64x512xf32, #tpu.memory_space<vmem>>, vector<64x512xf32>
    tpu.vector_store %arg10[%c0_14, %c0_15], %28 {strides = array<i32>} : memref<64x512xf32, #tpu.memory_space<vmem>>, vector<64x512xf32>,
    %cst_16 = arith.constant 0.000000e+00 : f32
    %30 = vector.broadcast %cst_16 : f32 to vector<8x128xf32>
    %cst_17 = arith.constant 0.000000e+00 : f32
    %31 = vector.broadcast %cst_17 : f32 to vector<8x128xf32>
    %c0_18 = arith.constant 0 : index
    %c0_19 = arith.constant 0 : index
    %32 = vector.load %arg10[%c0_18, %c0_19] : memref<64x512xf32, #tpu.memory_space<vmem>>, vector<8x512xf32>
    %33 = arith.truncf %30 : vector<8x128xf32> to vector<8x128xbf16>
    %c0_20 = arith.constant 0 : index
    %c0_21 = arith.constant 0 : index
    %34 = vector.load %arg4[%c0_20, %c0_21] : memref<128x512xbf16, #tpu.memory_space<vmem>>, vector<128x512xbf16>
    %cst_22 = arith.constant dense<0.000000e+00> : vector<8x512xf32>
    %35 = tpu.matmul %33, %34, %cst_22 {dimension_numbers = #tpu.dot_dimension_numbers<[1], [0], [0], [1], [0, 0, 1, 1], [], []>} : vector<8x128xbf16>, vector<128x512xbf16>, vector<8x512xf32> -> vector<8x512xf32>
    %36 = arith.addf %32, %35 : vector<8x512xf32>
    %37 = vector.extract_strided_slice %36 {offsets = [0, 0], sizes = [8, 128], strides = [1, 1]} : vector<8x512xf32> to vector<8x128xf32>
    %38 = arith.negf %37 : vector<8x128xf32>
    %39 = math.exp %38 : vector<8x128xf32>
    %cst_23 = arith.constant 1.000000e+00 : f32
    %40 = vector.broadcast %cst_23 : f32 to vector<8x128xf32>
    %41 = arith.addf %40, %39 : vector<8x128xf32>
    %42 = arith.divf %40, %41 : vector<8x128xf32>
    %43 = vector.extract_strided_slice %36 {offsets = [0, 128], sizes = [8, 128], strides = [1, 1]} : vector<8x512xf32> to vector<8x128xf32>
    %44 = arith.negf %43 : vector<8x128xf32>
    %45 = math.exp %44 : vector<8x128xf32>
    %cst_24 = arith.constant 1.000000e+00 : f32
    %46 = vector.broadcast %cst_24 : f32 to vector<8x128xf32>
    %47 = arith.addf %46, %45 : vector<8x128xf32>
    %48 = arith.divf %46, %47 : vector<8x128xf32>
    %49 = vector.extract_strided_slice %36 {offsets = [0, 256], sizes = [8, 128], strides = [1, 1]} : vector<8x512xf32> to vector<8x128xf32>
    %50 = math.tanh %49 : vector<8x128xf32>
    %51 = vector.extract_strided_slice %36 {offsets = [0, 384], sizes = [8, 128], strides = [1, 1]} : vector<8x512xf32> to vector<8x128xf32>
    %52 = arith.negf %51 : vector<8x128xf32>
    %53 = math.exp %52 : vector<8x128xf32>
    %cst_25 = arith.constant 1.000000e+00 : f32
    %54 = vector.broadcast %cst_25 : f32 to vector<8x128xf32>
    %55 = arith.addf %54, %53 : vector<8x128xf32>
    %56 = arith.divf %54, %55 : vector<8x128xf32>
    %57 = arith.mulf %48, %31 : vector<8x128xf32>
    %58 = arith.mulf %42, %50 : vector<8x128xf32>
    %59 = arith.addf %57, %58 : vector<8x128xf32>
    %60 = math.tanh %59 : vector<8x128xf32>
    %61 = arith.mulf %56, %60 : vector<8x128xf32>
    %c0_26 = arith.constant 0 : index
    %c0_27 = arith.constant 0 : index
    %62 = vector.load %arg11[%c0_26, %c0_27] : memref<64x128xf32, #tpu.memory_space<vmem>>, vector<8x128xf32>
    tpu.vector_store %arg11[%c0_26, %c0_27], %61 {strides = array<i32>} : memref<64x128xf32, #tpu.memory_space<vmem>>, vector<8x128xf32>,
    %c8 = arith.constant 8 : index
    %c0_28 = arith.constant 0 : index
    %63 = vector.load %arg10[%c8, %c0_28] : memref<64x512xf32, #tpu.memory_space<vmem>>, vector<8x512xf32>
    %64 = arith.truncf %61 : vector<8x128xf32> to vector<8x128xbf16>
    %c0_29 = arith.constant 0 : index
    %c0_30 = arith.constant 0 : index
    %65 = vector.load %arg4[%c0_29, %c0_30] : memref<128x512xbf16, #tpu.memory_space<vmem>>, vector<128x512xbf16>
    %cst_31 = arith.constant dense<0.000000e+00> : vector<8x512xf32>
    %66 = tpu.matmul %64, %65, %cst_31 {dimension_numbers = #tpu.dot_dimension_numbers<[1], [0], [0], [1], [0, 0, 1, 1], [], []>} : vector<8x128xbf16>, vector<128x512xbf16>, vector<8x512xf32> -> vector<8x512xf32>
    %67 = arith.addf %63, %66 : vector<8x512xf32>
    %68 = vector.extract_strided_slice %67 {offsets = [0, 0], sizes = [8, 128], strides = [1, 1]} : vector<8x512xf32> to vector<8x128xf32>
    %69 = arith.negf %68 : vector<8x128xf32>
    %70 = math.exp %69 : vector<8x128xf32>
    %cst_32 = arith.constant 1.000000e+00 : f32
    %71 = vector.broadcast %cst_32 : f32 to vector<8x128xf32>
    %72 = arith.addf %71, %70 : vector<8x128xf32>
    %73 = arith.divf %71, %72 : vector<8x128xf32>
    %74 = vector.extract_strided_slice %67 {offsets = [0, 128], sizes = [8, 128], strides = [1, 1]} : vector<8x512xf32> to vector<8x128xf32>
    %75 = arith.negf %74 : vector<8x128xf32>
    %76 = math.exp %75 : vector<8x128xf32>
    %cst_33 = arith.constant 1.000000e+00 : f32
    %77 = vector.broadcast %cst_33 : f32 to vector<8x128xf32>
    %78 = arith.addf %77, %76 : vector<8x128xf32>
    %79 = arith.divf %77, %78 : vector<8x128xf32>
    %80 = vector.extract_strided_slice %67 {offsets = [0, 256], sizes = [8, 128], strides = [1, 1]} : vector<8x512xf32> to vector<8x128xf32>
    %81 = math.tanh %80 : vector<8x128xf32>
    %82 = vector.extract_strided_slice %67 {offsets = [0, 384], sizes = [8, 128], strides = [1, 1]} : vector<8x512xf32> to vector<8x128xf32>
    %83 = arith.negf %82 : vector<8x128xf32>
    %84 = math.exp %83 : vector<8x128xf32>
    %cst_34 = arith.constant 1.000000e+00 : f32
    %85 = vector.broadcast %cst_34 : f32 to vector<8x128xf32>
    %86 = arith.addf %85, %84 : vector<8x128xf32>
    %87 = arith.divf %85, %86 : vector<8x128xf32>
    %88 = arith.mulf %79, %59 : vector<8x128xf32>
    %89 = arith.mulf %73, %81 : vector<8x128xf32>
    %90 = arith.addf %88, %89 : vector<8x128xf32>
    %91 = math.tanh %90 : vector<8x128xf32>
    %92 = arith.mulf %87, %91 : vector<8x128xf32>
    %c8_35 = arith.constant 8 : index
    %c0_36 = arith.constant 0 : index
    %93 = vector.load %arg11[%c8_35, %c0_36] : memref<64x128xf32, #tpu.memory_space<vmem>>, vector<8x128xf32>
    tpu.vector_store %arg11[%c8_35, %c0_36], %92 {strides = array<i32>} : memref<64x128xf32, #tpu.memory_space<vmem>>, vector<8x128xf32>,
    %c16 = arith.constant 16 : index
    %c0_37 = arith.constant 0 : index
    %94 = vector.load %arg10[%c16, %c0_37] : memref<64x512xf32, #tpu.memory_space<vmem>>, vector<8x512xf32>
    %95 = arith.truncf %92 : vector<8x128xf32> to vector<8x128xbf16>
    %c0_38 = arith.constant 0 : index
    %c0_39 = arith.constant 0 : index
    %96 = vector.load %arg4[%c0_38, %c0_39] : memref<128x512xbf16, #tpu.memory_space<vmem>>, vector<128x512xbf16>
    %cst_40 = arith.constant dense<0.000000e+00> : vector<8x512xf32>
    %97 = tpu.matmul %95, %96, %cst_40 {dimension_numbers = #tpu.dot_dimension_numbers<[1], [0], [0], [1], [0, 0, 1, 1], [], []>} : vector<8x128xbf16>, vector<128x512xbf16>, vector<8x512xf32> -> vector<8x512xf32>
    %98 = arith.addf %94, %97 : vector<8x512xf32>
    %99 = vector.extract_strided_slice %98 {offsets = [0, 0], sizes = [8, 128], strides = [1, 1]} : vector<8x512xf32> to vector<8x128xf32>
    %100 = arith.negf %99 : vector<8x128xf32>
    %101 = math.exp %100 : vector<8x128xf32>
    %cst_41 = arith.constant 1.000000e+00 : f32
    %102 = vector.broadcast %cst_41 : f32 to vector<8x128xf32>
    %103 = arith.addf %102, %101 : vector<8x128xf32>
    %104 = arith.divf %102, %103 : vector<8x128xf32>
    %105 = vector.extract_strided_slice %98 {offsets = [0, 128], sizes = [8, 128], strides = [1, 1]} : vector<8x512xf32> to vector<8x128xf32>
    %106 = arith.negf %105 : vector<8x128xf32>
    %107 = math.exp %106 : vector<8x128xf32>
    %cst_42 = arith.constant 1.000000e+00 : f32
    %108 = vector.broadcast %cst_42 : f32 to vector<8x128xf32>
    %109 = arith.addf %108, %107 : vector<8x128xf32>
    %110 = arith.divf %108, %109 : vector<8x128xf32>
    %111 = vector.extract_strided_slice %98 {offsets = [0, 256], sizes = [8, 128], strides = [1, 1]} : vector<8x512xf32> to vector<8x128xf32>
    %112 = math.tanh %111 : vector<8x128xf32>
    %113 = vector.extract_strided_slice %98 {offsets = [0, 384], sizes = [8, 128], strides = [1, 1]} : vector<8x512xf32> to vector<8x128xf32>
    %114 = arith.negf %113 : vector<8x128xf32>
    %115 = math.exp %114 : vector<8x128xf32>
    %cst_43 = arith.constant 1.000000e+00 : f32
    %116 = vector.broadcast %cst_43 : f32 to vector<8x128xf32>
    %117 = arith.addf %116, %115 : vector<8x128xf32>
    %118 = arith.divf %116, %117 : vector<8x128xf32>
    %119 = arith.mulf %110, %90 : vector<8x128xf32>
    %120 = arith.mulf %104, %112 : vector<8x128xf32>
    %121 = arith.addf %119, %120 : vector<8x128xf32>
    %122 = math.tanh %121 : vector<8x128xf32>
    %123 = arith.mulf %118, %122 : vector<8x128xf32>
    %c16_44 = arith.constant 16 : index
    %c0_45 = arith.constant 0 : index
    %124 = vector.load %arg11[%c16_44, %c0_45] : memref<64x128xf32, #tpu.memory_space<vmem>>, vector<8x128xf32>
    tpu.vector_store %arg11[%c16_44, %c0_45], %123 {strides = array<i32>} : memref<64x128xf32, #tpu.memory_space<vmem>>, vector<8x128xf32>,
    %c24 = arith.constant 24 : index
    %c0_46 = arith.constant 0 : index
    %125 = vector.load %arg10[%c24, %c0_46] : memref<64x512xf32, #tpu.memory_space<vmem>>, vector<8x512xf32>
    %126 = arith.truncf %123 : vector<8x128xf32> to vector<8x128xbf16>
    %c0_47 = arith.constant 0 : index
    %c0_48 = arith.constant 0 : index
    %127 = vector.load %arg4[%c0_47, %c0_48] : memref<128x512xbf16, #tpu.memory_space<vmem>>, vector<128x512xbf16>
    %cst_49 = arith.constant dense<0.000000e+00> : vector<8x512xf32>
    %128 = tpu.matmul %126, %127, %cst_49 {dimension_numbers = #tpu.dot_dimension_numbers<[1], [0], [0], [1], [0, 0, 1, 1], [], []>} : vector<8x128xbf16>, vector<128x512xbf16>, vector<8x512xf32> -> vector<8x512xf32>
    %129 = arith.addf %125, %128 : vector<8x512xf32>
    %130 = vector.extract_strided_slice %129 {offsets = [0, 0], sizes = [8, 128], strides = [1, 1]} : vector<8x512xf32> to vector<8x128xf32>
    %131 = arith.negf %130 : vector<8x128xf32>
    %132 = math.exp %131 : vector<8x128xf32>
    %cst_50 = arith.constant 1.000000e+00 : f32
    %133 = vector.broadcast %cst_50 : f32 to vector<8x128xf32>
    %134 = arith.addf %133, %132 : vector<8x128xf32>
    %135 = arith.divf %133, %134 : vector<8x128xf32>
    %136 = vector.extract_strided_slice %129 {offsets = [0, 128], sizes = [8, 128], strides = [1, 1]} : vector<8x512xf32> to vector<8x128xf32>
    %137 = arith.negf %136 : vector<8x128xf32>
    %138 = math.exp %137 : vector<8x128xf32>
    %cst_51 = arith.constant 1.000000e+00 : f32
    %139 = vector.broadcast %cst_51 : f32 to vector<8x128xf32>
    %140 = arith.addf %139, %138 : vector<8x128xf32>
    %141 = arith.divf %139, %140 : vector<8x128xf32>
    %142 = vector.extract_strided_slice %129 {offsets = [0, 256], sizes = [8, 128], strides = [1, 1]} : vector<8x512xf32> to vector<8x128xf32>
    %143 = math.tanh %142 : vector<8x128xf32>
    %144 = vector.extract_strided_slice %129 {offsets = [0, 384], sizes = [8, 128], strides = [1, 1]} : vector<8x512xf32> to vector<8x128xf32>
    %145 = arith.negf %144 : vector<8x128xf32>
    %146 = math.exp %145 : vector<8x128xf32>
    %cst_52 = arith.constant 1.000000e+00 : f32
    %147 = vector.broadcast %cst_52 : f32 to vector<8x128xf32>
    %148 = arith.addf %147, %146 : vector<8x128xf32>
    %149 = arith.divf %147, %148 : vector<8x128xf32>
    %150 = arith.mulf %141, %121 : vector<8x128xf32>
    %151 = arith.mulf %135, %143 : vector<8x128xf32>
    %152 = arith.addf %150, %151 : vector<8x128xf32>
    %153 = math.tanh %152 : vector<8x128xf32>
    %154 = arith.mulf %149, %153 : vector<8x128xf32>
    %c24_53 = arith.constant 24 : index
    %c0_54 = arith.constant 0 : index
    %155 = vector.load %arg11[%c24_53, %c0_54] : memref<64x128xf32, #tpu.memory_space<vmem>>, vector<8x128xf32>
    tpu.vector_store %arg11[%c24_53, %c0_54], %154 {strides = array<i32>} : memref<64x128xf32, #tpu.memory_space<vmem>>, vector<8x128xf32>,
    %c32 = arith.constant 32 : index
    %c0_55 = arith.constant 0 : index
    %156 = vector.load %arg10[%c32, %c0_55] : memref<64x512xf32, #tpu.memory_space<vmem>>, vector<8x512xf32>
    %157 = arith.truncf %154 : vector<8x128xf32> to vector<8x128xbf16>
    %c0_56 = arith.constant 0 : index
    %c0_57 = arith.constant 0 : index
    %158 = vector.load %arg4[%c0_56, %c0_57] : memref<128x512xbf16, #tpu.memory_space<vmem>>, vector<128x512xbf16>
    %cst_58 = arith.constant dense<0.000000e+00> : vector<8x512xf32>
    %159 = tpu.matmul %157, %158, %cst_58 {dimension_numbers = #tpu.dot_dimension_numbers<[1], [0], [0], [1], [0, 0, 1, 1], [], []>} : vector<8x128xbf16>, vector<128x512xbf16>, vector<8x512xf32> -> vector<8x512xf32>
    %160 = arith.addf %156, %159 : vector<8x512xf32>
    %161 = vector.extract_strided_slice %160 {offsets = [0, 0], sizes = [8, 128], strides = [1, 1]} : vector<8x512xf32> to vector<8x128xf32>
    %162 = arith.negf %161 : vector<8x128xf32>
    %163 = math.exp %162 : vector<8x128xf32>
    %cst_59 = arith.constant 1.000000e+00 : f32
    %164 = vector.broadcast %cst_59 : f32 to vector<8x128xf32>
    %165 = arith.addf %164, %163 : vector<8x128xf32>
    %166 = arith.divf %164, %165 : vector<8x128xf32>
    %167 = vector.extract_strided_slice %160 {offsets = [0, 128], sizes = [8, 128], strides = [1, 1]} : vector<8x512xf32> to vector<8x128xf32>
    %168 = arith.negf %167 : vector<8x128xf32>
    %169 = math.exp %168 : vector<8x128xf32>
    %cst_60 = arith.constant 1.000000e+00 : f32
    %170 = vector.broadcast %cst_60 : f32 to vector<8x128xf32>
    %171 = arith.addf %170, %169 : vector<8x128xf32>
    %172 = arith.divf %170, %171 : vector<8x128xf32>
    %173 = vector.extract_strided_slice %160 {offsets = [0, 256], sizes = [8, 128], strides = [1, 1]} : vector<8x512xf32> to vector<8x128xf32>
    %174 = math.tanh %173 : vector<8x128xf32>
    %175 = vector.extract_strided_slice %160 {offsets = [0, 384], sizes = [8, 128], strides = [1, 1]} : vector<8x512xf32> to vector<8x128xf32>
    %176 = arith.negf %175 : vector<8x128xf32>
    %177 = math.exp %176 : vector<8x128xf32>
    %cst_61 = arith.constant 1.000000e+00 : f32
    %178 = vector.broadcast %cst_61 : f32 to vector<8x128xf32>
    %179 = arith.addf %178, %177 : vector<8x128xf32>
    %180 = arith.divf %178, %179 : vector<8x128xf32>
    %181 = arith.mulf %172, %152 : vector<8x128xf32>
    %182 = arith.mulf %166, %174 : vector<8x128xf32>
    %183 = arith.addf %181, %182 : vector<8x128xf32>
    %184 = math.tanh %183 : vector<8x128xf32>
    %185 = arith.mulf %180, %184 : vector<8x128xf32>
    %c32_62 = arith.constant 32 : index
    %c0_63 = arith.constant 0 : index
    %186 = vector.load %arg11[%c32_62, %c0_63] : memref<64x128xf32, #tpu.memory_space<vmem>>, vector<8x128xf32>
    tpu.vector_store %arg11[%c32_62, %c0_63], %185 {strides = array<i32>} : memref<64x128xf32, #tpu.memory_space<vmem>>, vector<8x128xf32>,
    %c40 = arith.constant 40 : index
    %c0_64 = arith.constant 0 : index
    %187 = vector.load %arg10[%c40, %c0_64] : memref<64x512xf32, #tpu.memory_space<vmem>>, vector<8x512xf32>
    %188 = arith.truncf %185 : vector<8x128xf32> to vector<8x128xbf16>
    %c0_65 = arith.constant 0 : index
    %c0_66 = arith.constant 0 : index
    %189 = vector.load %arg4[%c0_65, %c0_66] : memref<128x512xbf16, #tpu.memory_space<vmem>>, vector<128x512xbf16>
    %cst_67 = arith.constant dense<0.000000e+00> : vector<8x512xf32>
    %190 = tpu.matmul %188, %189, %cst_67 {dimension_numbers = #tpu.dot_dimension_numbers<[1], [0], [0], [1], [0, 0, 1, 1], [], []>} : vector<8x128xbf16>, vector<128x512xbf16>, vector<8x512xf32> -> vector<8x512xf32>
    %191 = arith.addf %187, %190 : vector<8x512xf32>
    %192 = vector.extract_strided_slice %191 {offsets = [0, 0], sizes = [8, 128], strides = [1, 1]} : vector<8x512xf32> to vector<8x128xf32>
    %193 = arith.negf %192 : vector<8x128xf32>
    %194 = math.exp %193 : vector<8x128xf32>
    %cst_68 = arith.constant 1.000000e+00 : f32
    %195 = vector.broadcast %cst_68 : f32 to vector<8x128xf32>
    %196 = arith.addf %195, %194 : vector<8x128xf32>
    %197 = arith.divf %195, %196 : vector<8x128xf32>
    %198 = vector.extract_strided_slice %191 {offsets = [0, 128], sizes = [8, 128], strides = [1, 1]} : vector<8x512xf32> to vector<8x128xf32>
    %199 = arith.negf %198 : vector<8x128xf32>
    %200 = math.exp %199 : vector<8x128xf32>
    %cst_69 = arith.constant 1.000000e+00 : f32
    %201 = vector.broadcast %cst_69 : f32 to vector<8x128xf32>
    %202 = arith.addf %201, %200 : vector<8x128xf32>
    %203 = arith.divf %201, %202 : vector<8x128xf32>
    %204 = vector.extract_strided_slice %191 {offsets = [0, 256], sizes = [8, 128], strides = [1, 1]} : vector<8x512xf32> to vector<8x128xf32>
    %205 = math.tanh %204 : vector<8x128xf32>
    %206 = vector.extract_strided_slice %191 {offsets = [0, 384], sizes = [8, 128], strides = [1, 1]} : vector<8x512xf32> to vector<8x128xf32>
    %207 = arith.negf %206 : vector<8x128xf32>
    %208 = math.exp %207 : vector<8x128xf32>
    %cst_70 = arith.constant 1.000000e+00 : f32
    %209 = vector.broadcast %cst_70 : f32 to vector<8x128xf32>
    %210 = arith.addf %209, %208 : vector<8x128xf32>
    %211 = arith.divf %209, %210 : vector<8x128xf32>
    %212 = arith.mulf %203, %183 : vector<8x128xf32>
    %213 = arith.mulf %197, %205 : vector<8x128xf32>
    %214 = arith.addf %212, %213 : vector<8x128xf32>
    %215 = math.tanh %214 : vector<8x128xf32>
    %216 = arith.mulf %211, %215 : vector<8x128xf32>
    %c40_71 = arith.constant 40 : index
    %c0_72 = arith.constant 0 : index
    %217 = vector.load %arg11[%c40_71, %c0_72] : memref<64x128xf32, #tpu.memory_space<vmem>>, vector<8x128xf32>
    tpu.vector_store %arg11[%c40_71, %c0_72], %216 {strides = array<i32>} : memref<64x128xf32, #tpu.memory_space<vmem>>, vector<8x128xf32>,
    %c48 = arith.constant 48 : index
    %c0_73 = arith.constant 0 : index
    %218 = vector.load %arg10[%c48, %c0_73] : memref<64x512xf32, #tpu.memory_space<vmem>>, vector<8x512xf32>
    %219 = arith.truncf %216 : vector<8x128xf32> to vector<8x128xbf16>
    %c0_74 = arith.constant 0 : index
    %c0_75 = arith.constant 0 : index
    %220 = vector.load %arg4[%c0_74, %c0_75] : memref<128x512xbf16, #tpu.memory_space<vmem>>, vector<128x512xbf16>
    %cst_76 = arith.constant dense<0.000000e+00> : vector<8x512xf32>
    %221 = tpu.matmul %219, %220, %cst_76 {dimension_numbers = #tpu.dot_dimension_numbers<[1], [0], [0], [1], [0, 0, 1, 1], [], []>} : vector<8x128xbf16>, vector<128x512xbf16>, vector<8x512xf32> -> vector<8x512xf32>
    %222 = arith.addf %218, %221 : vector<8x512xf32>
    %223 = vector.extract_strided_slice %222 {offsets = [0, 0], sizes = [8, 128], strides = [1, 1]} : vector<8x512xf32> to vector<8x128xf32>
    %224 = arith.negf %223 : vector<8x128xf32>
    %225 = math.exp %224 : vector<8x128xf32>
    %cst_77 = arith.constant 1.000000e+00 : f32
    %226 = vector.broadcast %cst_77 : f32 to vector<8x128xf32>
    %227 = arith.addf %226, %225 : vector<8x128xf32>
    %228 = arith.divf %226, %227 : vector<8x128xf32>
    %229 = vector.extract_strided_slice %222 {offsets = [0, 128], sizes = [8, 128], strides = [1, 1]} : vector<8x512xf32> to vector<8x128xf32>
    %230 = arith.negf %229 : vector<8x128xf32>
    %231 = math.exp %230 : vector<8x128xf32>
    %cst_78 = arith.constant 1.000000e+00 : f32
    %232 = vector.broadcast %cst_78 : f32 to vector<8x128xf32>
    %233 = arith.addf %232, %231 : vector<8x128xf32>
    %234 = arith.divf %232, %233 : vector<8x128xf32>
    %235 = vector.extract_strided_slice %222 {offsets = [0, 256], sizes = [8, 128], strides = [1, 1]} : vector<8x512xf32> to vector<8x128xf32>
    %236 = math.tanh %235 : vector<8x128xf32>
    %237 = vector.extract_strided_slice %222 {offsets = [0, 384], sizes = [8, 128], strides = [1, 1]} : vector<8x512xf32> to vector<8x128xf32>
    %238 = arith.negf %237 : vector<8x128xf32>
    %239 = math.exp %238 : vector<8x128xf32>
    %cst_79 = arith.constant 1.000000e+00 : f32
    %240 = vector.broadcast %cst_79 : f32 to vector<8x128xf32>
    %241 = arith.addf %240, %239 : vector<8x128xf32>
    %242 = arith.divf %240, %241 : vector<8x128xf32>
    %243 = arith.mulf %234, %214 : vector<8x128xf32>
    %244 = arith.mulf %228, %236 : vector<8x128xf32>
    %245 = arith.addf %243, %244 : vector<8x128xf32>
    %246 = math.tanh %245 : vector<8x128xf32>
    %247 = arith.mulf %242, %246 : vector<8x128xf32>
    %c48_80 = arith.constant 48 : index
    %c0_81 = arith.constant 0 : index
    %248 = vector.load %arg11[%c48_80, %c0_81] : memref<64x128xf32, #tpu.memory_space<vmem>>, vector<8x128xf32>
    tpu.vector_store %arg11[%c48_80, %c0_81], %247 {strides = array<i32>} : memref<64x128xf32, #tpu.memory_space<vmem>>, vector<8x128xf32>,
    %c56 = arith.constant 56 : index
    %c0_82 = arith.constant 0 : index
    %249 = vector.load %arg10[%c56, %c0_82] : memref<64x512xf32, #tpu.memory_space<vmem>>, vector<8x512xf32>
    %250 = arith.truncf %247 : vector<8x128xf32> to vector<8x128xbf16>
    %c0_83 = arith.constant 0 : index
    %c0_84 = arith.constant 0 : index
    %251 = vector.load %arg4[%c0_83, %c0_84] : memref<128x512xbf16, #tpu.memory_space<vmem>>, vector<128x512xbf16>
    %cst_85 = arith.constant dense<0.000000e+00> : vector<8x512xf32>
    %252 = tpu.matmul %250, %251, %cst_85 {dimension_numbers = #tpu.dot_dimension_numbers<[1], [0], [0], [1], [0, 0, 1, 1], [], []>} : vector<8x128xbf16>, vector<128x512xbf16>, vector<8x512xf32> -> vector<8x512xf32>
    %253 = arith.addf %249, %252 : vector<8x512xf32>
    %254 = vector.extract_strided_slice %253 {offsets = [0, 0], sizes = [8, 128], strides = [1, 1]} : vector<8x512xf32> to vector<8x128xf32>
    %255 = arith.negf %254 : vector<8x128xf32>
    %256 = math.exp %255 : vector<8x128xf32>
    %cst_86 = arith.constant 1.000000e+00 : f32
    %257 = vector.broadcast %cst_86 : f32 to vector<8x128xf32>
    %258 = arith.addf %257, %256 : vector<8x128xf32>
    %259 = arith.divf %257, %258 : vector<8x128xf32>
    %260 = vector.extract_strided_slice %253 {offsets = [0, 128], sizes = [8, 128], strides = [1, 1]} : vector<8x512xf32> to vector<8x128xf32>
    %261 = arith.negf %260 : vector<8x128xf32>
    %262 = math.exp %261 : vector<8x128xf32>
    %cst_87 = arith.constant 1.000000e+00 : f32
    %263 = vector.broadcast %cst_87 : f32 to vector<8x128xf32>
    %264 = arith.addf %263, %262 : vector<8x128xf32>
    %265 = arith.divf %263, %264 : vector<8x128xf32>
    %266 = vector.extract_strided_slice %253 {offsets = [0, 256], sizes = [8, 128], strides = [1, 1]} : vector<8x512xf32> to vector<8x128xf32>
    %267 = math.tanh %266 : vector<8x128xf32>
    %268 = vector.extract_strided_slice %253 {offsets = [0, 384], sizes = [8, 128], strides = [1, 1]} : vector<8x512xf32> to vector<8x128xf32>
    %269 = arith.negf %268 : vector<8x128xf32>
    %270 = math.exp %269 : vector<8x128xf32>
    %cst_88 = arith.constant 1.000000e+00 : f32
    %271 = vector.broadcast %cst_88 : f32 to vector<8x128xf32>
    %272 = arith.addf %271, %270 : vector<8x128xf32>
    %273 = arith.divf %271, %272 : vector<8x128xf32>
    %274 = arith.mulf %265, %245 : vector<8x128xf32>
    %275 = arith.mulf %259, %267 : vector<8x128xf32>
    %276 = arith.addf %274, %275 : vector<8x128xf32>
    %277 = math.tanh %276 : vector<8x128xf32>
    %278 = arith.mulf %273, %277 : vector<8x128xf32>
    %c56_89 = arith.constant 56 : index
    %c0_90 = arith.constant 0 : index
    %279 = vector.load %arg11[%c56_89, %c0_90] : memref<64x128xf32, #tpu.memory_space<vmem>>, vector<8x128xf32>
    tpu.vector_store %arg11[%c56_89, %c0_90], %278 {strides = array<i32>} : memref<64x128xf32, #tpu.memory_space<vmem>>, vector<8x128xf32>,
    %c0_91 = arith.constant 0 : index
    %c0_92 = arith.constant 0 : index
    %280 = vector.load %arg11[%c0_91, %c0_92] : memref<64x128xf32, #tpu.memory_space<vmem>>, vector<64x128xf32>
    %281 = arith.truncf %280 : vector<64x128xf32> to vector<64x128xbf16>
    %c0_93 = arith.constant 0 : index
    %c0_94 = arith.constant 0 : index
    %282 = vector.load %arg6[%c0_93, %c0_94] : memref<128x512xbf16, #tpu.memory_space<vmem>>, vector<128x512xbf16>
    %cst_95 = arith.constant dense<0.000000e+00> : vector<64x512xf32>
    %283 = tpu.matmul %281, %282, %cst_95 {dimension_numbers = #tpu.dot_dimension_numbers<[1], [0], [0], [1], [0, 0, 1, 1], [], []>} : vector<64x128xbf16>, vector<128x512xbf16>, vector<64x512xf32> -> vector<64x512xf32>
    %c0_96 = arith.constant 0 : index
    %c0_97 = arith.constant 0 : index
    %284 = vector.load %arg8[%c0_96, %c0_97] : memref<1x512xf32, #tpu.memory_space<vmem>>, vector<1x512xf32>
    %285 = vector.broadcast %284 : vector<1x512xf32> to vector<64x512xf32>
    %286 = arith.addf %283, %285 : vector<64x512xf32>
    %c0_98 = arith.constant 0 : index
    %c0_99 = arith.constant 0 : index
    %287 = vector.load %arg10[%c0_98, %c0_99] : memref<64x512xf32, #tpu.memory_space<vmem>>, vector<64x512xf32>
    tpu.vector_store %arg10[%c0_98, %c0_99], %286 {strides = array<i32>} : memref<64x512xf32, #tpu.memory_space<vmem>>, vector<64x512xf32>,
    %cst_100 = arith.constant 0.000000e+00 : f32
    %288 = vector.broadcast %cst_100 : f32 to vector<8x128xf32>
    %cst_101 = arith.constant 0.000000e+00 : f32
    %289 = vector.broadcast %cst_101 : f32 to vector<8x128xf32>
    %c0_102 = arith.constant 0 : index
    %c0_103 = arith.constant 0 : index
    %290 = vector.load %arg10[%c0_102, %c0_103] : memref<64x512xf32, #tpu.memory_space<vmem>>, vector<8x512xf32>
    %291 = arith.truncf %288 : vector<8x128xf32> to vector<8x128xbf16>
    %c0_104 = arith.constant 0 : index
    %c0_105 = arith.constant 0 : index
    %292 = vector.load %arg7[%c0_104, %c0_105] : memref<128x512xbf16, #tpu.memory_space<vmem>>, vector<128x512xbf16>
    %cst_106 = arith.constant dense<0.000000e+00> : vector<8x512xf32>
    %293 = tpu.matmul %291, %292, %cst_106 {dimension_numbers = #tpu.dot_dimension_numbers<[1], [0], [0], [1], [0, 0, 1, 1], [], []>} : vector<8x128xbf16>, vector<128x512xbf16>, vector<8x512xf32> -> vector<8x512xf32>
    %294 = arith.addf %290, %293 : vector<8x512xf32>
    %295 = vector.extract_strided_slice %294 {offsets = [0, 0], sizes = [8, 128], strides = [1, 1]} : vector<8x512xf32> to vector<8x128xf32>
    %296 = arith.negf %295 : vector<8x128xf32>
    %297 = math.exp %296 : vector<8x128xf32>
    %cst_107 = arith.constant 1.000000e+00 : f32
    %298 = vector.broadcast %cst_107 : f32 to vector<8x128xf32>
    %299 = arith.addf %298, %297 : vector<8x128xf32>
    %300 = arith.divf %298, %299 : vector<8x128xf32>
    %301 = vector.extract_strided_slice %294 {offsets = [0, 128], sizes = [8, 128], strides = [1, 1]} : vector<8x512xf32> to vector<8x128xf32>
    %302 = arith.negf %301 : vector<8x128xf32>
    %303 = math.exp %302 : vector<8x128xf32>
    %cst_108 = arith.constant 1.000000e+00 : f32
    %304 = vector.broadcast %cst_108 : f32 to vector<8x128xf32>
    %305 = arith.addf %304, %303 : vector<8x128xf32>
    %306 = arith.divf %304, %305 : vector<8x128xf32>
    %307 = vector.extract_strided_slice %294 {offsets = [0, 256], sizes = [8, 128], strides = [1, 1]} : vector<8x512xf32> to vector<8x128xf32>
    %308 = math.tanh %307 : vector<8x128xf32>
    %309 = vector.extract_strided_slice %294 {offsets = [0, 384], sizes = [8, 128], strides = [1, 1]} : vector<8x512xf32> to vector<8x128xf32>
    %310 = arith.negf %309 : vector<8x128xf32>
    %311 = math.exp %310 : vector<8x128xf32>
    %cst_109 = arith.constant 1.000000e+00 : f32
    %312 = vector.broadcast %cst_109 : f32 to vector<8x128xf32>
    %313 = arith.addf %312, %311 : vector<8x128xf32>
    %314 = arith.divf %312, %313 : vector<8x128xf32>
    %315 = arith.mulf %306, %289 : vector<8x128xf32>
    %316 = arith.mulf %300, %308 : vector<8x128xf32>
    %317 = arith.addf %315, %316 : vector<8x128xf32>
    %318 = math.tanh %317 : vector<8x128xf32>
    %319 = arith.mulf %314, %318 : vector<8x128xf32>
    %c8_110 = arith.constant 8 : index
    %c0_111 = arith.constant 0 : index
    %320 = vector.load %arg10[%c8_110, %c0_111] : memref<64x512xf32, #tpu.memory_space<vmem>>, vector<8x512xf32>
    %321 = arith.truncf %319 : vector<8x128xf32> to vector<8x128xbf16>
    %c0_112 = arith.constant 0 : index
    %c0_113 = arith.constant 0 : index
    %322 = vector.load %arg7[%c0_112, %c0_113] : memref<128x512xbf16, #tpu.memory_space<vmem>>, vector<128x512xbf16>
    %cst_114 = arith.constant dense<0.000000e+00> : vector<8x512xf32>
    %323 = tpu.matmul %321, %322, %cst_114 {dimension_numbers = #tpu.dot_dimension_numbers<[1], [0], [0], [1], [0, 0, 1, 1], [], []>} : vector<8x128xbf16>, vector<128x512xbf16>, vector<8x512xf32> -> vector<8x512xf32>
    %324 = arith.addf %320, %323 : vector<8x512xf32>
    %325 = vector.extract_strided_slice %324 {offsets = [0, 0], sizes = [8, 128], strides = [1, 1]} : vector<8x512xf32> to vector<8x128xf32>
    %326 = arith.negf %325 : vector<8x128xf32>
    %327 = math.exp %326 : vector<8x128xf32>
    %cst_115 = arith.constant 1.000000e+00 : f32
    %328 = vector.broadcast %cst_115 : f32 to vector<8x128xf32>
    %329 = arith.addf %328, %327 : vector<8x128xf32>
    %330 = arith.divf %328, %329 : vector<8x128xf32>
    %331 = vector.extract_strided_slice %324 {offsets = [0, 128], sizes = [8, 128], strides = [1, 1]} : vector<8x512xf32> to vector<8x128xf32>
    %332 = arith.negf %331 : vector<8x128xf32>
    %333 = math.exp %332 : vector<8x128xf32>
    %cst_116 = arith.constant 1.000000e+00 : f32
    %334 = vector.broadcast %cst_116 : f32 to vector<8x128xf32>
    %335 = arith.addf %334, %333 : vector<8x128xf32>
    %336 = arith.divf %334, %335 : vector<8x128xf32>
    %337 = vector.extract_strided_slice %324 {offsets = [0, 256], sizes = [8, 128], strides = [1, 1]} : vector<8x512xf32> to vector<8x128xf32>
    %338 = math.tanh %337 : vector<8x128xf32>
    %339 = vector.extract_strided_slice %324 {offsets = [0, 384], sizes = [8, 128], strides = [1, 1]} : vector<8x512xf32> to vector<8x128xf32>
    %340 = arith.negf %339 : vector<8x128xf32>
    %341 = math.exp %340 : vector<8x128xf32>
    %cst_117 = arith.constant 1.000000e+00 : f32
    %342 = vector.broadcast %cst_117 : f32 to vector<8x128xf32>
    %343 = arith.addf %342, %341 : vector<8x128xf32>
    %344 = arith.divf %342, %343 : vector<8x128xf32>
    %345 = arith.mulf %336, %317 : vector<8x128xf32>
    %346 = arith.mulf %330, %338 : vector<8x128xf32>
    %347 = arith.addf %345, %346 : vector<8x128xf32>
    %348 = math.tanh %347 : vector<8x128xf32>
    %349 = arith.mulf %344, %348 : vector<8x128xf32>
    %c16_118 = arith.constant 16 : index
    %c0_119 = arith.constant 0 : index
    %350 = vector.load %arg10[%c16_118, %c0_119] : memref<64x512xf32, #tpu.memory_space<vmem>>, vector<8x512xf32>
    %351 = arith.truncf %349 : vector<8x128xf32> to vector<8x128xbf16>
    %c0_120 = arith.constant 0 : index
    %c0_121 = arith.constant 0 : index
    %352 = vector.load %arg7[%c0_120, %c0_121] : memref<128x512xbf16, #tpu.memory_space<vmem>>, vector<128x512xbf16>
    %cst_122 = arith.constant dense<0.000000e+00> : vector<8x512xf32>
    %353 = tpu.matmul %351, %352, %cst_122 {dimension_numbers = #tpu.dot_dimension_numbers<[1], [0], [0], [1], [0, 0, 1, 1], [], []>} : vector<8x128xbf16>, vector<128x512xbf16>, vector<8x512xf32> -> vector<8x512xf32>
    %354 = arith.addf %350, %353 : vector<8x512xf32>
    %355 = vector.extract_strided_slice %354 {offsets = [0, 0], sizes = [8, 128], strides = [1, 1]} : vector<8x512xf32> to vector<8x128xf32>
    %356 = arith.negf %355 : vector<8x128xf32>
    %357 = math.exp %356 : vector<8x128xf32>
    %cst_123 = arith.constant 1.000000e+00 : f32
    %358 = vector.broadcast %cst_123 : f32 to vector<8x128xf32>
    %359 = arith.addf %358, %357 : vector<8x128xf32>
    %360 = arith.divf %358, %359 : vector<8x128xf32>
    %361 = vector.extract_strided_slice %354 {offsets = [0, 128], sizes = [8, 128], strides = [1, 1]} : vector<8x512xf32> to vector<8x128xf32>
    %362 = arith.negf %361 : vector<8x128xf32>
    %363 = math.exp %362 : vector<8x128xf32>
    %cst_124 = arith.constant 1.000000e+00 : f32
    %364 = vector.broadcast %cst_124 : f32 to vector<8x128xf32>
    %365 = arith.addf %364, %363 : vector<8x128xf32>
    %366 = arith.divf %364, %365 : vector<8x128xf32>
    %367 = vector.extract_strided_slice %354 {offsets = [0, 256], sizes = [8, 128], strides = [1, 1]} : vector<8x512xf32> to vector<8x128xf32>
    %368 = math.tanh %367 : vector<8x128xf32>
    %369 = vector.extract_strided_slice %354 {offsets = [0, 384], sizes = [8, 128], strides = [1, 1]} : vector<8x512xf32> to vector<8x128xf32>
    %370 = arith.negf %369 : vector<8x128xf32>
    %371 = math.exp %370 : vector<8x128xf32>
    %cst_125 = arith.constant 1.000000e+00 : f32
    %372 = vector.broadcast %cst_125 : f32 to vector<8x128xf32>
    %373 = arith.addf %372, %371 : vector<8x128xf32>
    %374 = arith.divf %372, %373 : vector<8x128xf32>
    %375 = arith.mulf %366, %347 : vector<8x128xf32>
    %376 = arith.mulf %360, %368 : vector<8x128xf32>
    %377 = arith.addf %375, %376 : vector<8x128xf32>
    %378 = math.tanh %377 : vector<8x128xf32>
    %379 = arith.mulf %374, %378 : vector<8x128xf32>
    %c24_126 = arith.constant 24 : index
    %c0_127 = arith.constant 0 : index
    %380 = vector.load %arg10[%c24_126, %c0_127] : memref<64x512xf32, #tpu.memory_space<vmem>>, vector<8x512xf32>
    %381 = arith.truncf %379 : vector<8x128xf32> to vector<8x128xbf16>
    %c0_128 = arith.constant 0 : index
    %c0_129 = arith.constant 0 : index
    %382 = vector.load %arg7[%c0_128, %c0_129] : memref<128x512xbf16, #tpu.memory_space<vmem>>, vector<128x512xbf16>
    %cst_130 = arith.constant dense<0.000000e+00> : vector<8x512xf32>
    %383 = tpu.matmul %381, %382, %cst_130 {dimension_numbers = #tpu.dot_dimension_numbers<[1], [0], [0], [1], [0, 0, 1, 1], [], []>} : vector<8x128xbf16>, vector<128x512xbf16>, vector<8x512xf32> -> vector<8x512xf32>
    %384 = arith.addf %380, %383 : vector<8x512xf32>
    %385 = vector.extract_strided_slice %384 {offsets = [0, 0], sizes = [8, 128], strides = [1, 1]} : vector<8x512xf32> to vector<8x128xf32>
    %386 = arith.negf %385 : vector<8x128xf32>
    %387 = math.exp %386 : vector<8x128xf32>
    %cst_131 = arith.constant 1.000000e+00 : f32
    %388 = vector.broadcast %cst_131 : f32 to vector<8x128xf32>
    %389 = arith.addf %388, %387 : vector<8x128xf32>
    %390 = arith.divf %388, %389 : vector<8x128xf32>
    %391 = vector.extract_strided_slice %384 {offsets = [0, 128], sizes = [8, 128], strides = [1, 1]} : vector<8x512xf32> to vector<8x128xf32>
    %392 = arith.negf %391 : vector<8x128xf32>
    %393 = math.exp %392 : vector<8x128xf32>
    %cst_132 = arith.constant 1.000000e+00 : f32
    %394 = vector.broadcast %cst_132 : f32 to vector<8x128xf32>
    %395 = arith.addf %394, %393 : vector<8x128xf32>
    %396 = arith.divf %394, %395 : vector<8x128xf32>
    %397 = vector.extract_strided_slice %384 {offsets = [0, 256], sizes = [8, 128], strides = [1, 1]} : vector<8x512xf32> to vector<8x128xf32>
    %398 = math.tanh %397 : vector<8x128xf32>
    %399 = vector.extract_strided_slice %384 {offsets = [0, 384], sizes = [8, 128], strides = [1, 1]} : vector<8x512xf32> to vector<8x128xf32>
    %400 = arith.negf %399 : vector<8x128xf32>
    %401 = math.exp %400 : vector<8x128xf32>
    %cst_133 = arith.constant 1.000000e+00 : f32
    %402 = vector.broadcast %cst_133 : f32 to vector<8x128xf32>
    %403 = arith.addf %402, %401 : vector<8x128xf32>
    %404 = arith.divf %402, %403 : vector<8x128xf32>
    %405 = arith.mulf %396, %377 : vector<8x128xf32>
    %406 = arith.mulf %390, %398 : vector<8x128xf32>
    %407 = arith.addf %405, %406 : vector<8x128xf32>
    %408 = math.tanh %407 : vector<8x128xf32>
    %409 = arith.mulf %404, %408 : vector<8x128xf32>
    %c32_134 = arith.constant 32 : index
    %c0_135 = arith.constant 0 : index
    %410 = vector.load %arg10[%c32_134, %c0_135] : memref<64x512xf32, #tpu.memory_space<vmem>>, vector<8x512xf32>
    %411 = arith.truncf %409 : vector<8x128xf32> to vector<8x128xbf16>
    %c0_136 = arith.constant 0 : index
    %c0_137 = arith.constant 0 : index
    %412 = vector.load %arg7[%c0_136, %c0_137] : memref<128x512xbf16, #tpu.memory_space<vmem>>, vector<128x512xbf16>
    %cst_138 = arith.constant dense<0.000000e+00> : vector<8x512xf32>
    %413 = tpu.matmul %411, %412, %cst_138 {dimension_numbers = #tpu.dot_dimension_numbers<[1], [0], [0], [1], [0, 0, 1, 1], [], []>} : vector<8x128xbf16>, vector<128x512xbf16>, vector<8x512xf32> -> vector<8x512xf32>
    %414 = arith.addf %410, %413 : vector<8x512xf32>
    %415 = vector.extract_strided_slice %414 {offsets = [0, 0], sizes = [8, 128], strides = [1, 1]} : vector<8x512xf32> to vector<8x128xf32>
    %416 = arith.negf %415 : vector<8x128xf32>
    %417 = math.exp %416 : vector<8x128xf32>
    %cst_139 = arith.constant 1.000000e+00 : f32
    %418 = vector.broadcast %cst_139 : f32 to vector<8x128xf32>
    %419 = arith.addf %418, %417 : vector<8x128xf32>
    %420 = arith.divf %418, %419 : vector<8x128xf32>
    %421 = vector.extract_strided_slice %414 {offsets = [0, 128], sizes = [8, 128], strides = [1, 1]} : vector<8x512xf32> to vector<8x128xf32>
    %422 = arith.negf %421 : vector<8x128xf32>
    %423 = math.exp %422 : vector<8x128xf32>
    %cst_140 = arith.constant 1.000000e+00 : f32
    %424 = vector.broadcast %cst_140 : f32 to vector<8x128xf32>
    %425 = arith.addf %424, %423 : vector<8x128xf32>
    %426 = arith.divf %424, %425 : vector<8x128xf32>
    %427 = vector.extract_strided_slice %414 {offsets = [0, 256], sizes = [8, 128], strides = [1, 1]} : vector<8x512xf32> to vector<8x128xf32>
    %428 = math.tanh %427 : vector<8x128xf32>
    %429 = vector.extract_strided_slice %414 {offsets = [0, 384], sizes = [8, 128], strides = [1, 1]} : vector<8x512xf32> to vector<8x128xf32>
    %430 = arith.negf %429 : vector<8x128xf32>
    %431 = math.exp %430 : vector<8x128xf32>
    %cst_141 = arith.constant 1.000000e+00 : f32
    %432 = vector.broadcast %cst_141 : f32 to vector<8x128xf32>
    %433 = arith.addf %432, %431 : vector<8x128xf32>
    %434 = arith.divf %432, %433 : vector<8x128xf32>
    %435 = arith.mulf %426, %407 : vector<8x128xf32>
    %436 = arith.mulf %420, %428 : vector<8x128xf32>
    %437 = arith.addf %435, %436 : vector<8x128xf32>
    %438 = math.tanh %437 : vector<8x128xf32>
    %439 = arith.mulf %434, %438 : vector<8x128xf32>
    %c40_142 = arith.constant 40 : index
    %c0_143 = arith.constant 0 : index
    %440 = vector.load %arg10[%c40_142, %c0_143] : memref<64x512xf32, #tpu.memory_space<vmem>>, vector<8x512xf32>
    %441 = arith.truncf %439 : vector<8x128xf32> to vector<8x128xbf16>
    %c0_144 = arith.constant 0 : index
    %c0_145 = arith.constant 0 : index
    %442 = vector.load %arg7[%c0_144, %c0_145] : memref<128x512xbf16, #tpu.memory_space<vmem>>, vector<128x512xbf16>
    %cst_146 = arith.constant dense<0.000000e+00> : vector<8x512xf32>
    %443 = tpu.matmul %441, %442, %cst_146 {dimension_numbers = #tpu.dot_dimension_numbers<[1], [0], [0], [1], [0, 0, 1, 1], [], []>} : vector<8x128xbf16>, vector<128x512xbf16>, vector<8x512xf32> -> vector<8x512xf32>
    %444 = arith.addf %440, %443 : vector<8x512xf32>
    %445 = vector.extract_strided_slice %444 {offsets = [0, 0], sizes = [8, 128], strides = [1, 1]} : vector<8x512xf32> to vector<8x128xf32>
    %446 = arith.negf %445 : vector<8x128xf32>
    %447 = math.exp %446 : vector<8x128xf32>
    %cst_147 = arith.constant 1.000000e+00 : f32
    %448 = vector.broadcast %cst_147 : f32 to vector<8x128xf32>
    %449 = arith.addf %448, %447 : vector<8x128xf32>
    %450 = arith.divf %448, %449 : vector<8x128xf32>
    %451 = vector.extract_strided_slice %444 {offsets = [0, 128], sizes = [8, 128], strides = [1, 1]} : vector<8x512xf32> to vector<8x128xf32>
    %452 = arith.negf %451 : vector<8x128xf32>
    %453 = math.exp %452 : vector<8x128xf32>
    %cst_148 = arith.constant 1.000000e+00 : f32
    %454 = vector.broadcast %cst_148 : f32 to vector<8x128xf32>
    %455 = arith.addf %454, %453 : vector<8x128xf32>
    %456 = arith.divf %454, %455 : vector<8x128xf32>
    %457 = vector.extract_strided_slice %444 {offsets = [0, 256], sizes = [8, 128], strides = [1, 1]} : vector<8x512xf32> to vector<8x128xf32>
    %458 = math.tanh %457 : vector<8x128xf32>
    %459 = vector.extract_strided_slice %444 {offsets = [0, 384], sizes = [8, 128], strides = [1, 1]} : vector<8x512xf32> to vector<8x128xf32>
    %460 = arith.negf %459 : vector<8x128xf32>
    %461 = math.exp %460 : vector<8x128xf32>
    %cst_149 = arith.constant 1.000000e+00 : f32
    %462 = vector.broadcast %cst_149 : f32 to vector<8x128xf32>
    %463 = arith.addf %462, %461 : vector<8x128xf32>
    %464 = arith.divf %462, %463 : vector<8x128xf32>
    %465 = arith.mulf %456, %437 : vector<8x128xf32>
    %466 = arith.mulf %450, %458 : vector<8x128xf32>
    %467 = arith.addf %465, %466 : vector<8x128xf32>
    %468 = math.tanh %467 : vector<8x128xf32>
    %469 = arith.mulf %464, %468 : vector<8x128xf32>
    %c48_150 = arith.constant 48 : index
    %c0_151 = arith.constant 0 : index
    %470 = vector.load %arg10[%c48_150, %c0_151] : memref<64x512xf32, #tpu.memory_space<vmem>>, vector<8x512xf32>
    %471 = arith.truncf %469 : vector<8x128xf32> to vector<8x128xbf16>
    %c0_152 = arith.constant 0 : index
    %c0_153 = arith.constant 0 : index
    %472 = vector.load %arg7[%c0_152, %c0_153] : memref<128x512xbf16, #tpu.memory_space<vmem>>, vector<128x512xbf16>
    %cst_154 = arith.constant dense<0.000000e+00> : vector<8x512xf32>
    %473 = tpu.matmul %471, %472, %cst_154 {dimension_numbers = #tpu.dot_dimension_numbers<[1], [0], [0], [1], [0, 0, 1, 1], [], []>} : vector<8x128xbf16>, vector<128x512xbf16>, vector<8x512xf32> -> vector<8x512xf32>
    %474 = arith.addf %470, %473 : vector<8x512xf32>
    %475 = vector.extract_strided_slice %474 {offsets = [0, 0], sizes = [8, 128], strides = [1, 1]} : vector<8x512xf32> to vector<8x128xf32>
    %476 = arith.negf %475 : vector<8x128xf32>
    %477 = math.exp %476 : vector<8x128xf32>
    %cst_155 = arith.constant 1.000000e+00 : f32
    %478 = vector.broadcast %cst_155 : f32 to vector<8x128xf32>
    %479 = arith.addf %478, %477 : vector<8x128xf32>
    %480 = arith.divf %478, %479 : vector<8x128xf32>
    %481 = vector.extract_strided_slice %474 {offsets = [0, 128], sizes = [8, 128], strides = [1, 1]} : vector<8x512xf32> to vector<8x128xf32>
    %482 = arith.negf %481 : vector<8x128xf32>
    %483 = math.exp %482 : vector<8x128xf32>
    %cst_156 = arith.constant 1.000000e+00 : f32
    %484 = vector.broadcast %cst_156 : f32 to vector<8x128xf32>
    %485 = arith.addf %484, %483 : vector<8x128xf32>
    %486 = arith.divf %484, %485 : vector<8x128xf32>
    %487 = vector.extract_strided_slice %474 {offsets = [0, 256], sizes = [8, 128], strides = [1, 1]} : vector<8x512xf32> to vector<8x128xf32>
    %488 = math.tanh %487 : vector<8x128xf32>
    %489 = vector.extract_strided_slice %474 {offsets = [0, 384], sizes = [8, 128], strides = [1, 1]} : vector<8x512xf32> to vector<8x128xf32>
    %490 = arith.negf %489 : vector<8x128xf32>
    %491 = math.exp %490 : vector<8x128xf32>
    %cst_157 = arith.constant 1.000000e+00 : f32
    %492 = vector.broadcast %cst_157 : f32 to vector<8x128xf32>
    %493 = arith.addf %492, %491 : vector<8x128xf32>
    %494 = arith.divf %492, %493 : vector<8x128xf32>
    %495 = arith.mulf %486, %467 : vector<8x128xf32>
    %496 = arith.mulf %480, %488 : vector<8x128xf32>
    %497 = arith.addf %495, %496 : vector<8x128xf32>
    %498 = math.tanh %497 : vector<8x128xf32>
    %499 = arith.mulf %494, %498 : vector<8x128xf32>
    %c56_158 = arith.constant 56 : index
    %c0_159 = arith.constant 0 : index
    %500 = vector.load %arg10[%c56_158, %c0_159] : memref<64x512xf32, #tpu.memory_space<vmem>>, vector<8x512xf32>
    %501 = arith.truncf %499 : vector<8x128xf32> to vector<8x128xbf16>
    %c0_160 = arith.constant 0 : index
    %c0_161 = arith.constant 0 : index
    %502 = vector.load %arg7[%c0_160, %c0_161] : memref<128x512xbf16, #tpu.memory_space<vmem>>, vector<128x512xbf16>
    %cst_162 = arith.constant dense<0.000000e+00> : vector<8x512xf32>
    %503 = tpu.matmul %501, %502, %cst_162 {dimension_numbers = #tpu.dot_dimension_numbers<[1], [0], [0], [1], [0, 0, 1, 1], [], []>} : vector<8x128xbf16>, vector<128x512xbf16>, vector<8x512xf32> -> vector<8x512xf32>
    %504 = arith.addf %500, %503 : vector<8x512xf32>
    %505 = vector.extract_strided_slice %504 {offsets = [0, 0], sizes = [8, 128], strides = [1, 1]} : vector<8x512xf32> to vector<8x128xf32>
    %506 = arith.negf %505 : vector<8x128xf32>
    %507 = math.exp %506 : vector<8x128xf32>
    %cst_163 = arith.constant 1.000000e+00 : f32
    %508 = vector.broadcast %cst_163 : f32 to vector<8x128xf32>
    %509 = arith.addf %508, %507 : vector<8x128xf32>
    %510 = arith.divf %508, %509 : vector<8x128xf32>
    %511 = vector.extract_strided_slice %504 {offsets = [0, 128], sizes = [8, 128], strides = [1, 1]} : vector<8x512xf32> to vector<8x128xf32>
    %512 = arith.negf %511 : vector<8x128xf32>
    %513 = math.exp %512 : vector<8x128xf32>
    %cst_164 = arith.constant 1.000000e+00 : f32
    %514 = vector.broadcast %cst_164 : f32 to vector<8x128xf32>
    %515 = arith.addf %514, %513 : vector<8x128xf32>
    %516 = arith.divf %514, %515 : vector<8x128xf32>
    %517 = vector.extract_strided_slice %504 {offsets = [0, 256], sizes = [8, 128], strides = [1, 1]} : vector<8x512xf32> to vector<8x128xf32>
    %518 = math.tanh %517 : vector<8x128xf32>
    %519 = vector.extract_strided_slice %504 {offsets = [0, 384], sizes = [8, 128], strides = [1, 1]} : vector<8x512xf32> to vector<8x128xf32>
    %520 = arith.negf %519 : vector<8x128xf32>
    %521 = math.exp %520 : vector<8x128xf32>
    %cst_165 = arith.constant 1.000000e+00 : f32
    %522 = vector.broadcast %cst_165 : f32 to vector<8x128xf32>
    %523 = arith.addf %522, %521 : vector<8x128xf32>
    %524 = arith.divf %522, %523 : vector<8x128xf32>
    %525 = arith.mulf %516, %497 : vector<8x128xf32>
    %526 = arith.mulf %510, %518 : vector<8x128xf32>
    %527 = arith.addf %525, %526 : vector<8x128xf32>
    %528 = math.tanh %527 : vector<8x128xf32>
    %529 = arith.mulf %524, %528 : vector<8x128xf32>
    %c0_166 = arith.constant 0 : index
    %c0_167 = arith.constant 0 : index
    %530 = vector.load %arg9[%c0_166, %c0_167] : memref<8x128xf32, #tpu.memory_space<vmem>>, vector<8x128xf32>
    tpu.vector_store %arg9[%c0_166, %c0_167], %529 {strides = array<i32>} : memref<8x128xf32, #tpu.memory_space<vmem>>, vector<8x128xf32>,
    return
  }
}

</mosaic_0001>

<bundles_post_ra>
// kernel: siamese_forward.1
= control target key start
LH: loop header
LB: loop body
LE: loop exit
PB: predicated region body
PF: predicated region fallthrough
CT: control target
= control target key end

     0   :  { %vm183_vm0 = vcmask 1043456   ;;  %v5310_v2 = vmov 0.0   ;;  %vm41_vm1 = vcmask 31744   ;;  %s7166_s3 = inlined_call_operand.vmem [shape: f32[4,512], index: 3, kind: input, shape index: {}]   ;;  %s7167_s4 = inlined_call_operand.vmem [shape: bf16[128,512], index: 4, kind: input, shape index: {}]   ;;  %s7168_s0 = inlined_call_operand.vmem [shape: f32[64,4], index: 0, kind: input, shape index: {}]   ;;  %s7169_s1 = inlined_call_operand.vmem [shape: f32[1,4], index: 1, kind: input, shape index: {}]   ;;  %s7170_s2 = inlined_call_operand.vmem [shape: f32[1,4], index: 2, kind: input, shape index: {}]   ;;  %s7171_s5 = inlined_call_operand.vmem [shape: f32[1,512], index: 5, kind: input, shape index: {}]   ;;  %s7172_s6 = inlined_call_operand.vmem [shape: bf16[128,512], index: 6, kind: input, shape index: {}]   ;;  %s7173_s7 = inlined_call_operand.vmem [shape: bf16[128,512], index: 7, kind: input, shape index: {}]   ;;  %s7174_s8 = inlined_call_operand.vmem [shape: f32[1,512], index: 8, kind: input, shape index: {}]   ;;  %s7175_s9 = inlined_call_operand.vmem [shape: f32[8,128], index: 9, kind: output, shape index: {}]  }
   0x1   :  { %v131_v0 = vld [vmem:[%s7166_s3] sm:$0xff]  ;;  %v132_v1 = vld [vmem:[%s7166_s3 + $0x8] sm:$0xff]  ;;  %256 = vmatprep.mubr.f32.mxu0 %v5310_v2  ;;  %369 = vmatprep.mubr.f32.mxu1 %v5310_v2  ;;  %v5388_v8 = vld [vmem:[%s7168_s0 + $0x10] sm:$0xff] }
   0x2   :  { %v157_v3 = vcombine.high %v131_v0, %v131_v0  ;;  %v158_v4 = vcombine.high %v132_v1, %v132_v1  ;;  %v5373_v5 = vld [vmem:[%s7167_s4 + $0x4] ss:$16 sps:$4 sm:$0xff]   ;;  %v5383_v7 = vld [vmem:[%s7168_s0 + $0x8] sm:$0xff]  ;;  %v5395_v9 = vld [vmem:[%s7168_s0 + $0x18] sm:$0xff]  ;;  %v45_v12 = vsel %vm41_vm1, %v5388_v8, 0.0  ;;  %v66_v18 = vmul.f32 %v5388_v8, %v5388_v8 }
   0x3   :  { %v5378_v6 = vld [vmem:[%s7168_s0] sm:$0xff]  ;;  %v43_v11 = vsel %vm41_vm1, %v5383_v7, 0.0  ;;  %v47_v16 = vsel %vm41_vm1, %v5395_v9, 0.0  ;;  %v65_v17 = vmul.f32 %v5383_v7, %v5383_v7  ;;  %v5422_v19 = vld [vmem:[%s7168_s0 + $0x28] sm:$0xff]  ;;  %v67_v21 = vmul.f32 %v5395_v9, %v5395_v9  ;;  %v5440_v27 = vld [vmem:[%s7168_s0 + $0x30] sm:$0xff] }
   0x4   :  { %4433 = vmatprep.subr.msk.mxu0 %vm183_vm0, %v157_v3  ;;  %4443 = vmatprep.subr.msk.mxu1 %vm183_vm0, %v158_v4  ;;  %v42_v10 = vsel %vm41_vm1, %v5378_v6, 0.0  ;;  %v64_v13 = vmul.f32 %v5378_v6, %v5378_v6  ;;  %v5410_v14 = vld [vmem:[%s7168_s0 + $0x20] sm:$0xff]  ;;  %v5429_v22 = vld [vmem:[%s7167_s4 + $0xc] ss:$16 sps:$4 sm:$0xff]   ;;  %v75_v30 = vsel %vm41_vm1, %v66_v18, 0.0  ;;  %v51_v31 = vsel %vm41_vm1, %v5422_v19, 0.0 }
   0x5   :  { %4434 = vmatpush1.msk.msra.mxu0 %vm183_vm0, %v131_v0  ;;  %4444 = vmatpush1.msk.msra.mxu1 %vm183_vm0, %v132_v1  ;;  %v44_v15 = vadd.f32 %v43_v11, %v42_v10  ;;  %v49_v23 = vsel %vm41_vm1, %v5410_v14, 0.0  ;;  %v68_v24 = vmul.f32 %v5410_v14, %v5410_v14  ;;  %v73_v26 = vsel %vm41_vm1, %v65_v17, 0.0  ;;  %v5452_v34 = vld [vmem:[%s7168_s0 + $0x38] sm:$0xff] }
   0x6   :  { %646 = vmatprep.subr.bf16.mxu0 %v5373_v5  ;;  %v72_v25 = vsel %vm41_vm1, %v64_v13, 0.0  ;;  %687 = vmatprep.subr.bf16.mxu1 %v5429_v22  ;;  %v69_v32 = vmul.f32 %v5422_v19, %v5422_v19  ;;  %v77_v33 = vsel %vm41_vm1, %v67_v21, 0.0  ;;  %v53_v37 = vsel %vm41_vm1, %v5440_v27, 0.0 }
   0x7   :  { %v46_v20 = vadd.f32 %v45_v12, %v44_v15  ;;  %v74_v29 = vadd.f32 %v73_v26, %v72_v25  ;;  %v70_v38 = vmul.f32 %v5440_v27, %v5440_v27  ;;  %v79_v39 = vsel %vm41_vm1, %v68_v24, 0.0  ;;  %v96_v15 = vld [vmem:[%s7169_s1] sm:$0x1] }
   0x8   :  { %v55_v42 = vsel %vm41_vm1, %v5452_v34, 0.0  ;;  %v71_v43 = vmul.f32 %v5452_v34, %v5452_v34  ;;  %v81_v44 = vsel %vm41_vm1, %v69_v32, 0.0  ;;  %v104_v12 = vlaneseq }
   0x9   :  { %v48_v28 = vadd.f32 %v47_v16, %v46_v20  ;;  %v76_v36 = vadd.f32 %v75_v30, %v74_v29  ;;  %v83_v47 = vsel %vm41_vm1, %v70_v38, 0.0  ;;  %v100_v20 = vld [vmem:[%s7170_s2] sm:$0x1]  ;;  %v5495_v30 = vld [vmem:[%s7167_s4 + $0x8] ss:$16 sps:$4 sm:$0xff]  }
   0xa   :  { %v85_v50 = vsel %vm41_vm1, %v71_v43, 0.0  ;;  %v5466_v13 = vshrl.u32 %v104_v12, 7  ;;  %v5490_v29 = vld [vmem:[%s7167_s4] ss:$16 sps:$4 sm:$0xff]  }
   0xb   :  { %v50_v35 = vadd.f32 %v49_v23, %v48_v28  ;;  %v78_v41 = vadd.f32 %v77_v33, %v76_v36  ;;  %v5523_v36 = vld [vmem:[%s7167_s4 + $0x28] ss:$16 sps:$4 sm:$0xff]  }
   0xc   :  { %7184 = vst [vmem:[#allocation4_spill] sm:$0xff] %v5466_v13  ;;  %v5472_v16 = vsub.s32 0, %v5466_v13 }
   0xd   :  { %v52_v40 = vadd.f32 %v51_v31, %v50_v35  ;;  %v80_v46 = vadd.f32 %v79_v39, %v78_v41  ;;  %v5518_v35 = vld [vmem:[%s7167_s4 + $0x20] ss:$16 sps:$4 sm:$0xff]   ;;  %v5554_v41 = vld [vmem:[%s7167_s4 + $0x48] ss:$16 sps:$4 sm:$0xff]  }
   0xe   :  { %7185 = vst [vmem:[#allocation5_spill] sm:$0xff] %v5472_v16 }
   0xf   :  { %v54_v45 = vadd.f32 %v53_v37, %v52_v40  ;;  %v82_v49 = vadd.f32 %v81_v44, %v80_v46  ;;  %v5537_v37 = vld [vmem:[%s7167_s4 + $0x4c] ss:$16 sps:$4 sm:$0xff]   ;;  %v5549_v40 = vld [vmem:[%s7167_s4 + $0x40] ss:$16 sps:$4 sm:$0xff]   ;;  %v5585_v46 = vld [vmem:[%s7167_s4 + $0x68] ss:$16 sps:$4 sm:$0xff]  }
  0x11   :  { %v56_v48 = vadd.f32 %v55_v42, %v54_v45  ;;  %v84_v52 = vadd.f32 %v83_v47, %v82_v49  ;;  %v5568_v42 = vld [vmem:[%s7167_s4 + $0x6c] ss:$16 sps:$4 sm:$0xff]   ;;  %v5580_v45 = vld [vmem:[%s7167_s4 + $0x60] ss:$16 sps:$4 sm:$0xff]  }
  0x12   :  { %v5599_v47 = vld [vmem:[%s7167_s4 + $0x8c] ss:$16 sps:$4 sm:$0xff]  }
  0x13   :  { %v57_v51 = vrot.slane %v56_v48, 4  ;;  %v86_v54 = vadd.f32 %v85_v50, %v84_v52  ;;  %v5611_v50 = vld [vmem:[%s7167_s4 + $0x80] ss:$16 sps:$4 sm:$0xff]   ;;  %v5630_v52 = vld [vmem:[%s7167_s4 + $0xac] ss:$16 sps:$4 sm:$0xff]  }
  0x15   :  { %v58_v53 = vadd.f32 %v57_v51, %v56_v48  ;;  %v87_v56 = vrot.slane %v86_v54, 4  ;;  %v5616_v51 = vld [vmem:[%s7167_s4 + $0x88] ss:$16 sps:$4 sm:$0xff]  }
  0x17   :  { %v59_v55 = vrot.slane %v58_v53, 2  ;;  %v88_v58 = vadd.f32 %v87_v56, %v86_v54  ;;  %v5647_v56 = vld [vmem:[%s7167_s4 + $0xa8] ss:$16 sps:$4 sm:$0xff]  }
  0x19   :  { %v60_v57 = vadd.f32 %v59_v55, %v58_v53  ;;  %v89_v60 = vrot.slane %v88_v58, 2  ;;  %v5642_v55 = vld [vmem:[%s7167_s4 + $0xa0] ss:$16 sps:$4 sm:$0xff]  }
  0x1b   :  { %v61_v59 = vrot.slane %v60_v57, 1  ;;  %v90_v62 = vadd.f32 %v89_v60, %v88_v58  ;;  %v5673_v60 = vld [vmem:[%s7167_s4 + $0xc0] ss:$16 sps:$4 sm:$0xff]  }
  0x1d   :  { %v62_v61 = vadd.f32 %v61_v59, %v60_v57  ;;  %v91_v0 = vrot.slane %v90_v62, 1  ;;  %v5661_v57 = vld [vmem:[%s7167_s4 + $0xcc] ss:$16 sps:$4 sm:$0xff]  }
  0x1f   :  { %v63_v63 = vmul.f32 0.0625, %v62_v61  ;;  %v92_v1 = vadd.f32 %v91_v0, %v90_v62  ;;  %v5678_v61 = vld [vmem:[%s7167_s4 + $0xc8] ss:$16 sps:$4 sm:$0xff]   ;;  %v5692_v62 = vld [vmem:[%s7167_s4 + $0xec] ss:$16 sps:$4 sm:$0xff]  }
  0x20   :  { %v5702_v0 = vld [vmem:[%s7167_s4 + $0xe0] ss:$16 sps:$4 sm:$0xff]  }
  0x21   :  { %v94_v3 = vmul.f32 %v63_v63, %v63_v63  ;;  %v93_v4 = vmul.f32 0.0625, %v92_v1  ;;  %v5707_v1 = vld [vmem:[%s7167_s4 + $0xe8] ss:$16 sps:$4 sm:$0xff]  }
  0x23   :  { %v95_v10 = vsub.f32 %v93_v4, %v94_v3  ;;  %v7179_v3 = vmov 0   ;;  %v133_v4 = vld [vmem:[%s7171_s5] sm:$0xf] }
  0x25   :  { %v97_v11 = vadd.f32 1e-05, %v95_v10 }
  0x27   :  { %5020 = vrsqrt.f32 %v97_v11  ;;  %v7177_v11 = vsub.s32 1, %v5466_v13 }
  0x31   :  { %v5021_v17 = vpop.eup %5020 }
  0x32   :  { %v99_v18 = vmul.f32 %v5021_v17, %v96_v15  ;;  %v7176_v15 = vsub.s32 3, %v5466_v13 }
  0x34   :  { %v101_v21 = vmul.f32 %v99_v18, %v63_v63  ;;  %v5478_v23 = vrot.slane %v99_v18, %v5472_v16 }
  0x36   :  { %v102_v24 = vsub.f32 %v100_v20, %v101_v21  ;;  %v109_v25 = vmul.f32 %v5478_v23, %v5378_v6  ;;  %v110_v28 = vmul.f32 %v5478_v23, %v5383_v7  ;;  %v5501_v6 = vld [vmem:[%s7167_s4 + $0x24] ss:$16 sps:$4 sm:$0xff]   ;;  %v5506_v7 = vld [vmem:[%s7167_s4 + $0x2c] ss:$16 sps:$4 sm:$0xff]   ;;  %v111_v33 = vmul.f32 %v5478_v23, %v5388_v8 }
  0x37   :  { %v5532_v8 = vld [vmem:[%s7167_s4 + $0x44] ss:$16 sps:$4 sm:$0xff]   ;;  %v112_v39 = vmul.f32 %v5478_v23, %v5395_v9  ;;  %v113_v44 = vmul.f32 %v5478_v23, %v5410_v14  ;;  %v114_v49 = vmul.f32 %v5478_v23, %v5422_v19  ;;  %v115_v54 = vmul.f32 %v5478_v23, %v5440_v27 }
  0x38   :  { %v5483_v26 = vrot.slane %v102_v24, %v5472_v16  ;;  %v5563_v9 = vld [vmem:[%s7167_s4 + $0x64] ss:$16 sps:$4 sm:$0xff]   ;;  %v116_v59 = vmul.f32 %v5478_v23, %v5452_v34  ;;  %v142_v21 = vrot.slane %v133_v4, %v7177_v11  ;;  %v150_v24 = vrot.slane %v133_v4, %v7176_v15 }
  0x39   :  { %v5594_v14 = vld [vmem:[%s7167_s4 + $0x84] ss:$16 sps:$4 sm:$0xff]  }
  0x3a   :  { %v123_v31 = vadd.f32 %v5483_v26, %v109_v25  ;;  %v124_v32 = vadd.f32 %v5483_v26, %v110_v28  ;;  %v125_v38 = vadd.f32 %v5483_v26, %v111_v33  ;;  %v126_v43 = vadd.f32 %v5483_v26, %v112_v39  ;;  %v5625_v19 = vld [vmem:[%s7167_s4 + $0xa4] ss:$16 sps:$4 sm:$0xff]  }
  0x3b   :  { %v127_v48 = vadd.f32 %v5483_v26, %v113_v44  ;;  %v128_v53 = vadd.f32 %v5483_v26, %v114_v49  ;;  %v5656_v27 = vld [vmem:[%s7167_s4 + $0xc4] ss:$16 sps:$4 sm:$0xff]   ;;  %v129_v58 = vadd.f32 %v5483_v26, %v115_v54  ;;  %v130_v63 = vadd.f32 %v5483_v26, %v116_v59 }
  0x3c   :  { %4435 = vmatmul.mubr.msk.f32.vlgmr.msra.gmra.mrb[0].mxu0 %vm41_vm1, %v123_v31  ;;  %4445 = vmatmul.mubr.msk.f32.vlgmr.msra.gmra.mrb[0].mxu1 %vm41_vm1, %v123_v31  ;;  %v5687_v34 = vld [vmem:[%s7167_s4 + $0xe4] ss:$16 sps:$4 sm:$0xff]  }
  0x3d   :  { %647 = vmatpush1.bf16.msra.mxu0 %v5490_v29  ;;  %688 = vmatpush1.bf16.msra.mxu1 %v5495_v30 }
  0x3e   :  { %262 = vmatprep.mubr.f32.mxu0 %v5310_v2  ;;  %375 = vmatprep.mubr.f32.mxu1 %v5310_v2 }
  0x3f   :  { %648 = vmatprep.subr.bf16.mxu0 %v5501_v6  ;;  %689 = vmatprep.subr.bf16.mxu1 %v5506_v7 }
  0x40   :  { %4436 = vmatmul.mubr.msk.f32.gmra.mrb[2].mxu0 %vm41_vm1, %v124_v32  ;;  %4446 = vmatmul.mubr.msk.f32.gmra.mrb[2].mxu1 %vm41_vm1, %v124_v32 }
  0x41   :  { %649 = vmatpush1.bf16.msra.mxu0 %v5518_v35  ;;  %690 = vmatpush1.bf16.msra.mxu1 %v5523_v36 }
  0x42   :  { %268 = vmatprep.mubr.f32.mxu0 %v5310_v2  ;;  %381 = vmatprep.mubr.f32.mxu1 %v5310_v2 }
  0x43   :  { %650 = vmatprep.subr.bf16.mxu0 %v5532_v8  ;;  %691 = vmatprep.subr.bf16.mxu1 %v5537_v37 }
  0x44   :  { %4437 = vmatmul.mubr.msk.f32.gmra.mrb[4].mxu0 %vm41_vm1, %v125_v38  ;;  %4447 = vmatmul.mubr.msk.f32.gmra.mrb[4].mxu1 %vm41_vm1, %v125_v38 }
  0x45   :  { %651 = vmatpush1.bf16.msra.mxu0 %v5549_v40  ;;  %692 = vmatpush1.bf16.msra.mxu1 %v5554_v41 }
  0x46   :  { %274 = vmatprep.mubr.f32.mxu0 %v5310_v2  ;;  %387 = vmatprep.mubr.f32.mxu1 %v5310_v2 }
  0x47   :  { %652 = vmatprep.subr.bf16.mxu0 %v5563_v9  ;;  %693 = vmatprep.subr.bf16.mxu1 %v5568_v42 }
  0x48   :  { %4438 = vmatmul.mubr.msk.f32.gmra.mrb[6].mxu0 %vm41_vm1, %v126_v43  ;;  %4448 = vmatmul.mubr.msk.f32.gmra.mrb[6].mxu1 %vm41_vm1, %v126_v43 }
  0x49   :  { %653 = vmatpush1.bf16.msra.mxu0 %v5580_v45  ;;  %694 = vmatpush1.bf16.msra.mxu1 %v5585_v46 }
  0x4a   :  { %280 = vmatprep.mubr.f32.mxu0 %v5310_v2  ;;  %393 = vmatprep.mubr.f32.mxu1 %v5310_v2 }
  0x4b   :  { %654 = vmatprep.subr.bf16.mxu0 %v5594_v14  ;;  %695 = vmatprep.subr.bf16.mxu1 %v5599_v47 }
  0x4c   :  { %4439 = vmatmul.mubr.msk.f32.gmra.mrb[8].mxu0 %vm41_vm1, %v127_v48  ;;  %4449 = vmatmul.mubr.msk.f32.gmra.mrb[8].mxu1 %vm41_vm1, %v127_v48 }
  0x4d   :  { %655 = vmatpush1.bf16.msra.mxu0 %v5611_v50  ;;  %696 = vmatpush1.bf16.msra.mxu1 %v5616_v51 }
  0x4e   :  { %286 = vmatprep.mubr.f32.mxu0 %v5310_v2  ;;  %399 = vmatprep.mubr.f32.mxu1 %v5310_v2 }
  0x4f   :  { %656 = vmatprep.subr.bf16.mxu0 %v5625_v19  ;;  %697 = vmatprep.subr.bf16.mxu1 %v5630_v52 }
  0x50   :  { %4440 = vmatmul.mubr.msk.f32.gmra.mrb[10].mxu0 %vm41_vm1, %v128_v53  ;;  %4450 = vmatmul.mubr.msk.f32.gmra.mrb[10].mxu1 %vm41_vm1, %v128_v53 }
  0x51   :  { %657 = vmatpush1.bf16.msra.mxu0 %v5642_v55  ;;  %698 = vmatpush1.bf16.msra.mxu1 %v5647_v56 }
  0x52   :  { %292 = vmatprep.mubr.f32.mxu0 %v5310_v2  ;;  %405 = vmatprep.mubr.f32.mxu1 %v5310_v2 }
  0x53   :  { %658 = vmatprep.subr.bf16.mxu0 %v5656_v27  ;;  %699 = vmatprep.subr.bf16.mxu1 %v5661_v57 }
  0x54   :  { %4441 = vmatmul.mubr.msk.f32.gmra.mrb[12].mxu0 %vm41_vm1, %v129_v58  ;;  %4451 = vmatmul.mubr.msk.f32.gmra.mrb[12].mxu1 %vm41_vm1, %v129_v58 }
  0x55   :  { %659 = vmatpush1.bf16.msra.mxu0 %v5673_v60  ;;  %700 = vmatpush1.bf16.msra.mxu1 %v5678_v61 }
  0x56   :  { %298 = vmatprep.mubr.f32.mxu0 %v5310_v2  ;;  %411 = vmatprep.mubr.f32.mxu1 %v5310_v2  ;;  %v7178_v2 = vsub.s32 2, %v5466_v13 }
  0x57   :  { %660 = vmatprep.subr.bf16.mxu0 %v5687_v34  ;;  %701 = vmatprep.subr.bf16.mxu1 %v5692_v62 }
  0x58   :  { %4442 = vmatmul.mubr.msk.f32.gmra.mrb[14].mxu0 %vm41_vm1, %v130_v63  ;;  %4452 = vmatmul.mubr.msk.f32.gmra.mrb[14].mxu1 %vm41_vm1, %v130_v63  ;;  %v146_v20 = vrot.slane %v133_v4, %v7178_v2 }
  0x59   :  { %661 = vmatpush1.bf16.msra.mxu0 %v5702_v0  ;;  %702 = vmatpush1.bf16.msra.mxu1 %v5707_v1 }
  0x5a   :  { %678 = vmatprep.mubr.bf16.mxu0 %v7179_v3  ;;  %719 = vmatprep.mubr.bf16.mxu1 %v7179_v3 }
  0x5b   :  { %954 = vmatprep.subr.bf16.mxu0 %v5373_v5  ;;  %995 = vmatprep.subr.bf16.mxu1 %v5429_v22 }
  0x5c   :  { %679 = vmatmul.mubr.bf16.vlgmr.msra.gmra.mrb[16].mxu0 %v7179_v3  ;;  %720 = vmatmul.mubr.bf16.vlgmr.msra.gmra.mrb[16].mxu1 %v7179_v3 }
  0x5d   :  { %955 = vmatpush1.bf16.msra.mxu0 %v5490_v29  ;;  %996 = vmatpush1.bf16.msra.mxu1 %v5495_v30 }
  0x5e   :  { %956 = vmatprep.subr.bf16.mxu0 %v5501_v6  ;;  %997 = vmatprep.subr.bf16.mxu1 %v5506_v7 }
  0x5f   :  { %986 = vmatprep.mubr.bf16.mxu0 %v7179_v3  ;;  %1027 = vmatprep.mubr.bf16.mxu1 %v7179_v3 }
  0x61   :  { %957 = vmatpush1.bf16.msra.mxu0 %v5518_v35  ;;  %998 = vmatpush1.bf16.msra.mxu1 %v5523_v36 }
  0x62   :  { %958 = vmatprep.subr.bf16.mxu0 %v5532_v8  ;;  %999 = vmatprep.subr.bf16.mxu1 %v5537_v37 }
  0x65   :  { %959 = vmatpush1.bf16.msra.mxu0 %v5549_v40  ;;  %1000 = vmatpush1.bf16.msra.mxu1 %v5554_v41 }
  0x66   :  { %960 = vmatprep.subr.bf16.mxu0 %v5563_v9  ;;  %1001 = vmatprep.subr.bf16.mxu1 %v5568_v42 }
  0x69   :  { %961 = vmatpush1.bf16.msra.mxu0 %v5580_v45  ;;  %1002 = vmatpush1.bf16.msra.mxu1 %v5585_v46 }
  0x6a   :  { %962 = vmatprep.subr.bf16.mxu0 %v5594_v14  ;;  %1003 = vmatprep.subr.bf16.mxu1 %v5599_v47 }
  0x6d   :  { %963 = vmatpush1.bf16.msra.mxu0 %v5611_v50  ;;  %1004 = vmatpush1.bf16.msra.mxu1 %v5616_v51 }
  0x6e   :  { %964 = vmatprep.subr.bf16.mxu0 %v5625_v19  ;;  %1005 = vmatprep.subr.bf16.mxu1 %v5630_v52 }
  0x71   :  { %965 = vmatpush1.bf16.msra.mxu0 %v5642_v55  ;;  %1006 = vmatpush1.bf16.msra.mxu1 %v5647_v56 }
  0x72   :  { %966 = vmatprep.subr.bf16.mxu0 %v5656_v27  ;;  %1007 = vmatprep.subr.bf16.mxu1 %v5661_v57 }
  0x75   :  { %967 = vmatpush1.bf16.msra.mxu0 %v5673_v60  ;;  %1008 = vmatpush1.bf16.msra.mxu1 %v5678_v61 }
  0x76   :  { %968 = vmatprep.subr.bf16.mxu0 %v5687_v34  ;;  %1009 = vmatprep.subr.bf16.mxu1 %v5692_v62 }
  0x79   :  { %969 = vmatpush1.bf16.msra.mxu0 %v5702_v0  ;;  %1010 = vmatpush1.bf16.msra.mxu1 %v5707_v1 }
  0x7a   :  { %1262 = vmatprep.subr.bf16.mxu0 %v5373_v5  ;;  %1303 = vmatprep.subr.bf16.mxu1 %v5429_v22  ;;  %v138_v5 = vrot.slane %v133_v4, %v5472_v16 }
 0x10f   :  { %v5761_v10 = vpop.f32.mrb[0].mxu0  ;;  %v5764_v12 = vpop.f32.mrb[0].mxu1 }
 0x110   :  { %v5767_v17 = vpop.f32.mrb[1].mxu0  ;;  %v5769_v18 = vpop.f32.mrb[1].mxu1 }
 0x113   :  { %v264_v23 = vpop.f32.mrb[2].mxu0  ;;  %v377_v25 = vpop.f32.mrb[2].mxu1 }
 0x114   :  { %v5778_v26 = vadd.f32 %v264_v23, %v138_v5  ;;  %v266_v28 = vpop.f32.mrb[3].mxu0  ;;  %v5780_v31 = vadd.f32 %v377_v25, %v146_v20  ;;  %v379_v32 = vpop.f32.mrb[3].mxu1 }
 0x115   :  { %v5782_v33 = vadd.f32 %v266_v28, %v142_v21  ;;  %v5784_v38 = vadd.f32 %v379_v32, %v150_v24 }
 0x117   :  { %v270_v39 = vpop.f32.mrb[4].mxu0  ;;  %v383_v43 = vpop.f32.mrb[4].mxu1 }
 0x118   :  { %v5786_v44 = vadd.f32 %v270_v39, %v138_v5  ;;  %v272_v48 = vpop.f32.mrb[5].mxu0  ;;  %v5788_v49 = vadd.f32 %v383_v43, %v146_v20  ;;  %v385_v53 = vpop.f32.mrb[5].mxu1 }
 0x119   :  { %v5790_v54 = vadd.f32 %v272_v48, %v142_v21  ;;  %v5792_v58 = vadd.f32 %v385_v53, %v150_v24 }
 0x11b   :  { %v276_v59 = vpop.f32.mrb[6].mxu0  ;;  %v389_v63 = vpop.f32.mrb[6].mxu1 }
 0x11c   :  { %v5794_v4 = vadd.f32 %v276_v59, %v138_v5  ;;  %v278_v23 = vpop.f32.mrb[7].mxu0  ;;  %v5796_v25 = vadd.f32 %v389_v63, %v146_v20  ;;  %v391_v28 = vpop.f32.mrb[7].mxu1 }
 0x11d   :  { %v5798_v32 = vadd.f32 %v278_v23, %v142_v21  ;;  %v5800_v39 = vadd.f32 %v391_v28, %v150_v24 }
 0x11e   :  { %7186 = vst [vmem:[#allocation6_spill] sm:$0xff] %v5794_v4  ;;  %7187 = vst [vmem:[#allocation7_spill] sm:$0xff] %v5796_v25 }
 0x11f   :  { %7188 = vst [vmem:[#allocation8_spill] sm:$0xff] %v5798_v32  ;;  %7189 = vst [vmem:[#allocation9_spill] sm:$0xff] %v5800_v39  ;;  %v282_v15 = vpop.f32.mrb[8].mxu0  ;;  %v395_v43 = vpop.f32.mrb[8].mxu1 }
 0x120   :  { %v5802_v11 = vadd.f32 %v282_v15, %v138_v5  ;;  %v284_v48 = vpop.f32.mrb[9].mxu0  ;;  %v5804_v2 = vadd.f32 %v395_v43, %v146_v20  ;;  %v397_v53 = vpop.f32.mrb[9].mxu1 }
 0x121   :  { %v5806_v3 = vadd.f32 %v284_v48, %v142_v21  ;;  %v5808_v59 = vadd.f32 %v397_v53, %v150_v24 }
 0x122   :  { %7190 = vst [vmem:[#allocation10_spill] sm:$0xff] %v5802_v11  ;;  %7191 = vst [vmem:[#allocation11_spill] sm:$0xff] %v5804_v2 }
 0x123   :  { %7192 = vst [vmem:[#allocation12_spill] sm:$0xff] %v5806_v3  ;;  %7193 = vst [vmem:[#allocation13_spill] sm:$0xff] %v5808_v59  ;;  %v288_v13 = vpop.f32.mrb[10].mxu0  ;;  %v401_v63 = vpop.f32.mrb[10].mxu1 }
 0x124   :  { %v5810_v16 = vadd.f32 %v288_v13, %v138_v5  ;;  %v290_v23 = vpop.f32.mrb[11].mxu0  ;;  %v5812_v32 = vadd.f32 %v401_v63, %v146_v20  ;;  %v403_v28 = vpop.f32.mrb[11].mxu1 }
 0x125   :  { %v5814_v39 = vadd.f32 %v290_v23, %v142_v21  ;;  %v5816_v15 = vadd.f32 %v403_v28, %v150_v24 }
 0x126   :  { %7194 = vst [vmem:[#allocation14_spill] sm:$0xff] %v5810_v16  ;;  %7195 = vst [vmem:[#allocation15_spill] sm:$0xff] %v5812_v32 }
 0x127   :  { %7196 = vst [vmem:[#allocation16_spill] sm:$0xff] %v5814_v39  ;;  %7197 = vst [vmem:[#allocation17_spill] sm:$0xff] %v5816_v15  ;;  %v294_v11 = vpop.f32.mrb[12].mxu0  ;;  %v407_v43 = vpop.f32.mrb[12].mxu1 }
 0x128   :  { %v5818_v2 = vadd.f32 %v294_v11, %v138_v5  ;;  %v296_v48 = vpop.f32.mrb[13].mxu0  ;;  %v5820_v3 = vadd.f32 %v407_v43, %v146_v20  ;;  %v409_v53 = vpop.f32.mrb[13].mxu1  ;;  %v259_v43 = vadd.f32 %v5761_v10, %v138_v5 }
 0x129   :  { %v5822_v59 = vadd.f32 %v296_v48, %v142_v21  ;;  %v5824_v13 = vadd.f32 %v409_v53, %v150_v24  ;;  %v261_v48 = vadd.f32 %v5767_v17, %v142_v21  ;;  %v374_v53 = vadd.f32 %v5769_v18, %v150_v24 }
 0x12a   :  { %7198 = vst [vmem:[#allocation18_spill] sm:$0xff] %v5818_v2  ;;  %7199 = vst [vmem:[#allocation19_spill] sm:$0xff] %v5820_v3  ;;  %v372_v3 = vadd.f32 %v5764_v12, %v146_v20 }
 0x12b   :  { %7200 = vst [vmem:[#allocation20_spill] sm:$0xff] %v5822_v59  ;;  %7201 = vst [vmem:[#allocation21_spill] sm:$0xff] %v5824_v13  ;;  %v300_v16 = vpop.f32.mrb[14].mxu0  ;;  %v413_v63 = vpop.f32.mrb[14].mxu1 }
 0x12c   :  { %v5826_v32 = vadd.f32 %v300_v16, %v138_v5  ;;  %v302_v23 = vpop.f32.mrb[15].mxu0  ;;  %v5828_v39 = vadd.f32 %v413_v63, %v146_v20  ;;  %v415_v28 = vpop.f32.mrb[15].mxu1 }
 0x12d   :  { %v5830_v15 = vadd.f32 %v302_v23, %v142_v21  ;;  %v5832_v11 = vadd.f32 %v415_v28, %v150_v24 }
 0x12e   :  { %7202 = vst [vmem:[#allocation22_spill] sm:$0xff] %v5826_v32  ;;  %7203 = vst [vmem:[#allocation23_spill] sm:$0xff] %v5828_v39 }
 0x12f   :  { %7204 = vst [vmem:[#allocation24_spill] sm:$0xff] %v5830_v15  ;;  %7205 = vst [vmem:[#allocation25_spill] sm:$0xff] %v5832_v11  ;;  %v680_v13 = vpop.f32.mrb[16].mxu0  ;;  %v721_v59 = vpop.f32.mrb[16].mxu1 }
 0x130   :  { %v728_v16 = vadd.f32 %v680_v13, %v259_v43  ;;  %v730_v32 = vadd.f32 %v721_v59, %v372_v3  ;;  %v682_v2 = vpop.f32.mrb[17].mxu0  ;;  %v723_v63 = vpop.f32.mrb[17].mxu1  ;;  %v7206_v43 = vmov 0  }
 0x131   :  { %v729_v39 = vadd.f32 %v682_v2, %v261_v48  ;;  %v731_v25 = vadd.f32 %v723_v63, %v374_v53  ;;  %v684_v23 = vpop.f32.mrb[18].mxu0  ;;  %v725_v15 = vpop.f32.mrb[18].mxu1 }
 0x132   :  { %v4485_v28 = vmul.f32 -1.442695, %v728_v16  ;;  %v685_v11 = vpop.f32.mrb[19].mxu0  ;;  %v726_v4 = vpop.f32.mrb[19].mxu1 }
 0x133   :  { %v4486_v10 = vmul.f32 -1.442695, %v729_v39  ;;  %v4487_v12 = vmul.f32 -1.442695, %v731_v25 }
 0x134   :  { %5022 = vpow2.f32 %v4485_v28 }
 0x135   :  { %5024 = vpow2.f32 %v4486_v10 }
 0x136   :  { %5026 = vpow2.f32 %v4487_v12 }
 0x137   :  { %5028 = vtanh.f32 %v730_v32 }
 0x13e   :  { %v5023_v17 = vpop.eup %5022 }
 0x13f   :  { %v5025_v5 = vpop.eup %5024  ;;  %v735_v18 = vadd.f32 1.0, %v5023_v17 }
 0x140   :  { %v741_v20 = vadd.f32 1.0, %v5025_v5  ;;  %v5027_v3 = vpop.eup %5026 }
 0x141   :  { %5030 = vrcp.f32 %v735_v18  ;;  %v5029_v2 = vpop.eup %5028  ;;  %v748_v15 = vadd.f32 1.0, %v5027_v3 }
 0x142   :  { %5032 = vrcp.f32 %v741_v20 }
 0x143   :  { %5034 = vrcp.f32 %v748_v15 }
 0x14b   :  { %v5031_v21 = vpop.eup %5030 }
 0x14c   :  { %v5033_v24 = vpop.eup %5032  ;;  %v752_v59 = vmul.f32 %v5031_v21, %v5029_v2 }
 0x14d   :  { %v751_v13 = vmul.f32 0.0, %v5033_v24  ;;  %v5035_v25 = vpop.eup %5034 }
 0x14f   :  { %v5838_v4 = vadd.f32 %v752_v59, %v751_v13 }
 0x151   :  { %5036 = vtanh.f32 %v5838_v4 }
 0x15b   :  { %v5037_v39 = vpop.eup %5036 }
 0x15c   :  { %v5841_v11 = vmul.f32 %v5037_v39, %v5035_v25 }
 0x15e   :  { %v761_v32 = vpack.c.bf16 %v5841_v11, %v5841_v11 }
 0x160   :  { %987 = vmatmul.mubr.bf16.vlgmr.msra.gmra.mrb[20].mxu0 %v761_v32  ;;  %1028 = vmatmul.mubr.bf16.vlgmr.msra.gmra.mrb[20].mxu1 %v761_v32 }
 0x161   :  { %1263 = vmatpush1.bf16.msra.mxu0 %v5490_v29  ;;  %1304 = vmatpush1.bf16.msra.mxu1 %v5495_v30 }
 0x162   :  { %1264 = vmatprep.subr.bf16.mxu0 %v5501_v6  ;;  %1305 = vmatprep.subr.bf16.mxu1 %v5506_v7 }
 0x163   :  { %1294 = vmatprep.mubr.bf16.mxu0 %v7206_v43  ;;  %1335 = vmatprep.mubr.bf16.mxu1 %v7206_v43 }
 0x165   :  { %1265 = vmatpush1.bf16.msra.mxu0 %v5518_v35  ;;  %1306 = vmatpush1.bf16.msra.mxu1 %v5523_v36 }
 0x166   :  { %1266 = vmatprep.subr.bf16.mxu0 %v5532_v8  ;;  %1307 = vmatprep.subr.bf16.mxu1 %v5537_v37 }
 0x169   :  { %1267 = vmatpush1.bf16.msra.mxu0 %v5549_v40  ;;  %1308 = vmatpush1.bf16.msra.mxu1 %v5554_v41 }
 0x16a   :  { %1268 = vmatprep.subr.bf16.mxu0 %v5563_v9  ;;  %1309 = vmatprep.subr.bf16.mxu1 %v5568_v42 }
 0x16d   :  { %1269 = vmatpush1.bf16.msra.mxu0 %v5580_v45  ;;  %1310 = vmatpush1.bf16.msra.mxu1 %v5585_v46 }
 0x16e   :  { %1270 = vmatprep.subr.bf16.mxu0 %v5594_v14  ;;  %1311 = vmatprep.subr.bf16.mxu1 %v5599_v47 }
 0x171   :  { %1271 = vmatpush1.bf16.msra.mxu0 %v5611_v50  ;;  %1312 = vmatpush1.bf16.msra.mxu1 %v5616_v51 }
 0x172   :  { %1272 = vmatprep.subr.bf16.mxu0 %v5625_v19  ;;  %1313 = vmatprep.subr.bf16.mxu1 %v5630_v52 }
 0x175   :  { %1273 = vmatpush1.bf16.msra.mxu0 %v5642_v55  ;;  %1314 = vmatpush1.bf16.msra.mxu1 %v5647_v56 }
 0x176   :  { %1274 = vmatprep.subr.bf16.mxu0 %v5656_v27  ;;  %1315 = vmatprep.subr.bf16.mxu1 %v5661_v57 }
 0x179   :  { %1275 = vmatpush1.bf16.msra.mxu0 %v5673_v60  ;;  %1316 = vmatpush1.bf16.msra.mxu1 %v5678_v61 }
 0x17a   :  { %1276 = vmatprep.subr.bf16.mxu0 %v5687_v34  ;;  %1317 = vmatprep.subr.bf16.mxu1 %v5692_v62 }
 0x17d   :  { %1277 = vmatpush1.bf16.msra.mxu0 %v5702_v0  ;;  %1318 = vmatpush1.bf16.msra.mxu1 %v5707_v1 }
 0x17e   :  { %1611 = vmatprep.subr.bf16.mxu1 %v5429_v22 }
 0x233   :  { %v988_v29 = vpop.f32.mrb[20].mxu0  ;;  %v1029_v48 = vpop.f32.mrb[20].mxu1 }
 0x234   :  { %v1036_v53 = vadd.f32 %v988_v29, %v5778_v26  ;;  %v1038_v16 = vadd.f32 %v1029_v48, %v5780_v31  ;;  %v990_v63 = vpop.f32.mrb[21].mxu0  ;;  %v1031_v23 = vpop.f32.mrb[21].mxu1 }
 0x235   :  { %v1037_v28 = vadd.f32 %v990_v63, %v5782_v33  ;;  %v1039_v10 = vadd.f32 %v1031_v23, %v5784_v38  ;;  %v992_v12 = vpop.f32.mrb[22].mxu0  ;;  %v1033_v17 = vpop.f32.mrb[22].mxu1  ;;  %v5964_v63 = vld [vmem:[%s7167_s4 + $0x24] ss:$16 sps:$4 sm:$0xff]   ;;  %v5969_v23 = vld [vmem:[%s7167_s4 + $0x2c] ss:$16 sps:$4 sm:$0xff]  }
 0x236   :  { %v4520_v5 = vmul.f32 -1.442695, %v1036_v53  ;;  %v993_v18 = vpop.f32.mrb[23].mxu0  ;;  %v1034_v20 = vpop.f32.mrb[23].mxu1  ;;  %v5988_v12 = vld [vmem:[%s7167_s4 + $0x44] ss:$16 sps:$4 sm:$0xff]  }
 0x237   :  { %v4521_v3 = vmul.f32 -1.442695, %v1037_v28  ;;  %v4522_v22 = vmul.f32 -1.442695, %v1039_v10  ;;  %v5974_v28 = vld [vmem:[%s7167_s4 + $0x20] ss:$16 sps:$4 sm:$0xff]  }
 0x238   :  { %5038 = vpow2.f32 %v4520_v5  ;;  %v5979_v10 = vld [vmem:[%s7167_s4 + $0x28] ss:$16 sps:$4 sm:$0xff]   ;;  %v5993_v17 = vld [vmem:[%s7167_s4 + $0x4c] ss:$16 sps:$4 sm:$0xff]   ;;  %v5998_v5 = vld [vmem:[%s7167_s4 + $0x40] ss:$16 sps:$4 sm:$0xff]  }
 0x239   :  { %5040 = vpow2.f32 %v4521_v3  ;;  %v6003_v18 = vld [vmem:[%s7167_s4 + $0x48] ss:$16 sps:$4 sm:$0xff]   ;;  %v6012_v20 = vld [vmem:[%s7167_s4 + $0x64] ss:$16 sps:$4 sm:$0xff]   ;;  %v6017_v3 = vld [vmem:[%s7167_s4 + $0x6c] ss:$16 sps:$4 sm:$0xff]  }
 0x23a   :  { %5042 = vpow2.f32 %v4522_v22  ;;  %v6022_v22 = vld [vmem:[%s7167_s4 + $0x60] ss:$16 sps:$4 sm:$0xff]  }
 0x23b   :  { %5044 = vtanh.f32 %v1038_v16  ;;  %v5957_v16 = vld [vmem:[%s7167_s4 + $0x8] ss:$16 sps:$4 sm:$0xff]  }
 0x242   :  { %v5039_v2 = vpop.eup %5038 }
 0x243   :  { %v5041_v21 = vpop.eup %5040  ;;  %v1043_v26 = vadd.f32 1.0, %v5039_v2  ;;  %v6027_v2 = vld [vmem:[%s7167_s4 + $0x68] ss:$16 sps:$4 sm:$0xff]  }
 0x244   :  { %v1049_v31 = vadd.f32 1.0, %v5041_v21  ;;  %v5043_v33 = vpop.eup %5042  ;;  %v6036_v21 = vld [vmem:[%s7167_s4 + $0x84] ss:$16 sps:$4 sm:$0xff]  }
 0x245   :  { %5046 = vrcp.f32 %v1043_v26  ;;  %v5045_v24 = vpop.eup %5044  ;;  %v1056_v13 = vadd.f32 1.0, %v5043_v33  ;;  %v6041_v26 = vld [vmem:[%s7167_s4 + $0x8c] ss:$16 sps:$4 sm:$0xff]   ;;  %v6051_v33 = vld [vmem:[%s7167_s4 + $0x88] ss:$16 sps:$4 sm:$0xff]  }
 0x246   :  { %5048 = vrcp.f32 %v1049_v31  ;;  %v6046_v31 = vld [vmem:[%s7167_s4 + $0x80] ss:$16 sps:$4 sm:$0xff]  }
 0x247   :  { %5050 = vrcp.f32 %v1056_v13  ;;  %v6081_v13 = vld [vmem:[%s7167_s4 + $0xc4] ss:$16 sps:$4 sm:$0xff]  }
 0x24f   :  { %v5047_v38 = vpop.eup %5046 }
 0x250   :  { %v5049_v59 = vpop.eup %5048  ;;  %v1060_v15 = vmul.f32 %v5047_v38, %v5045_v24  ;;  %v6058_v24 = vld [vmem:[%s7167_s4 + $0xa4] ss:$16 sps:$4 sm:$0xff]   ;;  %v6065_v38 = vld [vmem:[%s7167_s4 + $0xa0] ss:$16 sps:$4 sm:$0xff]  }
 0x251   :  { %v1059_v25 = vmul.f32 %v5049_v59, %v5838_v4  ;;  %v5051_v32 = vpop.eup %5050  ;;  %v5952_v4 = vld [vmem:[%s7167_s4 + $0xc] ss:$16 sps:$4 sm:$0xff]   ;;  %v6070_v59 = vld [vmem:[%s7167_s4 + $0xa8] ss:$16 sps:$4 sm:$0xff]  }
 0x253   :  { %v5883_v39 = vadd.f32 %v1060_v15, %v1059_v25  ;;  %v6075_v15 = vld [vmem:[%s7167_s4 + $0xac] ss:$16 sps:$4 sm:$0xff]  }
 0x254   :  { %v6086_v25 = vld [vmem:[%s7167_s4 + $0xcc] ss:$16 sps:$4 sm:$0xff]  }
 0x255   :  { %5052 = vtanh.f32 %v5883_v39 }
 0x25f   :  { %v5053_v29 = vpop.eup %5052 }
 0x260   :  { %v5886_v48 = vmul.f32 %v5053_v29, %v5051_v32  ;;  %v6099_v32 = vld [vmem:[%s7167_s4 + $0xc8] ss:$16 sps:$4 sm:$0xff]   ;;  %v6106_v29 = vld [vmem:[%s7167_s4 + $0xe4] ss:$16 sps:$4 sm:$0xff]  }
 0x262   :  { %v1069_v53 = vpack.c.bf16 %v5886_v48, %v5886_v48 }
 0x264   :  { %1295 = vmatmul.mubr.bf16.vlgmr.msra.gmra.mrb[24].mxu0 %v1069_v53  ;;  %1336 = vmatmul.mubr.bf16.vlgmr.msra.gmra.mrb[24].mxu1 %v1069_v53  ;;  %v6111_v53 = vld [vmem:[%s7167_s4 + $0xec] ss:$16 sps:$4 sm:$0xff]  }
 0x265   :  { %1612 = vmatpush1.bf16.msra.mxu1 %v5495_v30  ;;  %1602 = vmatprep.mubr.bf16.mxu0 %v7206_v43  ;;  %v5910_v30 = vld [vmem:[%s7167_s4 + $0x4] ss:$16 sps:$4 sm:$0xff]  }
 0x266   :  { %1613 = vmatprep.subr.bf16.mxu1 %v5506_v7  ;;  %1643 = vmatprep.mubr.bf16.mxu1 %v7206_v43  ;;  %v5915_v7 = vld [vmem:[%s7167_s4] ss:$16 sps:$4 sm:$0xff]  }
 0x267   :  { %1570 = vmatprep.subr.bf16.mxu0 %v5910_v30 }
 0x268   :  { %1571 = vmatpush1.bf16.msra.mxu0 %v5915_v7 }
 0x269   :  { %1614 = vmatpush1.bf16.msra.mxu1 %v5523_v36  ;;  %1572 = vmatprep.subr.bf16.mxu0 %v5501_v6 }
 0x26a   :  { %1615 = vmatprep.subr.bf16.mxu1 %v5537_v37 }
 0x26c   :  { %1573 = vmatpush1.bf16.msra.mxu0 %v5518_v35 }
 0x26d   :  { %1616 = vmatpush1.bf16.msra.mxu1 %v5554_v41  ;;  %1574 = vmatprep.subr.bf16.mxu0 %v5532_v8 }
 0x26e   :  { %1617 = vmatprep.subr.bf16.mxu1 %v5568_v42 }
 0x270   :  { %1575 = vmatpush1.bf16.msra.mxu0 %v5549_v40 }
 0x271   :  { %1618 = vmatpush1.bf16.msra.mxu1 %v5585_v46  ;;  %1576 = vmatprep.subr.bf16.mxu0 %v5563_v9 }
 0x272   :  { %1619 = vmatprep.subr.bf16.mxu1 %v5599_v47 }
 0x274   :  { %1577 = vmatpush1.bf16.msra.mxu0 %v5580_v45 }
 0x275   :  { %1620 = vmatpush1.bf16.msra.mxu1 %v5616_v51  ;;  %1578 = vmatprep.subr.bf16.mxu0 %v5594_v14 }
 0x276   :  { %1621 = vmatprep.subr.bf16.mxu1 %v5630_v52 }
 0x278   :  { %1579 = vmatpush1.bf16.msra.mxu0 %v5611_v50 }
 0x279   :  { %1622 = vmatpush1.bf16.msra.mxu1 %v5647_v56  ;;  %1580 = vmatprep.subr.bf16.mxu0 %v5625_v19 }
 0x27a   :  { %1623 = vmatprep.subr.bf16.mxu1 %v5661_v57 }
 0x27c   :  { %1581 = vmatpush1.bf16.msra.mxu0 %v5642_v55 }
 0x27d   :  { %1624 = vmatpush1.bf16.msra.mxu1 %v5678_v61  ;;  %1582 = vmatprep.subr.bf16.mxu0 %v5656_v27 }
 0x27e   :  { %1625 = vmatprep.subr.bf16.mxu1 %v5692_v62 }
 0x280   :  { %1583 = vmatpush1.bf16.msra.mxu0 %v5673_v60 }
 0x281   :  { %1626 = vmatpush1.bf16.msra.mxu1 %v5707_v1  ;;  %1584 = vmatprep.subr.bf16.mxu0 %v5687_v34 }
 0x282   :  { %1919 = vmatprep.subr.bf16.mxu1 %v5952_v4 }
 0x284   :  { %1585 = vmatpush1.bf16.msra.mxu0 %v5702_v0 }
 0x285   :  { %1878 = vmatprep.subr.bf16.mxu0 %v5910_v30 }
 0x337   :  { %v1296_v6 = vpop.f32.mrb[24].mxu0  ;;  %v1337_v35 = vpop.f32.mrb[24].mxu1 }
 0x338   :  { %v1344_v36 = vadd.f32 %v1296_v6, %v5786_v44  ;;  %v1346_v8 = vadd.f32 %v1337_v35, %v5788_v49  ;;  %v1298_v37 = vpop.f32.mrb[25].mxu0  ;;  %v1339_v40 = vpop.f32.mrb[25].mxu1  ;;  %v6118_v6 = vld [vmem:[%s7167_s4 + $0xe0] ss:$16 sps:$4 sm:$0xff]   ;;  %v6123_v35 = vld [vmem:[%s7167_s4 + $0xe8] ss:$16 sps:$4 sm:$0xff]  }
 0x339   :  { %v1345_v41 = vadd.f32 %v1298_v37, %v5790_v54  ;;  %v1347_v9 = vadd.f32 %v1339_v40, %v5792_v58  ;;  %v1300_v42 = vpop.f32.mrb[26].mxu0  ;;  %v1341_v45 = vpop.f32.mrb[26].mxu1  ;;  %v7207_v37 = vld [vmem:[#allocation6_spill] sm:$0xff] }
 0x33a   :  { %v4555_v46 = vmul.f32 -1.442695, %v1344_v36  ;;  %v1301_v14 = vpop.f32.mrb[27].mxu0  ;;  %v1342_v47 = vpop.f32.mrb[27].mxu1 }
 0x33b   :  { %v4556_v50 = vmul.f32 -1.442695, %v1345_v41  ;;  %v4557_v51 = vmul.f32 -1.442695, %v1347_v9  ;;  %v7208_v41 = vld [vmem:[#allocation7_spill] sm:$0xff]  ;;  %v7210_v47 = vld [vmem:[#allocation9_spill] sm:$0xff] }
 0x33c   :  { %5054 = vpow2.f32 %v4555_v46  ;;  %v7209_v46 = vld [vmem:[#allocation8_spill] sm:$0xff] }
 0x33d   :  { %5056 = vpow2.f32 %v4556_v50 }
 0x33e   :  { %5058 = vpow2.f32 %v4557_v51 }
 0x33f   :  { %5060 = vtanh.f32 %v1346_v8 }
 0x346   :  { %v5055_v19 = vpop.eup %5054 }
 0x347   :  { %v5057_v52 = vpop.eup %5056  ;;  %v1351_v55 = vadd.f32 1.0, %v5055_v19 }
 0x348   :  { %v1357_v56 = vadd.f32 1.0, %v5057_v52  ;;  %v5059_v27 = vpop.eup %5058 }
 0x349   :  { %5062 = vrcp.f32 %v1351_v55  ;;  %v5061_v57 = vpop.eup %5060  ;;  %v1364_v62 = vadd.f32 1.0, %v5059_v27 }
 0x34a   :  { %5064 = vrcp.f32 %v1357_v56 }
 0x34b   :  { %5066 = vrcp.f32 %v1364_v62 }
 0x353   :  { %v5063_v60 = vpop.eup %5062 }
 0x354   :  { %v5065_v61 = vpop.eup %5064  ;;  %v1368_v34 = vmul.f32 %v5063_v60, %v5061_v57 }
 0x355   :  { %v1367_v0 = vmul.f32 %v5065_v61, %v5883_v39  ;;  %v5067_v44 = vpop.eup %5066  ;;  %v6094_v39 = vld [vmem:[%s7167_s4 + $0xc0] ss:$16 sps:$4 sm:$0xff]  }
 0x357   :  { %v5939_v1 = vadd.f32 %v1368_v34, %v1367_v0 }
 0x359   :  { %5068 = vtanh.f32 %v5939_v1 }
 0x363   :  { %v5069_v49 = vpop.eup %5068 }
 0x364   :  { %v5942_v54 = vmul.f32 %v5069_v49, %v5067_v44 }
 0x366   :  { %v1377_v58 = vpack.c.bf16 %v5942_v54, %v5942_v54 }
 0x368   :  { %1603 = vmatmul.mubr.bf16.vlgmr.msra.gmra.mrb[28].mxu0 %v1377_v58  ;;  %1644 = vmatmul.mubr.bf16.vlgmr.msra.gmra.mrb[28].mxu1 %v1377_v58 }
 0x369   :  { %1879 = vmatpush1.bf16.msra.mxu0 %v5915_v7  ;;  %1910 = vmatprep.mubr.bf16.mxu0 %v7206_v43 }
 0x36a   :  { %1951 = vmatprep.mubr.bf16.mxu1 %v7206_v43  ;;  %1920 = vmatpush1.bf16.msra.mxu1 %v5957_v16 }
 0x36b   :  { %1880 = vmatprep.subr.bf16.mxu0 %v5964_v63  ;;  %1921 = vmatprep.subr.bf16.mxu1 %v5969_v23 }
 0x36d   :  { %1881 = vmatpush1.bf16.msra.mxu0 %v5974_v28 }
 0x36e   :  { %1922 = vmatpush1.bf16.msra.mxu1 %v5979_v10  ;;  %1882 = vmatprep.subr.bf16.mxu0 %v5988_v12 }
 0x36f   :  { %1923 = vmatprep.subr.bf16.mxu1 %v5993_v17 }
 0x371   :  { %1883 = vmatpush1.bf16.msra.mxu0 %v5998_v5 }
 0x372   :  { %1924 = vmatpush1.bf16.msra.mxu1 %v6003_v18  ;;  %1884 = vmatprep.subr.bf16.mxu0 %v6012_v20 }
 0x373   :  { %1925 = vmatprep.subr.bf16.mxu1 %v6017_v3 }
 0x375   :  { %1885 = vmatpush1.bf16.msra.mxu0 %v6022_v22 }
 0x376   :  { %1926 = vmatpush1.bf16.msra.mxu1 %v6027_v2  ;;  %1886 = vmatprep.subr.bf16.mxu0 %v6036_v21 }
 0x377   :  { %1927 = vmatprep.subr.bf16.mxu1 %v6041_v26 }
 0x379   :  { %1887 = vmatpush1.bf16.msra.mxu0 %v6046_v31 }
 0x37a   :  { %1928 = vmatpush1.bf16.msra.mxu1 %v6051_v33  ;;  %1888 = vmatprep.subr.bf16.mxu0 %v6058_v24 }
 0x37b   :  { %1929 = vmatprep.subr.bf16.mxu1 %v6075_v15 }
 0x37d   :  { %1889 = vmatpush1.bf16.msra.mxu0 %v6065_v38 }
 0x37e   :  { %1930 = vmatpush1.bf16.msra.mxu1 %v6070_v59  ;;  %1890 = vmatprep.subr.bf16.mxu0 %v6081_v13 }
 0x37f   :  { %1931 = vmatprep.subr.bf16.mxu1 %v6086_v25 }
 0x381   :  { %1891 = vmatpush1.bf16.msra.mxu0 %v6094_v39 }
 0x382   :  { %1932 = vmatpush1.bf16.msra.mxu1 %v6099_v32  ;;  %1892 = vmatprep.subr.bf16.mxu0 %v6106_v29 }
 0x383   :  { %1933 = vmatprep.subr.bf16.mxu1 %v6111_v53 }
 0x385   :  { %1893 = vmatpush1.bf16.msra.mxu0 %v6118_v6 }
 0x386   :  { %1934 = vmatpush1.bf16.msra.mxu1 %v6123_v35  ;;  %2186 = vmatprep.subr.bf16.mxu0 %v5910_v30 }
 0x387   :  { %2227 = vmatprep.subr.bf16.mxu1 %v5952_v4 }
 0x43b   :  { %v1604_v36 = vpop.f32.mrb[28].mxu0  ;;  %v1645_v8 = vpop.f32.mrb[28].mxu1 }
 0x43c   :  { %v1652_v40 = vadd.f32 %v1604_v36, %v7207_v37  ;;  %v1654_v9 = vadd.f32 %v1645_v8, %v7208_v41  ;;  %v1606_v42 = vpop.f32.mrb[29].mxu0  ;;  %v1647_v45 = vpop.f32.mrb[29].mxu1 }
 0x43d   :  { %v1653_v14 = vadd.f32 %v1606_v42, %v7209_v46  ;;  %v1655_v50 = vadd.f32 %v1647_v45, %v7210_v47  ;;  %v1608_v51 = vpop.f32.mrb[30].mxu0  ;;  %v1649_v19 = vpop.f32.mrb[30].mxu1 }
 0x43e   :  { %v4590_v52 = vmul.f32 -1.442695, %v1652_v40  ;;  %v1609_v55 = vpop.f32.mrb[31].mxu0  ;;  %v1650_v56 = vpop.f32.mrb[31].mxu1 }
 0x43f   :  { %v4591_v27 = vmul.f32 -1.442695, %v1653_v14  ;;  %v4592_v57 = vmul.f32 -1.442695, %v1655_v50  ;;  %v7211_v14 = vld [vmem:[#allocation10_spill] sm:$0xff]  ;;  %v7212_v50 = vld [vmem:[#allocation11_spill] sm:$0xff] }
 0x440   :  { %5070 = vpow2.f32 %v4590_v52  ;;  %v7213_v55 = vld [vmem:[#allocation12_spill] sm:$0xff] }
 0x441   :  { %5072 = vpow2.f32 %v4591_v27  ;;  %v7214_v27 = vld [vmem:[#allocation13_spill] sm:$0xff] }
 0x442   :  { %5074 = vpow2.f32 %v4592_v57 }
 0x443   :  { %5076 = vtanh.f32 %v1654_v9 }
 0x44a   :  { %v5071_v60 = vpop.eup %5070 }
 0x44b   :  { %v5073_v61 = vpop.eup %5072  ;;  %v1659_v34 = vadd.f32 1.0, %v5071_v60 }
 0x44c   :  { %v1665_v62 = vadd.f32 1.0, %v5073_v61  ;;  %v5075_v0 = vpop.eup %5074 }
 0x44d   :  { %5078 = vrcp.f32 %v1659_v34  ;;  %v5077_v44 = vpop.eup %5076  ;;  %v1672_v8 = vadd.f32 1.0, %v5075_v0 }
 0x44e   :  { %5080 = vrcp.f32 %v1665_v62 }
 0x44f   :  { %5082 = vrcp.f32 %v1672_v8 }
 0x457   :  { %v5079_v49 = vpop.eup %5078 }
 0x458   :  { %v5081_v58 = vpop.eup %5080  ;;  %v1676_v36 = vmul.f32 %v5079_v49, %v5077_v44 }
 0x459   :  { %v1675_v37 = vmul.f32 %v5081_v58, %v5939_v1  ;;  %v5083_v41 = vpop.eup %5082 }
 0x45b   :  { %v6136_v40 = vadd.f32 %v1676_v36, %v1675_v37 }
 0x45d   :  { %5084 = vtanh.f32 %v6136_v40 }
 0x467   :  { %v5085_v42 = vpop.eup %5084 }
 0x468   :  { %v6139_v45 = vmul.f32 %v5085_v42, %v5083_v41 }
 0x46a   :  { %v1685_v9 = vpack.c.bf16 %v6139_v45, %v6139_v45 }
 0x46c   :  { %1911 = vmatmul.mubr.bf16.vlgmr.msra.gmra.mrb[32].mxu0 %v1685_v9  ;;  %1952 = vmatmul.mubr.bf16.vlgmr.msra.gmra.mrb[32].mxu1 %v1685_v9 }
 0x46d   :  { %2187 = vmatpush1.bf16.msra.mxu0 %v5915_v7  ;;  %2228 = vmatpush1.bf16.msra.mxu1 %v5957_v16 }
 0x46e   :  { %2188 = vmatprep.subr.bf16.mxu0 %v5964_v63  ;;  %2229 = vmatprep.subr.bf16.mxu1 %v5969_v23 }
 0x46f   :  { %2218 = vmatprep.mubr.bf16.mxu0 %v7206_v43  ;;  %2259 = vmatprep.mubr.bf16.mxu1 %v7206_v43 }
 0x471   :  { %2189 = vmatpush1.bf16.msra.mxu0 %v5974_v28  ;;  %2230 = vmatpush1.bf16.msra.mxu1 %v5979_v10 }
 0x472   :  { %2190 = vmatprep.subr.bf16.mxu0 %v5988_v12  ;;  %2231 = vmatprep.subr.bf16.mxu1 %v5993_v17 }
 0x475   :  { %2191 = vmatpush1.bf16.msra.mxu0 %v5998_v5  ;;  %2232 = vmatpush1.bf16.msra.mxu1 %v6003_v18 }
 0x476   :  { %2192 = vmatprep.subr.bf16.mxu0 %v6012_v20  ;;  %2233 = vmatprep.subr.bf16.mxu1 %v6017_v3 }
 0x479   :  { %2193 = vmatpush1.bf16.msra.mxu0 %v6022_v22  ;;  %2234 = vmatpush1.bf16.msra.mxu1 %v6027_v2 }
 0x47a   :  { %2194 = vmatprep.subr.bf16.mxu0 %v6036_v21  ;;  %2235 = vmatprep.subr.bf16.mxu1 %v6041_v26 }
 0x47d   :  { %2195 = vmatpush1.bf16.msra.mxu0 %v6046_v31  ;;  %2236 = vmatpush1.bf16.msra.mxu1 %v6051_v33 }
 0x47e   :  { %2196 = vmatprep.subr.bf16.mxu0 %v6058_v24  ;;  %2237 = vmatprep.subr.bf16.mxu1 %v6075_v15 }
 0x481   :  { %2197 = vmatpush1.bf16.msra.mxu0 %v6065_v38  ;;  %2238 = vmatpush1.bf16.msra.mxu1 %v6070_v59 }
 0x482   :  { %2198 = vmatprep.subr.bf16.mxu0 %v6081_v13  ;;  %2239 = vmatprep.subr.bf16.mxu1 %v6086_v25 }
 0x485   :  { %2199 = vmatpush1.bf16.msra.mxu0 %v6094_v39  ;;  %2240 = vmatpush1.bf16.msra.mxu1 %v6099_v32 }
 0x486   :  { %2200 = vmatprep.subr.bf16.mxu0 %v6106_v29  ;;  %2241 = vmatprep.subr.bf16.mxu1 %v6111_v53 }
 0x489   :  { %2201 = vmatpush1.bf16.msra.mxu0 %v6118_v6  ;;  %2242 = vmatpush1.bf16.msra.mxu1 %v6123_v35 }
 0x48a   :  { %2494 = vmatprep.subr.bf16.mxu0 %v5910_v30  ;;  %2535 = vmatprep.subr.bf16.mxu1 %v5952_v4 }
 0x53f   :  { %v1912_v1 = vpop.f32.mrb[32].mxu0  ;;  %v1953_v46 = vpop.f32.mrb[32].mxu1 }
 0x540   :  { %v1960_v47 = vadd.f32 %v1912_v1, %v7211_v14  ;;  %v1962_v51 = vadd.f32 %v1953_v46, %v7212_v50  ;;  %v1914_v19 = vpop.f32.mrb[33].mxu0  ;;  %v1955_v52 = vpop.f32.mrb[33].mxu1 }
 0x541   :  { %v1961_v56 = vadd.f32 %v1914_v19, %v7213_v55  ;;  %v1963_v57 = vadd.f32 %v1955_v52, %v7214_v27  ;;  %v1916_v60 = vpop.f32.mrb[34].mxu0  ;;  %v1957_v61 = vpop.f32.mrb[34].mxu1  ;;  %v7215_v55 = vld [vmem:[#allocation14_spill] sm:$0xff]  ;;  %v7216_v27 = vld [vmem:[#allocation15_spill] sm:$0xff] }
 0x542   :  { %v4625_v34 = vmul.f32 -1.442695, %v1960_v47  ;;  %v1917_v62 = vpop.f32.mrb[35].mxu0  ;;  %v1958_v0 = vpop.f32.mrb[35].mxu1 }
 0x543   :  { %v4626_v30 = vmul.f32 -1.442695, %v1961_v56  ;;  %v4627_v44 = vmul.f32 -1.442695, %v1963_v57  ;;  %v7218_v0 = vld [vmem:[#allocation17_spill] sm:$0xff] }
 0x544   :  { %5086 = vpow2.f32 %v4625_v34  ;;  %v7217_v34 = vld [vmem:[#allocation16_spill] sm:$0xff] }
 0x545   :  { %5088 = vpow2.f32 %v4626_v30 }
 0x546   :  { %5090 = vpow2.f32 %v4627_v44 }
 0x547   :  { %5092 = vtanh.f32 %v1962_v51 }
 0x54e   :  { %v5087_v49 = vpop.eup %5086 }
 0x54f   :  { %v5089_v58 = vpop.eup %5088  ;;  %v1967_v36 = vadd.f32 1.0, %v5087_v49 }
 0x550   :  { %v1973_v8 = vadd.f32 1.0, %v5089_v58  ;;  %v5091_v37 = vpop.eup %5090 }
 0x551   :  { %5094 = vrcp.f32 %v1967_v36  ;;  %v5093_v41 = vpop.eup %5092  ;;  %v1980_v46 = vadd.f32 1.0, %v5091_v37 }
 0x552   :  { %5096 = vrcp.f32 %v1973_v8 }
 0x553   :  { %5098 = vrcp.f32 %v1980_v46 }
 0x55b   :  { %v5095_v42 = vpop.eup %5094 }
 0x55c   :  { %v5097_v9 = vpop.eup %5096  ;;  %v1984_v1 = vmul.f32 %v5095_v42, %v5093_v41 }
 0x55d   :  { %v1983_v14 = vmul.f32 %v5097_v9, %v6136_v40  ;;  %v5099_v50 = vpop.eup %5098 }
 0x55f   :  { %v6182_v47 = vadd.f32 %v1984_v1, %v1983_v14 }
 0x561   :  { %5100 = vtanh.f32 %v6182_v47 }
 0x56b   :  { %v5101_v19 = vpop.eup %5100 }
 0x56c   :  { %v6185_v52 = vmul.f32 %v5101_v19, %v5099_v50 }
 0x56e   :  { %v1993_v51 = vpack.c.bf16 %v6185_v52, %v6185_v52 }
 0x570   :  { %2219 = vmatmul.mubr.bf16.vlgmr.msra.gmra.mrb[36].mxu0 %v1993_v51  ;;  %2260 = vmatmul.mubr.bf16.vlgmr.msra.gmra.mrb[36].mxu1 %v1993_v51 }
 0x571   :  { %2495 = vmatpush1.bf16.msra.mxu0 %v5915_v7  ;;  %2536 = vmatpush1.bf16.msra.mxu1 %v5957_v16 }
 0x572   :  { %2496 = vmatprep.subr.bf16.mxu0 %v5964_v63  ;;  %2537 = vmatprep.subr.bf16.mxu1 %v5969_v23 }
 0x573   :  { %2526 = vmatprep.mubr.bf16.mxu0 %v7206_v43  ;;  %2567 = vmatprep.mubr.bf16.mxu1 %v7206_v43 }
 0x575   :  { %2497 = vmatpush1.bf16.msra.mxu0 %v5974_v28  ;;  %2538 = vmatpush1.bf16.msra.mxu1 %v5979_v10 }
 0x576   :  { %2498 = vmatprep.subr.bf16.mxu0 %v5988_v12  ;;  %2539 = vmatprep.subr.bf16.mxu1 %v5993_v17 }
 0x579   :  { %2499 = vmatpush1.bf16.msra.mxu0 %v5998_v5  ;;  %2540 = vmatpush1.bf16.msra.mxu1 %v6003_v18 }
 0x57a   :  { %2500 = vmatprep.subr.bf16.mxu0 %v6012_v20  ;;  %2541 = vmatprep.subr.bf16.mxu1 %v6017_v3 }
 0x57d   :  { %2501 = vmatpush1.bf16.msra.mxu0 %v6022_v22  ;;  %2542 = vmatpush1.bf16.msra.mxu1 %v6027_v2 }
 0x57e   :  { %2502 = vmatprep.subr.bf16.mxu0 %v6036_v21  ;;  %2543 = vmatprep.subr.bf16.mxu1 %v6041_v26 }
 0x581   :  { %2503 = vmatpush1.bf16.msra.mxu0 %v6046_v31  ;;  %2544 = vmatpush1.bf16.msra.mxu1 %v6051_v33 }
 0x582   :  { %2504 = vmatprep.subr.bf16.mxu0 %v6058_v24  ;;  %2545 = vmatprep.subr.bf16.mxu1 %v6075_v15 }
 0x585   :  { %2505 = vmatpush1.bf16.msra.mxu0 %v6065_v38  ;;  %2546 = vmatpush1.bf16.msra.mxu1 %v6070_v59 }
 0x586   :  { %2506 = vmatprep.subr.bf16.mxu0 %v6081_v13  ;;  %2547 = vmatprep.subr.bf16.mxu1 %v6086_v25 }
 0x589   :  { %2507 = vmatpush1.bf16.msra.mxu0 %v6094_v39  ;;  %2548 = vmatpush1.bf16.msra.mxu1 %v6099_v32 }
 0x58a   :  { %2508 = vmatprep.subr.bf16.mxu0 %v6106_v29  ;;  %2549 = vmatprep.subr.bf16.mxu1 %v6111_v53 }
 0x58d   :  { %2509 = vmatpush1.bf16.msra.mxu0 %v6118_v6  ;;  %2550 = vmatpush1.bf16.msra.mxu1 %v6123_v35 }
 0x58e   :  { %2843 = vmatprep.subr.bf16.mxu1 %v5952_v4 }
 0x643   :  { %v2220_v7 = vpop.f32.mrb[36].mxu0  ;;  %v2261_v40 = vpop.f32.mrb[36].mxu1 }
 0x644   :  { %v2268_v56 = vadd.f32 %v2220_v7, %v7215_v55  ;;  %v2270_v57 = vadd.f32 %v2261_v40, %v7216_v27  ;;  %v2222_v60 = vpop.f32.mrb[37].mxu0  ;;  %v2263_v61 = vpop.f32.mrb[37].mxu1 }
 0x645   :  { %v2269_v62 = vadd.f32 %v2222_v60, %v7217_v34  ;;  %v2271_v30 = vadd.f32 %v2263_v61, %v7218_v0  ;;  %v2224_v44 = vpop.f32.mrb[38].mxu0  ;;  %v2265_v49 = vpop.f32.mrb[38].mxu1 }
 0x646   :  { %v4660_v58 = vmul.f32 -1.442695, %v2268_v56  ;;  %v2225_v36 = vpop.f32.mrb[39].mxu0  ;;  %v2266_v8 = vpop.f32.mrb[39].mxu1 }
 0x647   :  { %v4661_v37 = vmul.f32 -1.442695, %v2269_v62  ;;  %v4662_v4 = vmul.f32 -1.442695, %v2271_v30  ;;  %v4924_v36 = vld [vmem:[%s7172_s6] ss:$16 sps:$4 sm:$0xff]  }
 0x648   :  { %5102 = vpow2.f32 %v4660_v58  ;;  %v4927_v8 = vld [vmem:[%s7172_s6 + $0x8] ss:$16 sps:$4 sm:$0xff]  }
 0x649   :  { %5104 = vpow2.f32 %v4661_v37 }
 0x64a   :  { %5106 = vpow2.f32 %v4662_v4  ;;  %v4932_v4 = vld [vmem:[%s7172_s6 + $0x24] ss:$16 sps:$4 sm:$0xff]  }
 0x64b   :  { %5108 = vtanh.f32 %v2270_v57 }
 0x652   :  { %v5103_v41 = vpop.eup %5102 }
 0x653   :  { %v5105_v42 = vpop.eup %5104  ;;  %v2275_v9 = vadd.f32 1.0, %v5103_v41  ;;  %v4935_v41 = vld [vmem:[%s7172_s6 + $0x2c] ss:$16 sps:$4 sm:$0xff]  }
 0x654   :  { %v2281_v1 = vadd.f32 1.0, %v5105_v42  ;;  %v5107_v46 = vpop.eup %5106  ;;  %v4930_v42 = vld [vmem:[%s7172_s6 + $0x20] ss:$16 sps:$4 sm:$0xff]  }
 0x655   :  { %5110 = vrcp.f32 %v2275_v9  ;;  %v5109_v14 = vpop.eup %5108  ;;  %v2288_v7 = vadd.f32 1.0, %v5107_v46  ;;  %v4933_v9 = vld [vmem:[%s7172_s6 + $0x28] ss:$16 sps:$4 sm:$0xff]   ;;  %v4941_v46 = vld [vmem:[%s7172_s6 + $0x4c] ss:$16 sps:$4 sm:$0xff]  }
 0x656   :  { %5112 = vrcp.f32 %v2281_v1  ;;  %v4938_v1 = vld [vmem:[%s7172_s6 + $0x44] ss:$16 sps:$4 sm:$0xff]  }
 0x657   :  { %5114 = vrcp.f32 %v2288_v7  ;;  %v4942_v7 = vld [vmem:[%s7172_s6 + $0x60] ss:$16 sps:$4 sm:$0xff]  }
 0x65f   :  { %v5111_v50 = vpop.eup %5110 }
 0x660   :  { %v5113_v19 = vpop.eup %5112  ;;  %v2292_v51 = vmul.f32 %v5111_v50, %v5109_v14  ;;  %v4936_v14 = vld [vmem:[%s7172_s6 + $0x40] ss:$16 sps:$4 sm:$0xff]   ;;  %v4939_v50 = vld [vmem:[%s7172_s6 + $0x48] ss:$16 sps:$4 sm:$0xff]  }
 0x661   :  { %v2291_v40 = vmul.f32 %v5113_v19, %v6182_v47  ;;  %v5115_v56 = vpop.eup %5114  ;;  %v4944_v19 = vld [vmem:[%s7172_s6 + $0x64] ss:$16 sps:$4 sm:$0xff]  }
 0x663   :  { %v6227_v55 = vadd.f32 %v2292_v51, %v2291_v40  ;;  %v4947_v51 = vld [vmem:[%s7172_s6 + $0x6c] ss:$16 sps:$4 sm:$0xff]   ;;  %v4945_v40 = vld [vmem:[%s7172_s6 + $0x68] ss:$16 sps:$4 sm:$0xff]  }
 0x665   :  { %5116 = vtanh.f32 %v6227_v55 }
 0x66f   :  { %v5117_v27 = vpop.eup %5116 }
 0x670   :  { %v6230_v60 = vmul.f32 %v5117_v27, %v5115_v56  ;;  %v4953_v56 = vld [vmem:[%s7172_s6 + $0x8c] ss:$16 sps:$4 sm:$0xff]   ;;  %v4948_v27 = vld [vmem:[%s7172_s6 + $0x80] ss:$16 sps:$4 sm:$0xff]  }
 0x672   :  { %v2301_v57 = vpack.c.bf16 %v6230_v60, %v6230_v60 }
 0x674   :  { %2527 = vmatmul.mubr.bf16.vlgmr.msra.gmra.mrb[40].mxu0 %v2301_v57  ;;  %2568 = vmatmul.mubr.bf16.vlgmr.msra.gmra.mrb[40].mxu1 %v2301_v57  ;;  %v4951_v57 = vld [vmem:[%s7172_s6 + $0x88] ss:$16 sps:$4 sm:$0xff]  }
 0x675   :  { %2844 = vmatpush1.bf16.msra.mxu1 %v5957_v16  ;;  %2834 = vmatprep.mubr.bf16.mxu0 %v7206_v43  ;;  %v4923_v16 = vld [vmem:[%s7167_s4 + $0x4] ss:$16 sps:$4 sm:$0xff]  }
 0x676   :  { %2845 = vmatprep.subr.bf16.mxu1 %v5969_v23  ;;  %2875 = vmatprep.mubr.bf16.mxu1 %v7206_v43  ;;  %v4921_v23 = vld [vmem:[%s7167_s4] ss:$16 sps:$4 sm:$0xff]  }
 0x677   :  { %2802 = vmatprep.subr.bf16.mxu0 %v4923_v16  ;;  %v4956_v16 = vld [vmem:[%s7172_s6 + $0xa4] ss:$16 sps:$4 sm:$0xff]  }
 0x678   :  { %2803 = vmatpush1.bf16.msra.mxu0 %v4921_v23  ;;  %v4959_v23 = vld [vmem:[%s7172_s6 + $0xac] ss:$16 sps:$4 sm:$0xff]  }
 0x679   :  { %2846 = vmatpush1.bf16.msra.mxu1 %v5979_v10  ;;  %2804 = vmatprep.subr.bf16.mxu0 %v5964_v63  ;;  %v4929_v63 = vld [vmem:[%s7172_s6 + $0xc] ss:$16 sps:$4 sm:$0xff]  }
 0x67a   :  { %2847 = vmatprep.subr.bf16.mxu1 %v5993_v17  ;;  %v7219_v17 = vld [vmem:[#allocation18_spill] sm:$0xff] }
 0x67c   :  { %2805 = vmatpush1.bf16.msra.mxu0 %v5974_v28  ;;  %v4926_v28 = vld [vmem:[%s7172_s6 + $0x4] ss:$16 sps:$4 sm:$0xff]  }
 0x67d   :  { %2848 = vmatpush1.bf16.msra.mxu1 %v6003_v18  ;;  %2806 = vmatprep.subr.bf16.mxu0 %v5988_v12  ;;  %v7220_v18 = vld [vmem:[#allocation19_spill] sm:$0xff] }
 0x67e   :  { %2849 = vmatprep.subr.bf16.mxu1 %v6017_v3 }
 0x680   :  { %2807 = vmatpush1.bf16.msra.mxu0 %v5998_v5 }
 0x681   :  { %2850 = vmatpush1.bf16.msra.mxu1 %v6027_v2  ;;  %2808 = vmatprep.subr.bf16.mxu0 %v6012_v20  ;;  %v7221_v2 = vld [vmem:[#allocation20_spill] sm:$0xff] }
 0x682   :  { %2851 = vmatprep.subr.bf16.mxu1 %v6041_v26  ;;  %v7222_v26 = vld [vmem:[#allocation21_spill] sm:$0xff] }
 0x684   :  { %2809 = vmatpush1.bf16.msra.mxu0 %v6022_v22 }
 0x685   :  { %2852 = vmatpush1.bf16.msra.mxu1 %v6051_v33  ;;  %2810 = vmatprep.subr.bf16.mxu0 %v6036_v21 }
 0x686   :  { %2853 = vmatprep.subr.bf16.mxu1 %v6075_v15 }
 0x688   :  { %2811 = vmatpush1.bf16.msra.mxu0 %v6046_v31 }
 0x689   :  { %2854 = vmatpush1.bf16.msra.mxu1 %v6070_v59  ;;  %2812 = vmatprep.subr.bf16.mxu0 %v6058_v24 }
 0x68a   :  { %2855 = vmatprep.subr.bf16.mxu1 %v6086_v25 }
 0x68c   :  { %2813 = vmatpush1.bf16.msra.mxu0 %v6065_v38 }
 0x68d   :  { %2856 = vmatpush1.bf16.msra.mxu1 %v6099_v32  ;;  %2814 = vmatprep.subr.bf16.mxu0 %v6081_v13 }
 0x68e   :  { %2857 = vmatprep.subr.bf16.mxu1 %v6111_v53 }
 0x690   :  { %2815 = vmatpush1.bf16.msra.mxu0 %v6094_v39 }
 0x691   :  { %2858 = vmatpush1.bf16.msra.mxu1 %v6123_v35  ;;  %2816 = vmatprep.subr.bf16.mxu0 %v6106_v29 }
 0x692   :  { %3212 = vmatprep.subr.bf16.mxu1 %v4929_v63  ;;  %v4954_v63 = vld [vmem:[%s7172_s6 + $0xa0] ss:$16 sps:$4 sm:$0xff]  }
 0x694   :  { %2817 = vmatpush1.bf16.msra.mxu0 %v6118_v6 }
 0x695   :  { %3139 = vmatprep.subr.bf16.mxu0 %v4926_v28  ;;  %v4957_v28 = vld [vmem:[%s7172_s6 + $0xa8] ss:$16 sps:$4 sm:$0xff]  }
 0x747   :  { %v2528_v10 = vpop.f32.mrb[40].mxu0  ;;  %v2569_v12 = vpop.f32.mrb[40].mxu1 }
 0x748   :  { %v2576_v5 = vadd.f32 %v2528_v10, %v7219_v17  ;;  %v2578_v20 = vadd.f32 %v2569_v12, %v7220_v18  ;;  %v2530_v3 = vpop.f32.mrb[41].mxu0  ;;  %v2571_v22 = vpop.f32.mrb[41].mxu1  ;;  %v4962_v10 = vld [vmem:[%s7172_s6 + $0xc4] ss:$16 sps:$4 sm:$0xff]   ;;  %v4965_v12 = vld [vmem:[%s7172_s6 + $0xcc] ss:$16 sps:$4 sm:$0xff]  }
 0x749   :  { %v2577_v21 = vadd.f32 %v2530_v3, %v7221_v2  ;;  %v2579_v31 = vadd.f32 %v2571_v22, %v7222_v26  ;;  %v2532_v33 = vpop.f32.mrb[42].mxu0  ;;  %v2573_v24 = vpop.f32.mrb[42].mxu1  ;;  %v4960_v17 = vld [vmem:[%s7172_s6 + $0xc0] ss:$16 sps:$4 sm:$0xff]   ;;  %v4968_v18 = vld [vmem:[%s7172_s6 + $0xe4] ss:$16 sps:$4 sm:$0xff]   ;;  %v2921_v2 = vpack.c.bf16 %v5886_v48, %v5841_v11  ;;  %v2923_v26 = vpack.c.bf16 %v6230_v60, %v6185_v52 }
 0x74a   :  { %v4695_v38 = vmul.f32 -1.442695, %v2576_v5  ;;  %v2533_v59 = vpop.f32.mrb[43].mxu0  ;;  %v2574_v15 = vpop.f32.mrb[43].mxu1  ;;  %v4963_v5 = vld [vmem:[%s7172_s6 + $0xc8] ss:$16 sps:$4 sm:$0xff]  }
 0x74b   :  { %v4696_v13 = vmul.f32 -1.442695, %v2577_v21  ;;  %v4697_v25 = vmul.f32 -1.442695, %v2579_v31  ;;  %v4966_v3 = vld [vmem:[%s7172_s6 + $0xe0] ss:$16 sps:$4 sm:$0xff]   ;;  %v2922_v21 = vpack.c.bf16 %v6139_v45, %v5942_v54 }
 0x74c   :  { %5118 = vpow2.f32 %v4695_v38  ;;  %v4969_v22 = vld [vmem:[%s7172_s6 + $0xe8] ss:$16 sps:$4 sm:$0xff]   ;;  %v6396_v11 = vld [vmem:[%s7173_s7 + $0x4] ss:$16 sps:$4 sm:$0xff]   ;;  %v6401_v48 = vld [vmem:[%s7173_s7] ss:$16 sps:$4 sm:$0xff]  }
 0x74d   :  { %5120 = vpow2.f32 %v4696_v13  ;;  %v6407_v54 = vld [vmem:[%s7173_s7 + $0xc] ss:$16 sps:$4 sm:$0xff]   ;;  %v6412_v45 = vld [vmem:[%s7173_s7 + $0x8] ss:$16 sps:$4 sm:$0xff]   ;;  %v6419_v52 = vld [vmem:[%s7173_s7 + $0x24] ss:$16 sps:$4 sm:$0xff]  }
 0x74e   :  { %5122 = vpow2.f32 %v4697_v25  ;;  %v6424_v60 = vld [vmem:[%s7173_s7 + $0x2c] ss:$16 sps:$4 sm:$0xff]   ;;  %v6430_v31 = vld [vmem:[%s7173_s7 + $0x20] ss:$16 sps:$4 sm:$0xff]   ;;  %v6435_v33 = vld [vmem:[%s7173_s7 + $0x28] ss:$16 sps:$4 sm:$0xff]  }
 0x74f   :  { %5124 = vtanh.f32 %v2578_v20  ;;  %v4971_v20 = vld [vmem:[%s7172_s6 + $0xec] ss:$16 sps:$4 sm:$0xff]   ;;  %v6443_v24 = vld [vmem:[%s7173_s7 + $0x44] ss:$16 sps:$4 sm:$0xff]   ;;  %v6454_v59 = vld [vmem:[%s7173_s7 + $0x40] ss:$16 sps:$4 sm:$0xff]  }
 0x750   :  { %v6448_v38 = vld [vmem:[%s7173_s7 + $0x4c] ss:$16 sps:$4 sm:$0xff]   ;;  %v6459_v15 = vld [vmem:[%s7173_s7 + $0x48] ss:$16 sps:$4 sm:$0xff]   ;;  %v6467_v13 = vld [vmem:[%s7173_s7 + $0x64] ss:$16 sps:$4 sm:$0xff]  }
 0x751   :  { %v6472_v25 = vld [vmem:[%s7173_s7 + $0x60] ss:$16 sps:$4 sm:$0xff]  }
 0x756   :  { %v5119_v39 = vpop.eup %5118 }
 0x757   :  { %v5121_v32 = vpop.eup %5120  ;;  %v2583_v29 = vadd.f32 1.0, %v5119_v39  ;;  %v6477_v39 = vld [vmem:[%s7173_s7 + $0x6c] ss:$16 sps:$4 sm:$0xff]  }
 0x758   :  { %v2589_v53 = vadd.f32 1.0, %v5121_v32  ;;  %v5123_v6 = vpop.eup %5122  ;;  %v6483_v32 = vld [vmem:[%s7173_s7 + $0x68] ss:$16 sps:$4 sm:$0xff]  }
 0x759   :  { %5126 = vrcp.f32 %v2583_v29  ;;  %v5125_v35 = vpop.eup %5124  ;;  %v2596_v62 = vadd.f32 1.0, %v5123_v6  ;;  %v6491_v29 = vld [vmem:[%s7173_s7 + $0x84] ss:$16 sps:$4 sm:$0xff]   ;;  %v6502_v6 = vld [vmem:[%s7173_s7 + $0x80] ss:$16 sps:$4 sm:$0xff]  }
 0x75a   :  { %5128 = vrcp.f32 %v2589_v53  ;;  %v6496_v53 = vld [vmem:[%s7173_s7 + $0x8c] ss:$16 sps:$4 sm:$0xff]  }
 0x75b   :  { %5130 = vrcp.f32 %v2596_v62  ;;  %v6531_v62 = vld [vmem:[%s7173_s7 + $0xa8] ss:$16 sps:$4 sm:$0xff]  }
 0x763   :  { %v5127_v47 = vpop.eup %5126 }
 0x764   :  { %v5129_v61 = vpop.eup %5128  ;;  %v2600_v34 = vmul.f32 %v5127_v47, %v5125_v35  ;;  %v6507_v35 = vld [vmem:[%s7173_s7 + $0x88] ss:$16 sps:$4 sm:$0xff]   ;;  %v6515_v47 = vld [vmem:[%s7173_s7 + $0xa4] ss:$16 sps:$4 sm:$0xff]  }
 0x765   :  { %v2599_v0 = vmul.f32 %v5129_v61, %v6227_v55  ;;  %v5131_v44 = vpop.eup %5130  ;;  %v4950_v55 = vld [vmem:[%s7172_s6 + $0x84] ss:$16 sps:$4 sm:$0xff]   ;;  %v6520_v61 = vld [vmem:[%s7173_s7 + $0xa0] ss:$16 sps:$4 sm:$0xff]  }
 0x767   :  { %v6282_v30 = vadd.f32 %v2600_v34, %v2599_v0  ;;  %v6525_v34 = vld [vmem:[%s7173_s7 + $0xac] ss:$16 sps:$4 sm:$0xff]   ;;  %v6539_v0 = vld [vmem:[%s7173_s7 + $0xc4] ss:$16 sps:$4 sm:$0xff]  }
 0x769   :  { %5132 = vtanh.f32 %v6282_v30 }
 0x773   :  { %v5133_v49 = vpop.eup %5132 }
 0x774   :  { %v6285_v58 = vmul.f32 %v5133_v49, %v5131_v44  ;;  %v6544_v44 = vld [vmem:[%s7173_s7 + $0xcc] ss:$16 sps:$4 sm:$0xff]   ;;  %v6550_v49 = vld [vmem:[%s7173_s7 + $0xc0] ss:$16 sps:$4 sm:$0xff]  }
 0x776   :  { %v2609_v37 = vpack.c.bf16 %v6285_v58, %v6285_v58 }
 0x778   :  { %2835 = vmatmul.mubr.bf16.vlgmr.msra.gmra.mrb[44].mxu0 %v2609_v37  ;;  %2876 = vmatmul.mubr.bf16.vlgmr.msra.gmra.mrb[44].mxu1 %v2609_v37  ;;  %v6568_v37 = vld [vmem:[%s7173_s7 + $0xe0] ss:$16 sps:$4 sm:$0xff]  }
 0x779   :  { %3140 = vmatpush1.bf16.msra.mxu0 %v4924_v36  ;;  %3213 = vmatpush1.bf16.msra.mxu1 %v4927_v8  ;;  %v6555_v36 = vld [vmem:[%s7173_s7 + $0xc8] ss:$16 sps:$4 sm:$0xff]   ;;  %v6563_v8 = vld [vmem:[%s7173_s7 + $0xe4] ss:$16 sps:$4 sm:$0xff]  }
 0x77a   :  { %3141 = vmatprep.subr.bf16.mxu0 %v4932_v4  ;;  %3214 = vmatprep.subr.bf16.mxu1 %v4935_v41  ;;  %v6573_v4 = vld [vmem:[%s7173_s7 + $0xec] ss:$16 sps:$4 sm:$0xff]   ;;  %v6579_v41 = vld [vmem:[%s7173_s7 + $0xe8] ss:$16 sps:$4 sm:$0xff]  }
 0x77b   :  { %3171 = vmatprep.mubr.bf16.mxu0 %v7206_v43  ;;  %3244 = vmatprep.mubr.bf16.mxu1 %v7206_v43 }
 0x77d   :  { %3142 = vmatpush1.bf16.msra.mxu0 %v4930_v42  ;;  %3215 = vmatpush1.bf16.msra.mxu1 %v4933_v9 }
 0x77e   :  { %3143 = vmatprep.subr.bf16.mxu0 %v4938_v1  ;;  %3216 = vmatprep.subr.bf16.mxu1 %v4941_v46  ;;  %v7223_v1 = vld [vmem:[#allocation22_spill] sm:$0xff] }
 0x781   :  { %3144 = vmatpush1.bf16.msra.mxu0 %v4936_v14  ;;  %3217 = vmatpush1.bf16.msra.mxu1 %v4939_v50  ;;  %v7224_v14 = vld [vmem:[#allocation23_spill] sm:$0xff] }
 0x782   :  { %3145 = vmatprep.subr.bf16.mxu0 %v4944_v19  ;;  %3218 = vmatprep.subr.bf16.mxu1 %v4947_v51 }
 0x785   :  { %3146 = vmatpush1.bf16.msra.mxu0 %v4942_v7  ;;  %3219 = vmatpush1.bf16.msra.mxu1 %v4945_v40  ;;  %v7225_v7 = vld [vmem:[#allocation24_spill] sm:$0xff] }
 0x786   :  { %3147 = vmatprep.subr.bf16.mxu0 %v4950_v55  ;;  %3220 = vmatprep.subr.bf16.mxu1 %v4953_v56  ;;  %v7226_v55 = vld [vmem:[#allocation25_spill] sm:$0xff] }
 0x789   :  { %3148 = vmatpush1.bf16.msra.mxu0 %v4948_v27  ;;  %3221 = vmatpush1.bf16.msra.mxu1 %v4951_v57 }
 0x78a   :  { %3149 = vmatprep.subr.bf16.mxu0 %v4956_v16  ;;  %3222 = vmatprep.subr.bf16.mxu1 %v4959_v23 }
 0x78d   :  { %3150 = vmatpush1.bf16.msra.mxu0 %v4954_v63  ;;  %3223 = vmatpush1.bf16.msra.mxu1 %v4957_v28 }
 0x78e   :  { %3151 = vmatprep.subr.bf16.mxu0 %v4962_v10  ;;  %3224 = vmatprep.subr.bf16.mxu1 %v4965_v12 }
 0x791   :  { %3152 = vmatpush1.bf16.msra.mxu0 %v4960_v17  ;;  %3225 = vmatpush1.bf16.msra.mxu1 %v4963_v5 }
 0x792   :  { %3153 = vmatprep.subr.bf16.mxu0 %v4968_v18  ;;  %3226 = vmatprep.subr.bf16.mxu1 %v4971_v20 }
 0x795   :  { %3154 = vmatpush1.bf16.msra.mxu0 %v4966_v3  ;;  %3227 = vmatpush1.bf16.msra.mxu1 %v4969_v22 }
 0x796   :  { %3513 = vmatprep.subr.bf16.mxu0 %v6396_v11  ;;  %3554 = vmatprep.subr.bf16.mxu1 %v6407_v54 }
 0x798   :  { %3172 = vmatmul.mubr.bf16.vlgmr.msra.gmra.mrb[48].mxu0 %v2921_v2  ;;  %3245 = vmatmul.mubr.bf16.vlgmr.msra.gmra.mrb[48].mxu1 %v2921_v2 }
 0x799   :  { %3181 = vmatprep.mubr.bf16.mxu0 %v7206_v43  ;;  %3254 = vmatprep.mubr.bf16.mxu1 %v7206_v43 }
 0x79a   :  { %3514 = vmatpush1.bf16.msra.mxu0 %v6401_v48  ;;  %3555 = vmatpush1.bf16.msra.mxu1 %v6412_v45 }
 0x79b   :  { %3515 = vmatprep.subr.bf16.mxu0 %v6419_v52  ;;  %3556 = vmatprep.subr.bf16.mxu1 %v6424_v60 }
 0x79e   :  { %3516 = vmatpush1.bf16.msra.mxu0 %v6430_v31  ;;  %3557 = vmatpush1.bf16.msra.mxu1 %v6435_v33 }
 0x79f   :  { %3517 = vmatprep.subr.bf16.mxu0 %v6443_v24  ;;  %3558 = vmatprep.subr.bf16.mxu1 %v6448_v38 }
 0x7a0   :  { %3182 = vmatmul.mubr.bf16.gmra.mrb[52].mxu0 %v2922_v21  ;;  %3255 = vmatmul.mubr.bf16.gmra.mrb[52].mxu1 %v2922_v21 }
 0x7a1   :  { %3191 = vmatprep.mubr.bf16.mxu0 %v7206_v43  ;;  %3264 = vmatprep.mubr.bf16.mxu1 %v7206_v43 }
 0x7a2   :  { %3518 = vmatpush1.bf16.msra.mxu0 %v6454_v59  ;;  %3559 = vmatpush1.bf16.msra.mxu1 %v6459_v15 }
 0x7a3   :  { %3519 = vmatprep.subr.bf16.mxu0 %v6467_v13  ;;  %3560 = vmatprep.subr.bf16.mxu1 %v6477_v39 }
 0x7a6   :  { %3520 = vmatpush1.bf16.msra.mxu0 %v6472_v25  ;;  %3561 = vmatpush1.bf16.msra.mxu1 %v6483_v32 }
 0x7a7   :  { %3521 = vmatprep.subr.bf16.mxu0 %v6491_v29  ;;  %3562 = vmatprep.subr.bf16.mxu1 %v6496_v53 }
 0x7a8   :  { %3192 = vmatmul.mubr.bf16.gmra.mrb[56].mxu0 %v2923_v26  ;;  %3265 = vmatmul.mubr.bf16.gmra.mrb[56].mxu1 %v2923_v26 }
 0x7a9   :  { %3201 = vmatprep.mubr.bf16.mxu0 %v7206_v43  ;;  %3274 = vmatprep.mubr.bf16.mxu1 %v7206_v43 }
 0x7aa   :  { %3522 = vmatpush1.bf16.msra.mxu0 %v6502_v6  ;;  %3563 = vmatpush1.bf16.msra.mxu1 %v6507_v35 }
 0x7ab   :  { %3523 = vmatprep.subr.bf16.mxu0 %v6515_v47  ;;  %3564 = vmatprep.subr.bf16.mxu1 %v6525_v34 }
 0x7ae   :  { %3524 = vmatpush1.bf16.msra.mxu0 %v6520_v61  ;;  %3565 = vmatpush1.bf16.msra.mxu1 %v6531_v62 }
 0x7af   :  { %3525 = vmatprep.subr.bf16.mxu0 %v6539_v0  ;;  %3566 = vmatprep.subr.bf16.mxu1 %v6544_v44 }
 0x7b2   :  { %3526 = vmatpush1.bf16.msra.mxu0 %v6550_v49  ;;  %3567 = vmatpush1.bf16.msra.mxu1 %v6555_v36 }
 0x7b3   :  { %3527 = vmatprep.subr.bf16.mxu0 %v6563_v8  ;;  %3568 = vmatprep.subr.bf16.mxu1 %v6573_v4 }
 0x7b6   :  { %3528 = vmatpush1.bf16.msra.mxu0 %v6568_v37  ;;  %3569 = vmatpush1.bf16.msra.mxu1 %v6579_v41 }
 0x7b7   :  { %3628 = vmatprep.subr.bf16.mxu0 %v6396_v11  ;;  %3669 = vmatprep.subr.bf16.mxu1 %v6407_v54 }
 0x84b   :  { %v2836_v42 = vpop.f32.mrb[44].mxu0  ;;  %v2877_v9 = vpop.f32.mrb[44].mxu1 }
 0x84c   :  { %v2884_v46 = vadd.f32 %v2836_v42, %v7223_v1  ;;  %v2886_v50 = vadd.f32 %v2877_v9, %v7224_v14  ;;  %v2838_v19 = vpop.f32.mrb[45].mxu0  ;;  %v2879_v51 = vpop.f32.mrb[45].mxu1 }
 0x84d   :  { %v2885_v40 = vadd.f32 %v2838_v19, %v7225_v7  ;;  %v2887_v56 = vadd.f32 %v2879_v51, %v7226_v55  ;;  %v2840_v27 = vpop.f32.mrb[46].mxu0  ;;  %v2881_v57 = vpop.f32.mrb[46].mxu1 }
 0x84e   :  { %v4730_v16 = vmul.f32 -1.442695, %v2884_v46  ;;  %v2841_v23 = vpop.f32.mrb[47].mxu0  ;;  %v2882_v63 = vpop.f32.mrb[47].mxu1 }
 0x84f   :  { %v4731_v28 = vmul.f32 -1.442695, %v2885_v40  ;;  %v4732_v10 = vmul.f32 -1.442695, %v2887_v56 }
 0x850   :  { %5134 = vpow2.f32 %v4730_v16 }
 0x851   :  { %5136 = vpow2.f32 %v4731_v28 }
 0x852   :  { %5138 = vpow2.f32 %v4732_v10 }
 0x853   :  { %5140 = vtanh.f32 %v2886_v50 }
 0x85a   :  { %v5135_v12 = vpop.eup %5134 }
 0x85b   :  { %v5137_v17 = vpop.eup %5136  ;;  %v2891_v5 = vadd.f32 1.0, %v5135_v12 }
 0x85c   :  { %v2897_v18 = vadd.f32 1.0, %v5137_v17  ;;  %v5139_v20 = vpop.eup %5138 }
 0x85d   :  { %5142 = vrcp.f32 %v2891_v5  ;;  %v5141_v3 = vpop.eup %5140  ;;  %v2904_v26 = vadd.f32 1.0, %v5139_v20 }
 0x85e   :  { %5144 = vrcp.f32 %v2897_v18 }
 0x85f   :  { %5146 = vrcp.f32 %v2904_v26  ;;  %v2957_v26 = vld [vmem:[%s7174_s8] sm:$0xf] }
 0x867   :  { %v5143_v22 = vpop.eup %5142 }
 0x868   :  { %v5145_v2 = vpop.eup %5144  ;;  %v2908_v21 = vmul.f32 %v5143_v22, %v5141_v3 }
 0x869   :  { %v2907_v42 = vmul.f32 %v5145_v2, %v6282_v30  ;;  %v5147_v23 = vpop.eup %5146 }
 0x86b   :  { %v6592_v9 = vpop.f32.mrb[48].mxu0  ;;  %v6594_v1 = vpop.f32.mrb[48].mxu1  ;;  %v2909_v46 = vadd.f32 %v2908_v21, %v2907_v42 }
 0x86c   :  { %v6596_v14 = vpop.f32.mrb[49].mxu0  ;;  %v6598_v50 = vpop.f32.mrb[49].mxu1 }
 0x86d   :  { %v6600_v19 = vpop.f32.mrb[50].mxu0  ;;  %v6602_v51 = vpop.f32.mrb[50].mxu1  ;;  %5148 = vtanh.f32 %v2909_v46 }
 0x86e   :  { %v6604_v7 = vpop.f32.mrb[51].mxu0  ;;  %v6606_v40 = vpop.f32.mrb[51].mxu1 }
 0x873   :  { %v6608_v30 = vpop.f32.mrb[52].mxu0  ;;  %v6610_v55 = vpop.f32.mrb[52].mxu1 }
 0x874   :  { %7227 = vst [vmem:[#allocation6_spill] sm:$0xff] %v6610_v55  ;;  %v6612_v56 = vpop.f32.mrb[53].mxu0  ;;  %v6614_v27 = vpop.f32.mrb[53].mxu1 }
 0x875   :  { %7228 = vst [vmem:[#allocation7_spill] sm:$0xff] %v6612_v56  ;;  %7229 = vst [vmem:[#allocation8_spill] sm:$0xff] %v6614_v27  ;;  %v6616_v57 = vpop.f32.mrb[54].mxu0  ;;  %v6618_v16 = vpop.f32.mrb[54].mxu1 }
 0x876   :  { %7230 = vst [vmem:[#allocation9_spill] sm:$0xff] %v6616_v57  ;;  %7231 = vst [vmem:[#allocation10_spill] sm:$0xff] %v6618_v16  ;;  %v6620_v63 = vpop.f32.mrb[55].mxu0  ;;  %v6622_v28 = vpop.f32.mrb[55].mxu1 }
 0x877   :  { %7232 = vst [vmem:[#allocation11_spill] sm:$0xff] %v6620_v63  ;;  %7233 = vst [vmem:[#allocation12_spill] sm:$0xff] %v6622_v28  ;;  %v5149_v10 = vpop.eup %5148 }
 0x878   :  { %v2911_v12 = vmul.f32 %v5149_v10, %v5147_v23 }
 0x87a   :  { %v2924_v17 = vpack.c.bf16 %v2911_v12, %v6285_v58 }
 0x87b   :  { %v6625_v5 = vpop.f32.mrb[56].mxu0  ;;  %v6627_v18 = vpop.f32.mrb[56].mxu1 }
 0x87c   :  { %7234 = vst [vmem:[#allocation13_spill] sm:$0xff] %v6625_v5  ;;  %7235 = vst [vmem:[#allocation14_spill] sm:$0xff] %v6627_v18  ;;  %v6629_v20 = vpop.f32.mrb[57].mxu0  ;;  %v6631_v3 = vpop.f32.mrb[57].mxu1  ;;  %3202 = vmatmul.mubr.bf16.gmra.mrb[60].mxu0 %v2924_v17  ;;  %3275 = vmatmul.mubr.bf16.gmra.mrb[60].mxu1 %v2924_v17 }
 0x87d   :  { %7236 = vst [vmem:[#allocation15_spill] sm:$0xff] %v6629_v20  ;;  %7237 = vst [vmem:[#allocation16_spill] sm:$0xff] %v6631_v3  ;;  %v6633_v22 = vpop.f32.mrb[58].mxu0  ;;  %v6635_v2 = vpop.f32.mrb[58].mxu1  ;;  %3545 = vmatprep.mubr.bf16.mxu0 %v7206_v43  ;;  %3586 = vmatprep.mubr.bf16.mxu1 %v7206_v43 }
 0x87e   :  { %7238 = vst [vmem:[#allocation17_spill] sm:$0xff] %v6633_v22  ;;  %7239 = vst [vmem:[#allocation18_spill] sm:$0xff] %v6635_v2  ;;  %v6639_v21 = vpop.f32.mrb[59].mxu0  ;;  %v6641_v58 = vpop.f32.mrb[59].mxu1  ;;  %v7249_v2 = vld [vmem:[#allocation4_spill] sm:$0xff] }
 0x87f   :  { %7240 = vst [vmem:[#allocation19_spill] sm:$0xff] %v6639_v21  ;;  %7241 = vst [vmem:[#allocation20_spill] sm:$0xff] %v6641_v58  ;;  %v7248_v58 = vld [vmem:[#allocation5_spill] sm:$0xff]  ;;  %v7250_v22 = vsub.s32 2, %v7249_v2 }
 0x880   :  { %v6695_v21 = vrot.slane %v2957_v26, %v7248_v58 }
 0x881   :  { %v6699_v3 = vrot.slane %v2957_v26, %v7250_v22 }
 0x882   :  { %v3174_v58 = vadd.f32 %v6592_v9, %v6695_v21 }
 0x884   :  { %3546 = vmatmul.mubr.bf16.vlgmr.msra.gmra.mrb[64].mxu0 %v7206_v43  ;;  %3587 = vmatmul.mubr.bf16.vlgmr.msra.gmra.mrb[64].mxu1 %v7206_v43 }
 0x885   :  { %3629 = vmatpush1.bf16.msra.mxu0 %v6401_v48  ;;  %3670 = vmatpush1.bf16.msra.mxu1 %v6412_v45 }
 0x886   :  { %3630 = vmatprep.subr.bf16.mxu0 %v6419_v52  ;;  %3671 = vmatprep.subr.bf16.mxu1 %v6424_v60 }
 0x887   :  { %3660 = vmatprep.mubr.bf16.mxu0 %v7206_v43  ;;  %3701 = vmatprep.mubr.bf16.mxu1 %v7206_v43 }
 0x889   :  { %3631 = vmatpush1.bf16.msra.mxu0 %v6430_v31  ;;  %3672 = vmatpush1.bf16.msra.mxu1 %v6435_v33 }
 0x88a   :  { %3632 = vmatprep.subr.bf16.mxu0 %v6443_v24  ;;  %3673 = vmatprep.subr.bf16.mxu1 %v6448_v38 }
 0x88d   :  { %3633 = vmatpush1.bf16.msra.mxu0 %v6454_v59  ;;  %3674 = vmatpush1.bf16.msra.mxu1 %v6459_v15 }
 0x88e   :  { %3634 = vmatprep.subr.bf16.mxu0 %v6467_v13  ;;  %3675 = vmatprep.subr.bf16.mxu1 %v6477_v39 }
 0x891   :  { %3635 = vmatpush1.bf16.msra.mxu0 %v6472_v25  ;;  %3676 = vmatpush1.bf16.msra.mxu1 %v6483_v32 }
 0x892   :  { %3636 = vmatprep.subr.bf16.mxu0 %v6491_v29  ;;  %3677 = vmatprep.subr.bf16.mxu1 %v6496_v53 }
 0x895   :  { %3637 = vmatpush1.bf16.msra.mxu0 %v6502_v6  ;;  %3678 = vmatpush1.bf16.msra.mxu1 %v6507_v35 }
 0x896   :  { %3638 = vmatprep.subr.bf16.mxu0 %v6515_v47  ;;  %3679 = vmatprep.subr.bf16.mxu1 %v6525_v34 }
 0x899   :  { %3639 = vmatpush1.bf16.msra.mxu0 %v6520_v61  ;;  %3680 = vmatpush1.bf16.msra.mxu1 %v6531_v62 }
 0x89a   :  { %3640 = vmatprep.subr.bf16.mxu0 %v6539_v0  ;;  %3681 = vmatprep.subr.bf16.mxu1 %v6544_v44 }
 0x89d   :  { %3641 = vmatpush1.bf16.msra.mxu0 %v6550_v49  ;;  %3682 = vmatpush1.bf16.msra.mxu1 %v6555_v36 }
 0x89e   :  { %3642 = vmatprep.subr.bf16.mxu0 %v6563_v8  ;;  %3683 = vmatprep.subr.bf16.mxu1 %v6573_v4 }
 0x8a1   :  { %3643 = vmatpush1.bf16.msra.mxu0 %v6568_v37  ;;  %3684 = vmatpush1.bf16.msra.mxu1 %v6579_v41 }
 0x8a2   :  { %3743 = vmatprep.subr.bf16.mxu0 %v6396_v11  ;;  %3784 = vmatprep.subr.bf16.mxu1 %v6407_v54 }
 0x94f   :  { %v6682_v42 = vpop.f32.mrb[60].mxu0  ;;  %v6684_v46 = vpop.f32.mrb[60].mxu1 }
 0x950   :  { %7242 = vst [vmem:[#allocation21_spill] sm:$0xff] %v6682_v42  ;;  %7243 = vst [vmem:[#allocation22_spill] sm:$0xff] %v6684_v46  ;;  %v6686_v23 = vpop.f32.mrb[61].mxu0  ;;  %v6688_v10 = vpop.f32.mrb[61].mxu1  ;;  %v7253_v46 = vsub.s32 1, %v7249_v2 }
 0x951   :  { %7244 = vst [vmem:[#allocation23_spill] sm:$0xff] %v6686_v23  ;;  %7245 = vst [vmem:[#allocation24_spill] sm:$0xff] %v6688_v10  ;;  %v6690_v12 = vpop.f32.mrb[62].mxu0  ;;  %v6692_v17 = vpop.f32.mrb[62].mxu1  ;;  %v7254_v10 = vsub.s32 3, %v7249_v2 }
 0x952   :  { %7246 = vst [vmem:[#allocation25_spill] sm:$0xff] %v6690_v12  ;;  %7247 = vst [vmem:[#allocation26_spill] sm:$0xff] %v6692_v17  ;;  %v6701_v20 = vpop.f32.mrb[63].mxu0  ;;  %v6703_v42 = vpop.f32.mrb[63].mxu1  ;;  %v6707_v23 = vrot.slane %v2957_v26, %v7253_v46  ;;  %v3247_v17 = vadd.f32 %v6594_v1, %v6699_v3 }
 0x953   :  { %7251 = vst [vmem:[#allocation5_spill] sm:$0xff] %v6701_v20  ;;  %7252 = vst [vmem:[#allocation4_spill] sm:$0xff] %v6703_v42  ;;  %v6711_v12 = vrot.slane %v2957_v26, %v7254_v10 }
 0x954   :  { %v3176_v22 = vadd.f32 %v6596_v14, %v6707_v23 }
 0x955   :  { %v3249_v42 = vadd.f32 %v6598_v50, %v6711_v12 }
 0x957   :  { %v3547_v20 = vpop.f32.mrb[64].mxu0  ;;  %v3588_v18 = vpop.f32.mrb[64].mxu1 }
 0x958   :  { %v3595_v46 = vadd.f32 %v3547_v20, %v3174_v58  ;;  %v3597_v5 = vadd.f32 %v3588_v18, %v3247_v17  ;;  %v3549_v28 = vpop.f32.mrb[65].mxu0  ;;  %v3590_v2 = vpop.f32.mrb[65].mxu1 }
 0x959   :  { %v3596_v26 = vadd.f32 %v3549_v28, %v3176_v22  ;;  %v3598_v10 = vadd.f32 %v3590_v2, %v3249_v42  ;;  %v3551_v63 = vpop.f32.mrb[66].mxu0  ;;  %v3592_v16 = vpop.f32.mrb[66].mxu1  ;;  %v3180_v2 = vadd.f32 %v6604_v7, %v6707_v23 }
 0x95a   :  { %v4797_v9 = vmul.f32 -1.442695, %v3595_v46  ;;  %v3552_v57 = vpop.f32.mrb[67].mxu0  ;;  %v3593_v27 = vpop.f32.mrb[67].mxu1 }
 0x95b   :  { %v4798_v1 = vmul.f32 -1.442695, %v3596_v26  ;;  %v4799_v14 = vmul.f32 -1.442695, %v3598_v10  ;;  %v3253_v26 = vadd.f32 %v6606_v40, %v6711_v12 }
 0x95c   :  { %5150 = vpow2.f32 %v4797_v9 }
 0x95d   :  { %5152 = vpow2.f32 %v4798_v1 }
 0x95e   :  { %5154 = vpow2.f32 %v4799_v14 }
 0x95f   :  { %5156 = vtanh.f32 %v3597_v5  ;;  %v3251_v5 = vadd.f32 %v6602_v51, %v6699_v3 }
 0x966   :  { %v5151_v56 = vpop.eup %5150 }
 0x967   :  { %v5153_v55 = vpop.eup %5152  ;;  %v3602_v50 = vadd.f32 1.0, %v5151_v56 }
 0x968   :  { %v3608_v20 = vadd.f32 1.0, %v5153_v55  ;;  %v5155_v18 = vpop.eup %5154  ;;  %v3178_v55 = vadd.f32 %v6600_v19, %v6695_v21 }
 0x969   :  { %5158 = vrcp.f32 %v3602_v50  ;;  %v5157_v28 = vpop.eup %5156  ;;  %v3615_v17 = vadd.f32 1.0, %v5155_v18 }
 0x96a   :  { %5160 = vrcp.f32 %v3608_v20 }
 0x96b   :  { %5162 = vrcp.f32 %v3615_v17 }
 0x973   :  { %v5159_v42 = vpop.eup %5158 }
 0x974   :  { %v5161_v63 = vpop.eup %5160  ;;  %v3619_v16 = vmul.f32 %v5159_v42, %v5157_v28 }
 0x975   :  { %v3618_v57 = vmul.f32 0.0, %v5161_v63  ;;  %v5163_v58 = vpop.eup %5162 }
 0x977   :  { %v6721_v27 = vadd.f32 %v3619_v16, %v3618_v57 }
 0x979   :  { %5164 = vtanh.f32 %v6721_v27 }
 0x983   :  { %v5165_v22 = vpop.eup %5164 }
 0x984   :  { %v3622_v56 = vmul.f32 %v5165_v22, %v5163_v58 }
 0x986   :  { %v3627_v46 = vpack.c.bf16 %v3622_v56, %v3622_v56 }
 0x988   :  { %3661 = vmatmul.mubr.bf16.vlgmr.msra.gmra.mrb[68].mxu0 %v3627_v46  ;;  %3702 = vmatmul.mubr.bf16.vlgmr.msra.gmra.mrb[68].mxu1 %v3627_v46 }
 0x989   :  { %3744 = vmatpush1.bf16.msra.mxu0 %v6401_v48  ;;  %3785 = vmatpush1.bf16.msra.mxu1 %v6412_v45 }
 0x98a   :  { %3745 = vmatprep.subr.bf16.mxu0 %v6419_v52  ;;  %3786 = vmatprep.subr.bf16.mxu1 %v6424_v60 }
 0x98b   :  { %3775 = vmatprep.mubr.bf16.mxu0 %v7206_v43  ;;  %3816 = vmatprep.mubr.bf16.mxu1 %v7206_v43 }
 0x98d   :  { %3746 = vmatpush1.bf16.msra.mxu0 %v6430_v31  ;;  %3787 = vmatpush1.bf16.msra.mxu1 %v6435_v33 }
 0x98e   :  { %3747 = vmatprep.subr.bf16.mxu0 %v6443_v24  ;;  %3788 = vmatprep.subr.bf16.mxu1 %v6448_v38 }
 0x991   :  { %3748 = vmatpush1.bf16.msra.mxu0 %v6454_v59  ;;  %3789 = vmatpush1.bf16.msra.mxu1 %v6459_v15 }
 0x992   :  { %3749 = vmatprep.subr.bf16.mxu0 %v6467_v13  ;;  %3790 = vmatprep.subr.bf16.mxu1 %v6477_v39 }
 0x995   :  { %3750 = vmatpush1.bf16.msra.mxu0 %v6472_v25  ;;  %3791 = vmatpush1.bf16.msra.mxu1 %v6483_v32 }
 0x996   :  { %3751 = vmatprep.subr.bf16.mxu0 %v6491_v29  ;;  %3792 = vmatprep.subr.bf16.mxu1 %v6496_v53 }
 0x999   :  { %3752 = vmatpush1.bf16.msra.mxu0 %v6502_v6  ;;  %3793 = vmatpush1.bf16.msra.mxu1 %v6507_v35 }
 0x99a   :  { %3753 = vmatprep.subr.bf16.mxu0 %v6515_v47  ;;  %3794 = vmatprep.subr.bf16.mxu1 %v6525_v34 }
 0x99d   :  { %3754 = vmatpush1.bf16.msra.mxu0 %v6520_v61  ;;  %3795 = vmatpush1.bf16.msra.mxu1 %v6531_v62 }
 0x99e   :  { %3755 = vmatprep.subr.bf16.mxu0 %v6539_v0  ;;  %3796 = vmatprep.subr.bf16.mxu1 %v6544_v44 }
 0x9a1   :  { %3756 = vmatpush1.bf16.msra.mxu0 %v6550_v49  ;;  %3797 = vmatpush1.bf16.msra.mxu1 %v6555_v36 }
 0x9a2   :  { %3757 = vmatprep.subr.bf16.mxu0 %v6563_v8  ;;  %3798 = vmatprep.subr.bf16.mxu1 %v6573_v4 }
 0x9a5   :  { %3758 = vmatpush1.bf16.msra.mxu0 %v6568_v37  ;;  %3799 = vmatpush1.bf16.msra.mxu1 %v6579_v41 }
 0x9a6   :  { %3858 = vmatprep.subr.bf16.mxu0 %v6396_v11  ;;  %3899 = vmatprep.subr.bf16.mxu1 %v6407_v54 }
 0xa5b   :  { %v3662_v10 = vpop.f32.mrb[68].mxu0  ;;  %v3703_v9 = vpop.f32.mrb[68].mxu1 }
 0xa5c   :  { %v3710_v1 = vadd.f32 %v3662_v10, %v3178_v55  ;;  %v3712_v14 = vadd.f32 %v3703_v9, %v3251_v5  ;;  %v3664_v50 = vpop.f32.mrb[69].mxu0  ;;  %v3705_v20 = vpop.f32.mrb[69].mxu1 }
 0xa5d   :  { %v3711_v18 = vadd.f32 %v3664_v50, %v3180_v2  ;;  %v3713_v28 = vadd.f32 %v3705_v20, %v3253_v26  ;;  %v3666_v42 = vpop.f32.mrb[70].mxu0  ;;  %v3707_v63 = vpop.f32.mrb[70].mxu1 }
 0xa5e   :  { %v4800_v19 = vmul.f32 -1.442695, %v3710_v1  ;;  %v3667_v16 = vpop.f32.mrb[71].mxu0  ;;  %v3708_v17 = vpop.f32.mrb[71].mxu1  ;;  %v7256_v42 = vld [vmem:[#allocation7_spill] sm:$0xff] }
 0xa5f   :  { %v4801_v51 = vmul.f32 -1.442695, %v3711_v18  ;;  %v4802_v7 = vmul.f32 -1.442695, %v3713_v28  ;;  %v7255_v18 = vld [vmem:[#allocation6_spill] sm:$0xff]  ;;  %v3186_v63 = vadd.f32 %v7256_v42, %v6707_v23 }
 0xa60   :  { %5166 = vpow2.f32 %v4800_v19  ;;  %v3257_v28 = vadd.f32 %v7255_v18, %v6699_v3  ;;  %v7257_v19 = vld [vmem:[#allocation8_spill] sm:$0xff] }
 0xa61   :  { %5168 = vpow2.f32 %v4801_v51  ;;  %v3259_v16 = vadd.f32 %v7257_v19, %v6711_v12 }
 0xa62   :  { %5170 = vpow2.f32 %v4802_v7 }
 0xa63   :  { %5172 = vtanh.f32 %v3712_v14 }
 0xa6a   :  { %v5167_v57 = vpop.eup %5166 }
 0xa6b   :  { %v5169_v58 = vpop.eup %5168  ;;  %v3717_v40 = vadd.f32 1.0, %v5167_v57 }
 0xa6c   :  { %v3723_v22 = vadd.f32 1.0, %v5169_v58  ;;  %v5171_v56 = vpop.eup %5170 }
 0xa6d   :  { %5174 = vrcp.f32 %v3717_v40  ;;  %v5173_v46 = vpop.eup %5172  ;;  %v3730_v26 = vadd.f32 1.0, %v5171_v56 }
 0xa6e   :  { %5176 = vrcp.f32 %v3723_v22 }
 0xa6f   :  { %5178 = vrcp.f32 %v3730_v26 }
 0xa77   :  { %v5175_v55 = vpop.eup %5174 }
 0xa78   :  { %v5177_v5 = vpop.eup %5176  ;;  %v3734_v2 = vmul.f32 %v5175_v55, %v5173_v46 }
 0xa79   :  { %v3733_v10 = vmul.f32 %v5177_v5, %v6721_v27  ;;  %v5179_v1 = vpop.eup %5178  ;;  %v3184_v27 = vadd.f32 %v6608_v30, %v6695_v21 }
 0xa7b   :  { %v6767_v9 = vadd.f32 %v3734_v2, %v3733_v10 }
 0xa7d   :  { %5180 = vtanh.f32 %v6767_v9 }
 0xa87   :  { %v5181_v50 = vpop.eup %5180 }
 0xa88   :  { %v3737_v20 = vmul.f32 %v5181_v50, %v5179_v1 }
 0xa8a   :  { %v3742_v14 = vpack.c.bf16 %v3737_v20, %v3737_v20 }
 0xa8c   :  { %3776 = vmatmul.mubr.bf16.vlgmr.msra.gmra.mrb[72].mxu0 %v3742_v14  ;;  %3817 = vmatmul.mubr.bf16.vlgmr.msra.gmra.mrb[72].mxu1 %v3742_v14 }
 0xa8d   :  { %3859 = vmatpush1.bf16.msra.mxu0 %v6401_v48  ;;  %3900 = vmatpush1.bf16.msra.mxu1 %v6412_v45 }
 0xa8e   :  { %3860 = vmatprep.subr.bf16.mxu0 %v6419_v52  ;;  %3901 = vmatprep.subr.bf16.mxu1 %v6424_v60 }
 0xa8f   :  { %3890 = vmatprep.mubr.bf16.mxu0 %v7206_v43  ;;  %3931 = vmatprep.mubr.bf16.mxu1 %v7206_v43 }
 0xa91   :  { %3861 = vmatpush1.bf16.msra.mxu0 %v6430_v31  ;;  %3902 = vmatpush1.bf16.msra.mxu1 %v6435_v33 }
 0xa92   :  { %3862 = vmatprep.subr.bf16.mxu0 %v6443_v24  ;;  %3903 = vmatprep.subr.bf16.mxu1 %v6448_v38 }
 0xa95   :  { %3863 = vmatpush1.bf16.msra.mxu0 %v6454_v59  ;;  %3904 = vmatpush1.bf16.msra.mxu1 %v6459_v15 }
 0xa96   :  { %3864 = vmatprep.subr.bf16.mxu0 %v6467_v13  ;;  %3905 = vmatprep.subr.bf16.mxu1 %v6477_v39 }
 0xa99   :  { %3865 = vmatpush1.bf16.msra.mxu0 %v6472_v25  ;;  %3906 = vmatpush1.bf16.msra.mxu1 %v6483_v32 }
 0xa9a   :  { %3866 = vmatprep.subr.bf16.mxu0 %v6491_v29  ;;  %3907 = vmatprep.subr.bf16.mxu1 %v6496_v53 }
 0xa9d   :  { %3867 = vmatpush1.bf16.msra.mxu0 %v6502_v6  ;;  %3908 = vmatpush1.bf16.msra.mxu1 %v6507_v35 }
 0xa9e   :  { %3868 = vmatprep.subr.bf16.mxu0 %v6515_v47  ;;  %3909 = vmatprep.subr.bf16.mxu1 %v6525_v34 }
 0xaa1   :  { %3869 = vmatpush1.bf16.msra.mxu0 %v6520_v61  ;;  %3910 = vmatpush1.bf16.msra.mxu1 %v6531_v62 }
 0xaa2   :  { %3870 = vmatprep.subr.bf16.mxu0 %v6539_v0  ;;  %3911 = vmatprep.subr.bf16.mxu1 %v6544_v44 }
 0xaa5   :  { %3871 = vmatpush1.bf16.msra.mxu0 %v6550_v49  ;;  %3912 = vmatpush1.bf16.msra.mxu1 %v6555_v36 }
 0xaa6   :  { %3872 = vmatprep.subr.bf16.mxu0 %v6563_v8  ;;  %3913 = vmatprep.subr.bf16.mxu1 %v6573_v4 }
 0xaa9   :  { %3873 = vmatpush1.bf16.msra.mxu0 %v6568_v37  ;;  %3914 = vmatpush1.bf16.msra.mxu1 %v6579_v41 }
 0xaaa   :  { %3973 = vmatprep.subr.bf16.mxu0 %v6396_v11  ;;  %4014 = vmatprep.subr.bf16.mxu1 %v6407_v54 }
 0xb5f   :  { %v3777_v17 = vpop.f32.mrb[72].mxu0  ;;  %v3818_v51 = vpop.f32.mrb[72].mxu1 }
 0xb60   :  { %v3825_v7 = vadd.f32 %v3777_v17, %v3184_v27  ;;  %v3827_v57 = vadd.f32 %v3818_v51, %v3257_v28  ;;  %v3779_v58 = vpop.f32.mrb[73].mxu0  ;;  %v3820_v40 = vpop.f32.mrb[73].mxu1 }
 0xb61   :  { %v3826_v22 = vadd.f32 %v3779_v58, %v3186_v63  ;;  %v3828_v56 = vadd.f32 %v3820_v40, %v3259_v16  ;;  %v3781_v46 = vpop.f32.mrb[74].mxu0  ;;  %v3822_v55 = vpop.f32.mrb[74].mxu1 }
 0xb62   :  { %v4803_v30 = vmul.f32 -1.442695, %v3825_v7  ;;  %v3782_v5 = vpop.f32.mrb[75].mxu0  ;;  %v3823_v2 = vpop.f32.mrb[75].mxu1  ;;  %v7260_v46 = vld [vmem:[#allocation11_spill] sm:$0xff] }
 0xb63   :  { %v4804_v26 = vmul.f32 -1.442695, %v3826_v22  ;;  %v4805_v10 = vmul.f32 -1.442695, %v3828_v56  ;;  %v7259_v22 = vld [vmem:[#allocation10_spill] sm:$0xff]  ;;  %v3190_v55 = vadd.f32 %v7260_v46, %v6707_v23 }
 0xb64   :  { %5182 = vpow2.f32 %v4803_v30  ;;  %v3261_v56 = vadd.f32 %v7259_v22, %v6699_v3  ;;  %v7261_v30 = vld [vmem:[#allocation12_spill] sm:$0xff] }
 0xb65   :  { %5184 = vpow2.f32 %v4804_v26  ;;  %v3263_v5 = vadd.f32 %v7261_v30, %v6711_v12 }
 0xb66   :  { %5186 = vpow2.f32 %v4805_v10 }
 0xb67   :  { %5188 = vtanh.f32 %v3827_v57 }
 0xb6e   :  { %v5183_v1 = vpop.eup %5182 }
 0xb6f   :  { %v5185_v50 = vpop.eup %5184  ;;  %v3832_v20 = vadd.f32 1.0, %v5183_v1 }
 0xb70   :  { %v3838_v14 = vadd.f32 1.0, %v5185_v50  ;;  %v5187_v27 = vpop.eup %5186 }
 0xb71   :  { %5190 = vrcp.f32 %v3832_v20  ;;  %v5189_v18 = vpop.eup %5188  ;;  %v3845_v19 = vadd.f32 1.0, %v5187_v27 }
 0xb72   :  { %5192 = vrcp.f32 %v3838_v14 }
 0xb73   :  { %5194 = vrcp.f32 %v3845_v19 }
 0xb7b   :  { %v5191_v28 = vpop.eup %5190 }
 0xb7c   :  { %v5193_v42 = vpop.eup %5192  ;;  %v3849_v63 = vmul.f32 %v5191_v28, %v5189_v18 }
 0xb7d   :  { %v3848_v16 = vmul.f32 %v5193_v42, %v6767_v9  ;;  %v5195_v51 = vpop.eup %5194  ;;  %v7258_v9 = vld [vmem:[#allocation9_spill] sm:$0xff] }
 0xb7e   :  { %v3188_v40 = vadd.f32 %v7258_v9, %v6695_v21 }
 0xb7f   :  { %v6813_v17 = vadd.f32 %v3849_v63, %v3848_v16 }
 0xb81   :  { %5196 = vtanh.f32 %v6813_v17 }
 0xb8b   :  { %v5197_v7 = vpop.eup %5196 }
 0xb8c   :  { %v3852_v58 = vmul.f32 %v5197_v7, %v5195_v51 }
 0xb8e   :  { %v3857_v57 = vpack.c.bf16 %v3852_v58, %v3852_v58 }
 0xb90   :  { %3891 = vmatmul.mubr.bf16.vlgmr.msra.gmra.mrb[76].mxu0 %v3857_v57  ;;  %3932 = vmatmul.mubr.bf16.vlgmr.msra.gmra.mrb[76].mxu1 %v3857_v57 }
 0xb91   :  { %3974 = vmatpush1.bf16.msra.mxu0 %v6401_v48  ;;  %4015 = vmatpush1.bf16.msra.mxu1 %v6412_v45 }
 0xb92   :  { %3975 = vmatprep.subr.bf16.mxu0 %v6419_v52  ;;  %4016 = vmatprep.subr.bf16.mxu1 %v6424_v60 }
 0xb93   :  { %4005 = vmatprep.mubr.bf16.mxu0 %v7206_v43  ;;  %4046 = vmatprep.mubr.bf16.mxu1 %v7206_v43 }
 0xb95   :  { %3976 = vmatpush1.bf16.msra.mxu0 %v6430_v31  ;;  %4017 = vmatpush1.bf16.msra.mxu1 %v6435_v33 }
 0xb96   :  { %3977 = vmatprep.subr.bf16.mxu0 %v6443_v24  ;;  %4018 = vmatprep.subr.bf16.mxu1 %v6448_v38 }
 0xb99   :  { %3978 = vmatpush1.bf16.msra.mxu0 %v6454_v59  ;;  %4019 = vmatpush1.bf16.msra.mxu1 %v6459_v15 }
 0xb9a   :  { %3979 = vmatprep.subr.bf16.mxu0 %v6467_v13  ;;  %4020 = vmatprep.subr.bf16.mxu1 %v6477_v39 }
 0xb9d   :  { %3980 = vmatpush1.bf16.msra.mxu0 %v6472_v25  ;;  %4021 = vmatpush1.bf16.msra.mxu1 %v6483_v32 }
 0xb9e   :  { %3981 = vmatprep.subr.bf16.mxu0 %v6491_v29  ;;  %4022 = vmatprep.subr.bf16.mxu1 %v6496_v53 }
 0xba1   :  { %3982 = vmatpush1.bf16.msra.mxu0 %v6502_v6  ;;  %4023 = vmatpush1.bf16.msra.mxu1 %v6507_v35 }
 0xba2   :  { %3983 = vmatprep.subr.bf16.mxu0 %v6515_v47  ;;  %4024 = vmatprep.subr.bf16.mxu1 %v6525_v34 }
 0xba5   :  { %3984 = vmatpush1.bf16.msra.mxu0 %v6520_v61  ;;  %4025 = vmatpush1.bf16.msra.mxu1 %v6531_v62 }
 0xba6   :  { %3985 = vmatprep.subr.bf16.mxu0 %v6539_v0  ;;  %4026 = vmatprep.subr.bf16.mxu1 %v6544_v44 }
 0xba9   :  { %3986 = vmatpush1.bf16.msra.mxu0 %v6550_v49  ;;  %4027 = vmatpush1.bf16.msra.mxu1 %v6555_v36 }
 0xbaa   :  { %3987 = vmatprep.subr.bf16.mxu0 %v6563_v8  ;;  %4028 = vmatprep.subr.bf16.mxu1 %v6573_v4 }
 0xbad   :  { %3988 = vmatpush1.bf16.msra.mxu0 %v6568_v37  ;;  %4029 = vmatpush1.bf16.msra.mxu1 %v6579_v41 }
 0xbae   :  { %4088 = vmatprep.subr.bf16.mxu0 %v6396_v11  ;;  %4129 = vmatprep.subr.bf16.mxu1 %v6407_v54 }
 0xc63   :  { %v3892_v2 = vpop.f32.mrb[76].mxu0  ;;  %v3933_v26 = vpop.f32.mrb[76].mxu1 }
 0xc64   :  { %v3940_v10 = vadd.f32 %v3892_v2, %v3188_v40  ;;  %v3942_v1 = vadd.f32 %v3933_v26, %v3261_v56  ;;  %v3894_v50 = vpop.f32.mrb[77].mxu0  ;;  %v3935_v11 = vpop.f32.mrb[77].mxu1 }
 0xc65   :  { %v3941_v20 = vadd.f32 %v3894_v50, %v3190_v55  ;;  %v3943_v54 = vadd.f32 %v3935_v11, %v3263_v5  ;;  %v3896_v14 = vpop.f32.mrb[78].mxu0  ;;  %v3937_v27 = vpop.f32.mrb[78].mxu1 }
 0xc66   :  { %v4806_v18 = vmul.f32 -1.442695, %v3940_v10  ;;  %v3897_v28 = vpop.f32.mrb[79].mxu0  ;;  %v3938_v42 = vpop.f32.mrb[79].mxu1 }
 0xc67   :  { %v4807_v63 = vmul.f32 -1.442695, %v3941_v20  ;;  %v4808_v19 = vmul.f32 -1.442695, %v3943_v54 }
 0xc68   :  { %5198 = vpow2.f32 %v4806_v18 }
 0xc69   :  { %5200 = vpow2.f32 %v4807_v63  ;;  %v6921_v63 = vld [vmem:[%s7173_s7] ss:$16 sps:$4 sm:$0xff]  }
 0xc6a   :  { %5202 = vpow2.f32 %v4808_v19  ;;  %v6927_v19 = vld [vmem:[%s7173_s7 + $0x8] ss:$16 sps:$4 sm:$0xff]  }
 0xc6b   :  { %5204 = vtanh.f32 %v3942_v1 }
 0xc72   :  { %v5199_v16 = vpop.eup %5198 }
 0xc73   :  { %v5201_v51 = vpop.eup %5200  ;;  %v3947_v7 = vadd.f32 1.0, %v5199_v16  ;;  %v6933_v16 = vld [vmem:[%s7173_s7 + $0x24] ss:$16 sps:$4 sm:$0xff]  }
 0xc74   :  { %v3953_v58 = vadd.f32 1.0, %v5201_v51  ;;  %v5203_v57 = vpop.eup %5202  ;;  %v6939_v51 = vld [vmem:[%s7173_s7 + $0x2c] ss:$16 sps:$4 sm:$0xff]  }
 0xc75   :  { %5206 = vrcp.f32 %v3947_v7  ;;  %v5205_v9 = vpop.eup %5204  ;;  %v3960_v46 = vadd.f32 1.0, %v5203_v57  ;;  %v6947_v7 = vld [vmem:[%s7173_s7 + $0x20] ss:$16 sps:$4 sm:$0xff]   ;;  %v6959_v57 = vld [vmem:[%s7173_s7 + $0x44] ss:$16 sps:$4 sm:$0xff]  }
 0xc76   :  { %5208 = vrcp.f32 %v3953_v58  ;;  %v6953_v58 = vld [vmem:[%s7173_s7 + $0x28] ss:$16 sps:$4 sm:$0xff]  }
 0xc77   :  { %5210 = vrcp.f32 %v3960_v46  ;;  %v6989_v46 = vld [vmem:[%s7173_s7 + $0x6c] ss:$16 sps:$4 sm:$0xff]  }
 0xc7f   :  { %v5207_v40 = vpop.eup %5206 }
 0xc80   :  { %v5209_v22 = vpop.eup %5208  ;;  %v3964_v56 = vmul.f32 %v5207_v40, %v5205_v9  ;;  %v6965_v9 = vld [vmem:[%s7173_s7 + $0x4c] ss:$16 sps:$4 sm:$0xff]   ;;  %v6971_v40 = vld [vmem:[%s7173_s7 + $0x40] ss:$16 sps:$4 sm:$0xff]  }
 0xc81   :  { %v3963_v55 = vmul.f32 %v5209_v22, %v6813_v17  ;;  %v5211_v5 = vpop.eup %5210  ;;  %v6977_v22 = vld [vmem:[%s7173_s7 + $0x48] ss:$16 sps:$4 sm:$0xff]  }
 0xc83   :  { %v6859_v30 = vadd.f32 %v3964_v56, %v3963_v55  ;;  %v6983_v56 = vld [vmem:[%s7173_s7 + $0x64] ss:$16 sps:$4 sm:$0xff]   ;;  %v6995_v55 = vld [vmem:[%s7173_s7 + $0x60] ss:$16 sps:$4 sm:$0xff]  }
 0xc85   :  { %5212 = vtanh.f32 %v6859_v30 }
 0xc8f   :  { %v5213_v2 = vpop.eup %5212 }
 0xc90   :  { %v3967_v26 = vmul.f32 %v5213_v2, %v5211_v5  ;;  %v7007_v5 = vld [vmem:[%s7173_s7 + $0x84] ss:$16 sps:$4 sm:$0xff]   ;;  %v7013_v2 = vld [vmem:[%s7173_s7 + $0x8c] ss:$16 sps:$4 sm:$0xff]  }
 0xc92   :  { %v3972_v10 = vpack.c.bf16 %v3967_v26, %v3967_v26  ;;  %v7019_v26 = vld [vmem:[%s7173_s7 + $0x80] ss:$16 sps:$4 sm:$0xff]  }
 0xc94   :  { %4006 = vmatmul.mubr.bf16.vlgmr.msra.gmra.mrb[80].mxu0 %v3972_v10  ;;  %4047 = vmatmul.mubr.bf16.vlgmr.msra.gmra.mrb[80].mxu1 %v3972_v10  ;;  %v7025_v10 = vld [vmem:[%s7173_s7 + $0x88] ss:$16 sps:$4 sm:$0xff]  }
 0xc95   :  { %4089 = vmatpush1.bf16.msra.mxu0 %v6401_v48  ;;  %4130 = vmatpush1.bf16.msra.mxu1 %v6412_v45  ;;  %v6897_v48 = vld [vmem:[%s7173_s7 + $0x4] ss:$16 sps:$4 sm:$0xff]   ;;  %v6903_v45 = vld [vmem:[%s7173_s7 + $0xc] ss:$16 sps:$4 sm:$0xff]  }
 0xc96   :  { %4090 = vmatprep.subr.bf16.mxu0 %v6419_v52  ;;  %4131 = vmatprep.subr.bf16.mxu1 %v6424_v60  ;;  %v7262_v52 = vld [vmem:[#allocation13_spill] sm:$0xff] }
 0xc97   :  { %4120 = vmatprep.mubr.bf16.mxu0 %v7206_v43  ;;  %4161 = vmatprep.mubr.bf16.mxu1 %v7206_v43  ;;  %v3194_v60 = vadd.f32 %v7262_v52, %v6695_v21  ;;  %v7031_v52 = vld [vmem:[%s7173_s7 + $0xa4] ss:$16 sps:$4 sm:$0xff]  }
 0xc99   :  { %4091 = vmatpush1.bf16.msra.mxu0 %v6430_v31  ;;  %4132 = vmatpush1.bf16.msra.mxu1 %v6435_v33  ;;  %v7263_v31 = vld [vmem:[#allocation14_spill] sm:$0xff] }
 0xc9a   :  { %4092 = vmatprep.subr.bf16.mxu0 %v6443_v24  ;;  %4133 = vmatprep.subr.bf16.mxu1 %v6448_v38  ;;  %v3267_v33 = vadd.f32 %v7263_v31, %v6699_v3  ;;  %v7264_v24 = vld [vmem:[#allocation15_spill] sm:$0xff]  ;;  %v7043_v31 = vld [vmem:[%s7173_s7 + $0xa0] ss:$16 sps:$4 sm:$0xff]  }
 0xc9b   :  { %v3196_v38 = vadd.f32 %v7264_v24, %v6707_v23  ;;  %v7055_v24 = vld [vmem:[%s7173_s7 + $0xc4] ss:$16 sps:$4 sm:$0xff]  }
 0xc9d   :  { %4093 = vmatpush1.bf16.msra.mxu0 %v6454_v59  ;;  %4134 = vmatpush1.bf16.msra.mxu1 %v6459_v15  ;;  %v7265_v59 = vld [vmem:[#allocation16_spill] sm:$0xff] }
 0xc9e   :  { %4094 = vmatprep.subr.bf16.mxu0 %v6467_v13  ;;  %4135 = vmatprep.subr.bf16.mxu1 %v6477_v39  ;;  %v3269_v15 = vadd.f32 %v7265_v59, %v6711_v12  ;;  %v7067_v59 = vld [vmem:[%s7173_s7 + $0xc0] ss:$16 sps:$4 sm:$0xff]  }
 0xca1   :  { %4095 = vmatpush1.bf16.msra.mxu0 %v6472_v25  ;;  %4136 = vmatpush1.bf16.msra.mxu1 %v6483_v32 }
 0xca2   :  { %4096 = vmatprep.subr.bf16.mxu0 %v6491_v29  ;;  %4137 = vmatprep.subr.bf16.mxu1 %v6496_v53 }
 0xca5   :  { %4097 = vmatpush1.bf16.msra.mxu0 %v6502_v6  ;;  %4138 = vmatpush1.bf16.msra.mxu1 %v6507_v35 }
 0xca6   :  { %4098 = vmatprep.subr.bf16.mxu0 %v6515_v47  ;;  %4139 = vmatprep.subr.bf16.mxu1 %v6525_v34 }
 0xca9   :  { %4099 = vmatpush1.bf16.msra.mxu0 %v6520_v61  ;;  %4140 = vmatpush1.bf16.msra.mxu1 %v6531_v62 }
 0xcaa   :  { %4100 = vmatprep.subr.bf16.mxu0 %v6539_v0  ;;  %4141 = vmatprep.subr.bf16.mxu1 %v6544_v44 }
 0xcad   :  { %4101 = vmatpush1.bf16.msra.mxu0 %v6550_v49  ;;  %4142 = vmatpush1.bf16.msra.mxu1 %v6555_v36 }
 0xcae   :  { %4102 = vmatprep.subr.bf16.mxu0 %v6563_v8  ;;  %4143 = vmatprep.subr.bf16.mxu1 %v6573_v4 }
 0xcb1   :  { %4103 = vmatpush1.bf16.msra.mxu0 %v6568_v37  ;;  %4144 = vmatpush1.bf16.msra.mxu1 %v6579_v41 }
 0xcb2   :  { %4203 = vmatprep.subr.bf16.mxu0 %v6897_v48  ;;  %4244 = vmatprep.subr.bf16.mxu1 %v6903_v45 }
 0xd67   :  { %v4007_v13 = vpop.f32.mrb[80].mxu0  ;;  %v4048_v25 = vpop.f32.mrb[80].mxu1 }
 0xd68   :  { %v4055_v39 = vadd.f32 %v4007_v13, %v3194_v60  ;;  %v4057_v32 = vadd.f32 %v4048_v25, %v3267_v33  ;;  %v4009_v29 = vpop.f32.mrb[81].mxu0  ;;  %v4050_v53 = vpop.f32.mrb[81].mxu1  ;;  %v7037_v60 = vld [vmem:[%s7173_s7 + $0xac] ss:$16 sps:$4 sm:$0xff]   ;;  %v7049_v33 = vld [vmem:[%s7173_s7 + $0xa8] ss:$16 sps:$4 sm:$0xff]  }
 0xd69   :  { %v4056_v6 = vadd.f32 %v4009_v29, %v3196_v38  ;;  %v4058_v35 = vadd.f32 %v4050_v53, %v3269_v15  ;;  %v4011_v47 = vpop.f32.mrb[82].mxu0  ;;  %v4052_v61 = vpop.f32.mrb[82].mxu1  ;;  %v7061_v38 = vld [vmem:[%s7173_s7 + $0xcc] ss:$16 sps:$4 sm:$0xff]   ;;  %v7073_v15 = vld [vmem:[%s7173_s7 + $0xc8] ss:$16 sps:$4 sm:$0xff]  }
 0xd6a   :  { %v4809_v34 = vmul.f32 -1.442695, %v4055_v39  ;;  %v4012_v62 = vpop.f32.mrb[83].mxu0  ;;  %v4053_v0 = vpop.f32.mrb[83].mxu1  ;;  %v7079_v13 = vld [vmem:[%s7173_s7 + $0xe4] ss:$16 sps:$4 sm:$0xff]  }
 0xd6b   :  { %v4810_v44 = vmul.f32 -1.442695, %v4056_v6  ;;  %v4811_v49 = vmul.f32 -1.442695, %v4058_v35  ;;  %v7085_v25 = vld [vmem:[%s7173_s7 + $0xec] ss:$16 sps:$4 sm:$0xff]  }
 0xd6c   :  { %5214 = vpow2.f32 %v4809_v34  ;;  %v7091_v39 = vld [vmem:[%s7173_s7 + $0xe0] ss:$16 sps:$4 sm:$0xff]   ;;  %v7266_v29 = vld [vmem:[#allocation17_spill] sm:$0xff]  ;;  %v7268_v47 = vld [vmem:[#allocation19_spill] sm:$0xff] }
 0xd6d   :  { %5216 = vpow2.f32 %v4810_v44  ;;  %v3198_v53 = vadd.f32 %v7266_v29, %v6695_v21  ;;  %v7267_v6 = vld [vmem:[#allocation18_spill] sm:$0xff]  ;;  %v3200_v61 = vadd.f32 %v7268_v47, %v6707_v23  ;;  %v7269_v34 = vld [vmem:[#allocation20_spill] sm:$0xff] }
 0xd6e   :  { %5218 = vpow2.f32 %v4811_v49  ;;  %v3271_v35 = vadd.f32 %v7267_v6, %v6699_v3  ;;  %v3273_v62 = vadd.f32 %v7269_v34, %v6711_v12 }
 0xd6f   :  { %5220 = vtanh.f32 %v4057_v32  ;;  %v7097_v32 = vld [vmem:[%s7173_s7 + $0xe8] ss:$16 sps:$4 sm:$0xff]  }
 0xd76   :  { %v5215_v36 = vpop.eup %5214 }
 0xd77   :  { %v5217_v8 = vpop.eup %5216  ;;  %v4062_v37 = vadd.f32 1.0, %v5215_v36 }
 0xd78   :  { %v4068_v4 = vadd.f32 1.0, %v5217_v8  ;;  %v5219_v41 = vpop.eup %5218 }
 0xd79   :  { %5222 = vrcp.f32 %v4062_v37  ;;  %v5221_v17 = vpop.eup %5220  ;;  %v4075_v20 = vadd.f32 1.0, %v5219_v41 }
 0xd7a   :  { %5224 = vrcp.f32 %v4068_v4 }
 0xd7b   :  { %5226 = vrcp.f32 %v4075_v20 }
 0xd83   :  { %v5223_v1 = vpop.eup %5222 }
 0xd84   :  { %v5225_v50 = vpop.eup %5224  ;;  %v4079_v11 = vmul.f32 %v5223_v1, %v5221_v17 }
 0xd85   :  { %v4078_v54 = vmul.f32 %v5225_v50, %v6859_v30  ;;  %v5227_v27 = vpop.eup %5226  ;;  %v7001_v30 = vld [vmem:[%s7173_s7 + $0x68] ss:$16 sps:$4 sm:$0xff]  }
 0xd87   :  { %v6915_v14 = vadd.f32 %v4079_v11, %v4078_v54 }
 0xd89   :  { %5228 = vtanh.f32 %v6915_v14 }
 0xd93   :  { %v5229_v18 = vpop.eup %5228 }
 0xd94   :  { %v4082_v28 = vmul.f32 %v5229_v18, %v5227_v27 }
 0xd96   :  { %v4087_v42 = vpack.c.bf16 %v4082_v28, %v4082_v28 }
 0xd98   :  { %4121 = vmatmul.mubr.bf16.vlgmr.msra.gmra.mrb[84].mxu0 %v4087_v42  ;;  %4162 = vmatmul.mubr.bf16.vlgmr.msra.gmra.mrb[84].mxu1 %v4087_v42 }
 0xd99   :  { %4204 = vmatpush1.bf16.msra.mxu0 %v6921_v63  ;;  %4245 = vmatpush1.bf16.msra.mxu1 %v6927_v19 }
 0xd9a   :  { %4205 = vmatprep.subr.bf16.mxu0 %v6933_v16  ;;  %4246 = vmatprep.subr.bf16.mxu1 %v6939_v51 }
 0xd9b   :  { %4235 = vmatprep.mubr.bf16.mxu0 %v7206_v43  ;;  %4276 = vmatprep.mubr.bf16.mxu1 %v7206_v43 }
 0xd9d   :  { %4206 = vmatpush1.bf16.msra.mxu0 %v6947_v7  ;;  %4247 = vmatpush1.bf16.msra.mxu1 %v6953_v58 }
 0xd9e   :  { %4207 = vmatprep.subr.bf16.mxu0 %v6959_v57  ;;  %4248 = vmatprep.subr.bf16.mxu1 %v6965_v9 }
 0xda1   :  { %4208 = vmatpush1.bf16.msra.mxu0 %v6971_v40  ;;  %4249 = vmatpush1.bf16.msra.mxu1 %v6977_v22 }
 0xda2   :  { %4209 = vmatprep.subr.bf16.mxu0 %v6983_v56  ;;  %4250 = vmatprep.subr.bf16.mxu1 %v6989_v46 }
 0xda5   :  { %4210 = vmatpush1.bf16.msra.mxu0 %v6995_v55  ;;  %4251 = vmatpush1.bf16.msra.mxu1 %v7001_v30 }
 0xda6   :  { %4211 = vmatprep.subr.bf16.mxu0 %v7007_v5  ;;  %4252 = vmatprep.subr.bf16.mxu1 %v7013_v2 }
 0xda9   :  { %4212 = vmatpush1.bf16.msra.mxu0 %v7019_v26  ;;  %4253 = vmatpush1.bf16.msra.mxu1 %v7025_v10 }
 0xdaa   :  { %4213 = vmatprep.subr.bf16.mxu0 %v7031_v52  ;;  %4254 = vmatprep.subr.bf16.mxu1 %v7037_v60 }
 0xdad   :  { %4214 = vmatpush1.bf16.msra.mxu0 %v7043_v31  ;;  %4255 = vmatpush1.bf16.msra.mxu1 %v7049_v33 }
 0xdae   :  { %4215 = vmatprep.subr.bf16.mxu0 %v7055_v24  ;;  %4256 = vmatprep.subr.bf16.mxu1 %v7061_v38 }
 0xdb1   :  { %4216 = vmatpush1.bf16.msra.mxu0 %v7067_v59  ;;  %4257 = vmatpush1.bf16.msra.mxu1 %v7073_v15 }
 0xdb2   :  { %4217 = vmatprep.subr.bf16.mxu0 %v7079_v13  ;;  %4258 = vmatprep.subr.bf16.mxu1 %v7085_v25 }
 0xdb5   :  { %4218 = vmatpush1.bf16.msra.mxu0 %v7091_v39  ;;  %4259 = vmatpush1.bf16.msra.mxu1 %v7097_v32 }
 0xdb6   :  { %4318 = vmatprep.subr.bf16.mxu0 %v6897_v48  ;;  %4359 = vmatprep.subr.bf16.mxu1 %v6903_v45 }
 0xe6b   :  { %v4122_v0 = vpop.f32.mrb[84].mxu0  ;;  %v4163_v44 = vpop.f32.mrb[84].mxu1 }
 0xe6c   :  { %v4170_v49 = vadd.f32 %v4122_v0, %v3198_v53  ;;  %v4172_v36 = vadd.f32 %v4163_v44, %v3271_v35  ;;  %v4124_v8 = vpop.f32.mrb[85].mxu0  ;;  %v4165_v48 = vpop.f32.mrb[85].mxu1 }
 0xe6d   :  { %v4171_v37 = vadd.f32 %v4124_v8, %v3200_v61  ;;  %v4173_v45 = vadd.f32 %v4165_v48, %v3273_v62  ;;  %v4126_v4 = vpop.f32.mrb[86].mxu0  ;;  %v4167_v41 = vpop.f32.mrb[86].mxu1 }
 0xe6e   :  { %v4812_v17 = vmul.f32 -1.442695, %v4170_v49  ;;  %v4127_v1 = vpop.f32.mrb[87].mxu0  ;;  %v4168_v50 = vpop.f32.mrb[87].mxu1 }
 0xe6f   :  { %v4813_v11 = vmul.f32 -1.442695, %v4171_v37  ;;  %v4814_v20 = vmul.f32 -1.442695, %v4173_v45  ;;  %v7275_v50 = vld [vmem:[#allocation26_spill] sm:$0xff] }
 0xe70   :  { %5230 = vpow2.f32 %v4812_v17  ;;  %v7274_v17 = vld [vmem:[#allocation25_spill] sm:$0xff] }
 0xe71   :  { %5232 = vpow2.f32 %v4813_v11  ;;  %v3208_v1 = vadd.f32 %v7274_v17, %v6695_v21  ;;  %v3281_v11 = vadd.f32 %v7275_v50, %v6699_v3 }
 0xe72   :  { %5234 = vpow2.f32 %v4814_v20  ;;  %v7276_v20 = vld [vmem:[#allocation5_spill] sm:$0xff] }
 0xe73   :  { %5236 = vtanh.f32 %v4172_v36 }
 0xe7a   :  { %v5231_v54 = vpop.eup %5230 }
 0xe7b   :  { %v5233_v27 = vpop.eup %5232  ;;  %v4177_v18 = vadd.f32 1.0, %v5231_v54  ;;  %v3210_v54 = vadd.f32 %v7276_v20, %v6707_v23 }
 0xe7c   :  { %v4183_v28 = vadd.f32 1.0, %v5233_v27  ;;  %v5235_v42 = vpop.eup %5234  ;;  %v7277_v27 = vld [vmem:[#allocation4_spill] sm:$0xff] }
 0xe7d   :  { %5238 = vrcp.f32 %v4177_v18  ;;  %v5237_v29 = vpop.eup %5236  ;;  %v4190_v47 = vadd.f32 1.0, %v5235_v42  ;;  %v3283_v18 = vadd.f32 %v7277_v27, %v6711_v12 }
 0xe7e   :  { %5240 = vrcp.f32 %v4183_v28 }
 0xe7f   :  { %5242 = vrcp.f32 %v4190_v47 }
 0xe87   :  { %v5239_v53 = vpop.eup %5238 }
 0xe88   :  { %v5241_v6 = vpop.eup %5240  ;;  %v4194_v35 = vmul.f32 %v5239_v53, %v5237_v29 }
 0xe89   :  { %v4193_v61 = vmul.f32 %v5241_v6, %v6915_v14  ;;  %v5243_v62 = vpop.eup %5242 }
 0xe8b   :  { %v7111_v34 = vadd.f32 %v4194_v35, %v4193_v61 }
 0xe8d   :  { %5244 = vtanh.f32 %v7111_v34 }
 0xe97   :  { %v5245_v0 = vpop.eup %5244 }
 0xe98   :  { %v4197_v44 = vmul.f32 %v5245_v0, %v5243_v62 }
 0xe9a   :  { %v4202_v49 = vpack.c.bf16 %v4197_v44, %v4197_v44 }
 0xe9c   :  { %4236 = vmatmul.mubr.bf16.vlgmr.msra.gmra.mrb[88].mxu0 %v4202_v49  ;;  %4277 = vmatmul.mubr.bf16.vlgmr.msra.gmra.mrb[88].mxu1 %v4202_v49 }
 0xe9d   :  { %4319 = vmatpush1.bf16.msra.mxu0 %v6921_v63  ;;  %4360 = vmatpush1.bf16.msra.mxu1 %v6927_v19  ;;  %v7271_v63 = vld [vmem:[#allocation22_spill] sm:$0xff] }
 0xe9e   :  { %4320 = vmatprep.subr.bf16.mxu0 %v6933_v16  ;;  %4361 = vmatprep.subr.bf16.mxu1 %v6939_v51  ;;  %v3277_v19 = vadd.f32 %v7271_v63, %v6699_v3  ;;  %v7272_v16 = vld [vmem:[#allocation23_spill] sm:$0xff] }
 0xe9f   :  { %4350 = vmatprep.mubr.bf16.mxu0 %v7206_v43  ;;  %4391 = vmatprep.mubr.bf16.mxu1 %v7206_v43  ;;  %v7270_v43 = vld [vmem:[#allocation21_spill] sm:$0xff]  ;;  %v3206_v51 = vadd.f32 %v7272_v16, %v6707_v23 }
 0xea0   :  { %v3204_v14 = vadd.f32 %v7270_v43, %v6695_v21 }
 0xea1   :  { %4321 = vmatpush1.bf16.msra.mxu0 %v6947_v7  ;;  %4362 = vmatpush1.bf16.msra.mxu1 %v6953_v58  ;;  %v7273_v7 = vld [vmem:[#allocation24_spill] sm:$0xff] }
 0xea2   :  { %4322 = vmatprep.subr.bf16.mxu0 %v6959_v57  ;;  %4363 = vmatprep.subr.bf16.mxu1 %v6965_v9  ;;  %v3279_v58 = vadd.f32 %v7273_v7, %v6711_v12 }
 0xea5   :  { %4323 = vmatpush1.bf16.msra.mxu0 %v6971_v40  ;;  %4364 = vmatpush1.bf16.msra.mxu1 %v6977_v22 }
 0xea6   :  { %4324 = vmatprep.subr.bf16.mxu0 %v6983_v56  ;;  %4365 = vmatprep.subr.bf16.mxu1 %v6989_v46 }
 0xea9   :  { %4325 = vmatpush1.bf16.msra.mxu0 %v6995_v55  ;;  %4366 = vmatpush1.bf16.msra.mxu1 %v7001_v30 }
 0xeaa   :  { %4326 = vmatprep.subr.bf16.mxu0 %v7007_v5  ;;  %4367 = vmatprep.subr.bf16.mxu1 %v7013_v2 }
 0xead   :  { %4327 = vmatpush1.bf16.msra.mxu0 %v7019_v26  ;;  %4368 = vmatpush1.bf16.msra.mxu1 %v7025_v10 }
 0xeae   :  { %4328 = vmatprep.subr.bf16.mxu0 %v7031_v52  ;;  %4369 = vmatprep.subr.bf16.mxu1 %v7037_v60 }
 0xeb1   :  { %4329 = vmatpush1.bf16.msra.mxu0 %v7043_v31  ;;  %4370 = vmatpush1.bf16.msra.mxu1 %v7049_v33 }
 0xeb2   :  { %4330 = vmatprep.subr.bf16.mxu0 %v7055_v24  ;;  %4371 = vmatprep.subr.bf16.mxu1 %v7061_v38 }
 0xeb5   :  { %4331 = vmatpush1.bf16.msra.mxu0 %v7067_v59  ;;  %4372 = vmatpush1.bf16.msra.mxu1 %v7073_v15 }
 0xeb6   :  { %4332 = vmatprep.subr.bf16.mxu0 %v7079_v13  ;;  %4373 = vmatprep.subr.bf16.mxu1 %v7085_v25 }
 0xeb9   :  { %4333 = vmatpush1.bf16.msra.mxu0 %v7091_v39  ;;  %4374 = vmatpush1.bf16.msra.mxu1 %v7097_v32 }
 0xf6f   :  { %v4237_v57 = vpop.f32.mrb[88].mxu0  ;;  %v4278_v9 = vpop.f32.mrb[88].mxu1 }
 0xf70   :  { %v4285_v40 = vadd.f32 %v4237_v57, %v3204_v14  ;;  %v4287_v22 = vadd.f32 %v4278_v9, %v3277_v19  ;;  %v4239_v56 = vpop.f32.mrb[89].mxu0  ;;  %v4280_v46 = vpop.f32.mrb[89].mxu1 }
 0xf71   :  { %v4286_v55 = vadd.f32 %v4239_v56, %v3206_v51  ;;  %v4288_v30 = vadd.f32 %v4280_v46, %v3279_v58  ;;  %v4241_v5 = vpop.f32.mrb[90].mxu0  ;;  %v4282_v2 = vpop.f32.mrb[90].mxu1 }
 0xf72   :  { %v4815_v26 = vmul.f32 -1.442695, %v4285_v40  ;;  %v4242_v10 = vpop.f32.mrb[91].mxu0  ;;  %v4283_v52 = vpop.f32.mrb[91].mxu1 }
 0xf73   :  { %v4816_v60 = vmul.f32 -1.442695, %v4286_v55  ;;  %v4817_v31 = vmul.f32 -1.442695, %v4288_v30 }
 0xf74   :  { %5246 = vpow2.f32 %v4815_v26 }
 0xf75   :  { %5248 = vpow2.f32 %v4816_v60 }
 0xf76   :  { %5250 = vpow2.f32 %v4817_v31 }
 0xf77   :  { %5252 = vtanh.f32 %v4287_v22 }
 0xf7e   :  { %v5247_v33 = vpop.eup %5246 }
 0xf7f   :  { %v5249_v24 = vpop.eup %5248  ;;  %v4292_v38 = vadd.f32 1.0, %v5247_v33 }
 0xf80   :  { %v4298_v59 = vadd.f32 1.0, %v5249_v24  ;;  %v5251_v15 = vpop.eup %5250 }
 0xf81   :  { %5254 = vrcp.f32 %v4292_v38  ;;  %v5253_v13 = vpop.eup %5252  ;;  %v4305_v36 = vadd.f32 1.0, %v5251_v15 }
 0xf82   :  { %5256 = vrcp.f32 %v4298_v59 }
 0xf83   :  { %5258 = vrcp.f32 %v4305_v36 }
 0xf8b   :  { %v5255_v25 = vpop.eup %5254 }
 0xf8c   :  { %v5257_v39 = vpop.eup %5256  ;;  %v4309_v32 = vmul.f32 %v5255_v25, %v5253_v13 }
 0xf8d   :  { %v4308_v8 = vmul.f32 %v5257_v39, %v7111_v34  ;;  %v5259_v37 = vpop.eup %5258 }
 0xf8f   :  { %v4310_v48 = vadd.f32 %v4309_v32, %v4308_v8 }
 0xf91   :  { %5260 = vtanh.f32 %v4310_v48 }
 0xf9b   :  { %v5261_v45 = vpop.eup %5260 }
 0xf9c   :  { %v4312_v4 = vmul.f32 %v5261_v45, %v5259_v37 }
 0xf9e   :  { %v4317_v41 = vpack.c.bf16 %v4312_v4, %v4312_v4 }
 0xfa0   :  { %4351 = vmatmul.mubr.bf16.vlgmr.msra.gmra.mrb[92].mxu0 %v4317_v41  ;;  %4392 = vmatmul.mubr.bf16.vlgmr.msra.gmra.mrb[92].mxu1 %v4317_v41 }
0x1073   :  { %v4352_v28 = vpop.f32.mrb[92].mxu0  ;;  %v4393_v42 = vpop.f32.mrb[92].mxu1 }
0x1074   :  { %v4400_v29 = vadd.f32 %v4352_v28, %v3208_v1  ;;  %v4402_v53 = vadd.f32 %v4393_v42, %v3281_v11  ;;  %v4354_v6 = vpop.f32.mrb[93].mxu0  ;;  %v4395_v35 = vpop.f32.mrb[93].mxu1 }
0x1075   :  { %v4401_v47 = vadd.f32 %v4354_v6, %v3210_v54  ;;  %v4403_v61 = vadd.f32 %v4395_v35, %v3283_v18  ;;  %v4356_v34 = vpop.f32.mrb[94].mxu0  ;;  %v4397_v62 = vpop.f32.mrb[94].mxu1 }
0x1076   :  { %v4818_v21 = vmul.f32 -1.442695, %v4400_v29  ;;  %v4357_v0 = vpop.f32.mrb[95].mxu0  ;;  %v4398_v44 = vpop.f32.mrb[95].mxu1 }
0x1077   :  { %v4819_v3 = vmul.f32 -1.442695, %v4401_v47  ;;  %v4820_v23 = vmul.f32 -1.442695, %v4403_v61 }
0x1078   :  { %5262 = vpow2.f32 %v4818_v21 }
0x1079   :  { %5264 = vpow2.f32 %v4819_v3 }
0x107a   :  { %5266 = vpow2.f32 %v4820_v23 }
0x107b   :  { %5268 = vtanh.f32 %v4402_v53 }
0x1082   :  { %v5263_v49 = vpop.eup %5262 }
0x1083   :  { %v5265_v43 = vpop.eup %5264  ;;  %v4407_v12 = vadd.f32 1.0, %v5263_v49 }
0x1084   :  { %v4413_v14 = vadd.f32 1.0, %v5265_v43  ;;  %v5267_v63 = vpop.eup %5266 }
0x1085   :  { %5270 = vrcp.f32 %v4407_v12  ;;  %v5269_v19 = vpop.eup %5268  ;;  %v4420_v58 = vadd.f32 1.0, %v5267_v63 }
0x1086   :  { %5272 = vrcp.f32 %v4413_v14 }
0x1087   :  { %5274 = vrcp.f32 %v4420_v58 }
0x108f   :  { %v5271_v16 = vpop.eup %5270 }
0x1090   :  { %v5273_v51 = vpop.eup %5272  ;;  %v4424_v7 = vmul.f32 %v5271_v16, %v5269_v19 }
0x1091   :  { %v4423_v57 = vmul.f32 %v5273_v51, %v4310_v48  ;;  %v5275_v40 = vpop.eup %5274 }
0x1093   :  { %v4425_v9 = vadd.f32 %v4424_v7, %v4423_v57 }
0x1095   :  { %5276 = vtanh.f32 %v4425_v9 }
0x109f   :  { %v5277_v22 = vpop.eup %5276 }
0x10a0   :  { %v4427_v56 = vmul.f32 %v5277_v22, %v5275_v40 }
0x10a2   :  { %4428 = vst [vmem:[%s7175_s9] sm:$0xff] %v4427_v56 }

</bundles_post_ra>
